<compile_context>
chip_gen: v5e
topology: v5e:2x2
jax: 0.10.0
libtpu: 0.0.40
codegen_flags: <defaults>
</compile_context>

<pallas_src>
import jax
import jax.numpy as jnp
from jax.experimental import pallas as pl
from jax.experimental.pallas import tpu as pltpu


# ----------------------------- Pallas kernels -----------------------------

def _conv_relu_bn_pool_kernel(p_ref, w_ref, bst_ref, o_ref):
    # p_ref  : (K, 4*tm) bf16 -- im2col patches; the 4 pool taps of each tm-wide
    #          group of pooled pixels are contiguous along M.
    # w_ref  : (Cout, K) bf16 (VMEM-resident across the grid)
    # bst_ref: (Cout, 3) f32  -- packed [conv bias | bn scale | bn shift]
    # o_ref  : (Cout, tm) bf16 (lane-dense output tile)
    tm = o_ref.shape[1]
    # single MXU matmul per tile (pool taps fused into the M dimension)
    y = jnp.dot(w_ref[...], p_ref[...], preferred_element_type=jnp.float32)  # (Cout, 4*tm) f32
    b = bst_ref[:, 0:1]
    sc = bst_ref[:, 1:2]
    sh = bst_ref[:, 2:3]
    y = jnp.maximum(y + b, 0.0) * sc + sh          # F.relu(conv+bias) -> eval BN (f32 epilogue)
    # fused MaxPool2d(2): max over the 4 static tm-wide lane slices (one per tap)
    o = jnp.maximum(jnp.maximum(y[:, 0 * tm:1 * tm], y[:, 1 * tm:2 * tm]),
                    jnp.maximum(y[:, 2 * tm:3 * tm], y[:, 3 * tm:4 * tm]))
    o_ref[...] = o.astype(o_ref.dtype)             # cast to bf16 only at the store


def _mlp_kernel(x_ref, w1_ref, b1_ref, w2_ref, b2_ref, o_ref):
    # fc1 + relu + (dropout == identity at inference) + fc2 (lane-dense padded logits)
    h = jnp.dot(x_ref[...], w1_ref[...], preferred_element_type=jnp.float32) + b1_ref[...]
    h = jnp.maximum(h, 0.0).astype(w2_ref.dtype)
    # TODO(synk): nn.Dropout(0.5) train-mode RNG masking not implemented (identity in eval).
    o_ref[...] = jnp.dot(h, w2_ref[...], preferred_element_type=jnp.float32) + b2_ref[...]


# ----------------------------- glue helpers -----------------------------

def _round_up(x, m):
    return (x + m - 1) // m * m


def _pooled_patches_cm(x_cm):
    """Channel-major im2col grouped by 2x2 pool window.

    x_cm: (C, N, H, W) -> patches (4, C*9, N*Hh*Wh), Hh, Wh.
    Tap index = 2*dy + dx; K ordering = (c, ky, kx) matching (Cout, Cin, 3, 3) weights.
    """
    c, n, h, w = x_cm.shape
    hh, wh = h // 2, w // 2
    xp = jnp.pad(x_cm, ((0, 0), (0, 0), (1, 1), (1, 1)))
    cols = [xp[:, :, ky:ky + h, kx:kx + w] for ky in range(3) for kx in range(3)]
    p = jnp.stack(cols, axis=1)                       # (C, 9, N, H, W)
    p = p[:, :, :, :2 * hh, :2 * wh]                  # floor semantics of MaxPool2d(2)
    p = p.reshape(c, 9, n, hh, 2, wh, 2)              # axes: c, k9, n, i, dy, j, dx
    p = jnp.transpose(p, (4, 6, 0, 1, 2, 3, 5))       # (dy, dx, c, k9, n, i, j)
    return p.reshape(4, c * 9, n * hh * wh), hh, wh


def bn_fold(gamma, beta, mean, var, eps=1e-5):
    scale = gamma / jnp.sqrt(var + eps)
    shift = beta - mean * scale
    return scale.reshape(-1, 1), shift.reshape(-1, 1)


def _pick_tm(npix):
    # Big tiles (better HBM roofline, amortized ~0.35us/step grid overhead) while
    # still aiming for >=2 parallel grid steps when the problem allows (v7x: 2 TCs).
    tm = _round_up(max(1, (npix + 1) // 2), 128)
    return max(128, min(1024, tm))


# ----------------------------- pallas_call wrappers -----------------------------

def conv_relu_bn_pool(x_cm, w2d, bst):
    """Fused conv3x3(pad=1) -> relu -> BN -> maxpool2x2 for the whole batch.

    x_cm: (Cin, N, H, W).  w2d: (Cout, Cin*9) f32.  bst: (Cout, 3) f32 packed
    [bias, bn_scale, bn_shift].  Returns (Cout, N, Hh, Wh) bf16.
    """
    _, n, _, _ = x_cm.shape
    cout = w2d.shape[0]
    p, hh, wh = _pooled_patches_cm(x_cm.astype(jnp.bfloat16))   # (4, K, Np) bf16
    k, npix = p.shape[1], p.shape[2]

    tm = _pick_tm(npix)
    np_pad = _round_up(npix, tm)
    nt = np_pad // tm
    p = jnp.pad(p, ((0, 0), (0, 0), (0, np_pad - npix)))
    # M layout: tile-major, then tap, then pixel-in-tile -> per-tile block is (K, 4*tm)
    p = jnp.transpose(p.reshape(4, k, nt, tm), (1, 2, 0, 3)).reshape(k, nt * 4 * tm)

    out = pl.pallas_call(
        _conv_relu_bn_pool_kernel,
        out_shape=jax.ShapeDtypeStruct((cout, np_pad), jnp.bfloat16),
        grid=(nt,),
        in_specs=[
            pl.BlockSpec((k, 4 * tm), lambda i: (0, i)),        # patches (4 taps fused in M)
            pl.BlockSpec((cout, k), lambda i: (0, 0)),          # weight: VMEM-resident
            pl.BlockSpec((cout, 3), lambda i: (0, 0)),          # packed bias/scale/shift
        ],
        out_specs=pl.BlockSpec((cout, tm), lambda i: (0, i)),   # lane-dense bf16 tile
        compiler_params=pltpu.CompilerParams(
            dimension_semantics=("parallel",),
            # let XLA fuse the im2col pad/stack/transpose into the patch input
            # instead of materializing the ~9x patch tensor in HBM
            allow_input_fusion=[True, False, False],
        ),
    )(p, w2d.astype(jnp.bfloat16), bst)

    return out[:, :npix].reshape(cout, n, hh, wh)


def mlp(x, w1, b1, w2, b2):
    """fc1 -> relu -> dropout(identity) -> fc2; batch-tiled grid, lane-dense logits."""
    n, f = x.shape
    hdim = w1.shape[1]
    ncls = w2.shape[1]
    ncls_pad = _round_up(ncls, 128)                   # lane-dense logits, slice after
    w2p = jnp.zeros((hdim, ncls_pad), jnp.float32).at[:, :ncls].set(w2)
    b2p = jnp.zeros((1, ncls_pad), jnp.float32).at[:, :ncls].set(b2)

    if n <= 128:
        tn = _round_up(n, 8)
        n_pad = tn
    else:
        tn = 128
        n_pad = _round_up(n, tn)
    xp = jnp.pad(x.astype(jnp.bfloat16), ((0, n_pad - n), (0, 0)))

    out = pl.pallas_call(
        _mlp_kernel,
        out_shape=jax.ShapeDtypeStruct((n_pad, ncls_pad), jnp.float32),
        grid=(n_pad // tn,),
        in_specs=[
            pl.BlockSpec((tn, f), lambda i: (i, 0)),            # batch tile
            pl.BlockSpec((f, hdim), lambda i: (0, 0)),          # fc1 weight (resident)
            pl.BlockSpec((1, hdim), lambda i: (0, 0)),
            pl.BlockSpec((hdim, ncls_pad), lambda i: (0, 0)),   # fc2 weight (resident)
            pl.BlockSpec((1, ncls_pad), lambda i: (0, 0)),
        ],
        out_specs=pl.BlockSpec((tn, ncls_pad), lambda i: (i, 0)),
        compiler_params=pltpu.CompilerParams(dimension_semantics=("parallel",)),
    )(xp, w1.astype(jnp.bfloat16), b1, w2p.astype(jnp.bfloat16), b2p)
    return out[:n, :ncls]


# ----------------------------- params & forward -----------------------------

def init_params(key, input_channels=1, num_classes=10):
    assert input_channels in (1, 3) and num_classes >= 2
    ks = jax.random.split(key, 16)

    def nrm(k, shape, scl):
        return scl * jax.random.normal(k, shape, jnp.float32)

    p = {}
    # conv weights stored PyTorch-style (Cout, Cin, 3, 3); reshape(Cout, -1) matches
    # the (c, ky, kx) patch feature ordering used by _pooled_patches_cm.
    p["conv1_w"] = nrm(ks[0], (32, input_channels, 3, 3), (9 * input_channels) ** -0.5)
    p["conv1_b"] = nrm(ks[1], (32,), 0.05)
    p["conv2_w"] = nrm(ks[2], (64, 32, 3, 3), (9 * 32) ** -0.5)
    p["conv2_b"] = nrm(ks[3], (64,), 0.05)
    p["conv3_w"] = nrm(ks[4], (64, 64, 3, 3), (9 * 64) ** -0.5)
    p["conv3_b"] = nrm(ks[5], (64,), 0.05)
    for i, c, kg, kb in ((1, 32, 6, 7), (2, 64, 8, 9), (3, 64, 10, 11)):
        p[f"bn{i}_gamma"] = 1.0 + nrm(ks[kg], (c,), 0.1)
        p[f"bn{i}_beta"] = nrm(ks[kb], (c,), 0.1)
        p[f"bn{i}_mean"] = jnp.zeros((c,), jnp.float32)   # fresh running stats
        p[f"bn{i}_var"] = jnp.ones((c,), jnp.float32)
    p["fc1_w"] = nrm(ks[12], (64 * 3 * 3, 512), (64 * 3 * 3) ** -0.5)  # (in, out)
    p["fc1_b"] = nrm(ks[13], (512,), 0.05)
    p["fc2_w"] = nrm(ks[14], (512, num_classes), 512 ** -0.5)
    p["fc2_b"] = nrm(ks[15], (num_classes,), 0.05)
    return p


def _pack_bst(bias, gamma, beta, mean, var):
    sc, sh = bn_fold(gamma, beta, mean, var)
    return jnp.concatenate([bias.reshape(-1, 1), sc, sh], axis=1)   # (Cout, 3) f32


def cnn_forward(params, x_nchw):
    n = x_nchw.shape[0]
    # NCHW -> channel-major (C, N, H, W); channels stay on sublanes for all blocks.
    x = jnp.transpose(x_nchw.astype(jnp.float32), (1, 0, 2, 3))

    # block 1: conv1 -> relu -> bn1 -> pool   (one fused kernel)
    bst1 = _pack_bst(params["conv1_b"], params["bn1_gamma"], params["bn1_beta"],
                     params["bn1_mean"], params["bn1_var"])
    y = conv_relu_bn_pool(x, params["conv1_w"].reshape(32, -1), bst1)        # (32, N, 14, 14) bf16

    # block 2: conv2 -> relu -> bn2 -> pool
    bst2 = _pack_bst(params["conv2_b"], params["bn2_gamma"], params["bn2_beta"],
                     params["bn2_mean"], params["bn2_var"])
    y = conv_relu_bn_pool(y, params["conv2_w"].reshape(64, -1), bst2)        # (64, N, 7, 7) bf16

    # block 3: conv3 -> relu -> bn3 -> pool
    bst3 = _pack_bst(params["conv3_b"], params["bn3_gamma"], params["bn3_beta"],
                     params["bn3_mean"], params["bn3_var"])
    y = conv_relu_bn_pool(y, params["conv3_w"].reshape(64, -1), bst3)        # (64, N, 3, 3) bf16

    # flatten matching PyTorch x.view(N, -1) on NCHW layout: (c, h, w) feature order
    feat = jnp.transpose(y, (1, 0, 2, 3)).reshape(n, -1)                     # (N, 576) bf16

    # fc1 -> relu -> dropout(identity) -> fc2
    return mlp(feat,
               params["fc1_w"], params["fc1_b"].reshape(1, -1),
               params["fc2_w"], params["fc2_b"].reshape(1, -1))


if __name__ == "__main__":
    key = jax.random.PRNGKey(0)
    kp, kx = jax.random.split(key)
    num_classes = 10
    params = init_params(kp, input_channels=1, num_classes=num_classes)
    # 28x28 input (MNIST-like) is what fc1's 64*3*3 = 576 features imply
    # (28 -> pool 14 -> pool 7 -> pool 3).
    x = jax.random.normal(kx, (2, 1, 28, 28), jnp.float32)

    logits = jax.jit(cnn_forward)(params, x)
    jax.block_until_ready(logits)
    assert logits.shape == (2, num_classes)
    assert bool(jnp.all(jnp.isfinite(logits)))
    print("KERNEL_OK")
</pallas_src>

<mosaic_0001>
module attributes {stable_mosaic.version = 11 : i64} {
  func.func @_conv_relu_bn_pool_kernel(%arg0: i32, %arg1: memref<9x1024xbf16, #tpu.memory_space<vmem>>, %arg2: memref<32x9xbf16, #tpu.memory_space<vmem>>, %arg3: memref<32x3xf32, #tpu.memory_space<vmem>>, %arg4: memref<32x256xbf16, #tpu.memory_space<vmem>>) attributes {dimension_semantics = [#tpu.dimension_semantics<parallel>], iteration_bounds = array<i64: 2>, scalar_prefetch = 0 : i64, scratch_operands = 0 : i64, tpu.core_type = #tpu.core_type<tc>, window_params = [{transform_indices = @transform_0, window_bounds = array<i64: 9, 1024>}, {pipeline_mode = #tpu.pipeline_mode<synchronous>, transform_indices = @transform_1, window_bounds = array<i64: 32, 9>}, {pipeline_mode = #tpu.pipeline_mode<synchronous>, transform_indices = @transform_2, window_bounds = array<i64: 32, 3>}, {transform_indices = @transform_3, window_bounds = array<i64: 32, 256>}]} {
    %c0 = arith.constant 0 : index
    %c0_0 = arith.constant 0 : index
    %0 = vector.load %arg2[%c0, %c0_0] : memref<32x9xbf16, #tpu.memory_space<vmem>>, vector<32x9xbf16>
    %c0_1 = arith.constant 0 : index
    %c0_2 = arith.constant 0 : index
    %1 = vector.load %arg1[%c0_1, %c0_2] : memref<9x1024xbf16, #tpu.memory_space<vmem>>, vector<9x1024xbf16>
    %cst = arith.constant dense<0.000000e+00> : vector<32x1024xf32>
    %2 = tpu.matmul %0, %1, %cst {dimension_numbers = #tpu.dot_dimension_numbers<[1], [0], [0], [1], [0, 0, 1, 1], [], []>} : vector<32x9xbf16>, vector<9x1024xbf16>, vector<32x1024xf32> -> vector<32x1024xf32>
    %c0_3 = arith.constant 0 : index
    %c0_4 = arith.constant 0 : index
    %3 = vector.load %arg3[%c0_3, %c0_4] : memref<32x3xf32, #tpu.memory_space<vmem>>, vector<32x1xf32>
    %c0_5 = arith.constant 0 : index
    %c1 = arith.constant 1 : index
    %4 = vector.load %arg3[%c0_5, %c1] : memref<32x3xf32, #tpu.memory_space<vmem>>, vector<32x1xf32>
    %c0_6 = arith.constant 0 : index
    %c2 = arith.constant 2 : index
    %5 = vector.load %arg3[%c0_6, %c2] : memref<32x3xf32, #tpu.memory_space<vmem>>, vector<32x1xf32>
    %6 = vector.broadcast %3 : vector<32x1xf32> to vector<32x1024xf32>
    %7 = arith.addf %2, %6 : vector<32x1024xf32>
    %cst_7 = arith.constant 0.000000e+00 : f32
    %8 = vector.broadcast %cst_7 : f32 to vector<32x1024xf32>
    %9 = arith.maximumf %7, %8 : vector<32x1024xf32>
    %10 = vector.broadcast %4 : vector<32x1xf32> to vector<32x1024xf32>
    %11 = arith.mulf %9, %10 : vector<32x1024xf32>
    %12 = vector.broadcast %5 : vector<32x1xf32> to vector<32x1024xf32>
    %13 = arith.addf %11, %12 : vector<32x1024xf32>
    %14 = vector.extract_strided_slice %13 {offsets = [0, 0], sizes = [32, 256], strides = [1, 1]} : vector<32x1024xf32> to vector<32x256xf32>
    %15 = vector.extract_strided_slice %13 {offsets = [0, 256], sizes = [32, 256], strides = [1, 1]} : vector<32x1024xf32> to vector<32x256xf32>
    %16 = arith.maximumf %14, %15 : vector<32x256xf32>
    %17 = vector.extract_strided_slice %13 {offsets = [0, 512], sizes = [32, 256], strides = [1, 1]} : vector<32x1024xf32> to vector<32x256xf32>
    %18 = vector.extract_strided_slice %13 {offsets = [0, 768], sizes = [32, 256], strides = [1, 1]} : vector<32x1024xf32> to vector<32x256xf32>
    %19 = arith.maximumf %17, %18 : vector<32x256xf32>
    %20 = arith.maximumf %16, %19 : vector<32x256xf32>
    %21 = arith.truncf %20 : vector<32x256xf32> to vector<32x256xbf16>
    %c0_8 = arith.constant 0 : index
    %c0_9 = arith.constant 0 : index
    %22 = vector.load %arg4[%c0_8, %c0_9] : memref<32x256xbf16, #tpu.memory_space<vmem>>, vector<32x256xbf16>
    tpu.vector_store %arg4[%c0_8, %c0_9], %21 {strides = array<i32>} : memref<32x256xbf16, #tpu.memory_space<vmem>>, vector<32x256xbf16>,
    return
  }
  func.func @transform_0(%arg0: i32) -> (i32, i32) {
    %c0_i32 = arith.constant 0 : i32
    %c0_i32_0 = arith.constant 0 : i32
    return %c0_i32, %arg0 : i32, i32
  }
  func.func @transform_1(%arg0: i32) -> (i32, i32) {
    %c0_i32 = arith.constant 0 : i32
    %c0_i32_0 = arith.constant 0 : i32
    %c0_i32_1 = arith.constant 0 : i32
    return %c0_i32, %c0_i32_0 : i32, i32
  }
  func.func @transform_2(%arg0: i32) -> (i32, i32) {
    %c0_i32 = arith.constant 0 : i32
    %c0_i32_0 = arith.constant 0 : i32
    %c0_i32_1 = arith.constant 0 : i32
    return %c0_i32, %c0_i32_0 : i32, i32
  }
  func.func @transform_3(%arg0: i32) -> (i32, i32) {
    %c0_i32 = arith.constant 0 : i32
    %c0_i32_0 = arith.constant 0 : i32
    return %c0_i32, %arg0 : i32, i32
  }
}

module attributes {stable_mosaic.version = 11 : i64} {
  func.func @_conv_relu_bn_pool_kernel(%arg0: i32, %arg1: memref<288x512xbf16, #tpu.memory_space<vmem>>, %arg2: memref<64x288xbf16, #tpu.memory_space<vmem>>, %arg3: memref<64x3xf32, #tpu.memory_space<vmem>>, %arg4: memref<64x128xbf16, #tpu.memory_space<vmem>>) attributes {dimension_semantics = [#tpu.dimension_semantics<parallel>], iteration_bounds = array<i64: 1>, scalar_prefetch = 0 : i64, scratch_operands = 0 : i64, tpu.core_type = #tpu.core_type<tc>, window_params = [{transform_indices = @transform_0, window_bounds = array<i64: 288, 512>}, {pipeline_mode = #tpu.pipeline_mode<synchronous>, transform_indices = @transform_1, window_bounds = array<i64: 64, 288>}, {pipeline_mode = #tpu.pipeline_mode<synchronous>, transform_indices = @transform_2, window_bounds = array<i64: 64, 3>}, {transform_indices = @transform_3, window_bounds = array<i64: 64, 128>}]} {
    %c0 = arith.constant 0 : index
    %c0_0 = arith.constant 0 : index
    %0 = vector.load %arg2[%c0, %c0_0] : memref<64x288xbf16, #tpu.memory_space<vmem>>, vector<64x288xbf16>
    %c0_1 = arith.constant 0 : index
    %c0_2 = arith.constant 0 : index
    %1 = vector.load %arg1[%c0_1, %c0_2] : memref<288x512xbf16, #tpu.memory_space<vmem>>, vector<288x512xbf16>
    %cst = arith.constant dense<0.000000e+00> : vector<64x512xf32>
    %2 = tpu.matmul %0, %1, %cst {dimension_numbers = #tpu.dot_dimension_numbers<[1], [0], [0], [1], [0, 0, 1, 1], [], []>} : vector<64x288xbf16>, vector<288x512xbf16>, vector<64x512xf32> -> vector<64x512xf32>
    %c0_3 = arith.constant 0 : index
    %c0_4 = arith.constant 0 : index
    %3 = vector.load %arg3[%c0_3, %c0_4] : memref<64x3xf32, #tpu.memory_space<vmem>>, vector<64x1xf32>
    %c0_5 = arith.constant 0 : index
    %c1 = arith.constant 1 : index
    %4 = vector.load %arg3[%c0_5, %c1] : memref<64x3xf32, #tpu.memory_space<vmem>>, vector<64x1xf32>
    %c0_6 = arith.constant 0 : index
    %c2 = arith.constant 2 : index
    %5 = vector.load %arg3[%c0_6, %c2] : memref<64x3xf32, #tpu.memory_space<vmem>>, vector<64x1xf32>
    %6 = vector.broadcast %3 : vector<64x1xf32> to vector<64x512xf32>
    %7 = arith.addf %2, %6 : vector<64x512xf32>
    %cst_7 = arith.constant 0.000000e+00 : f32
    %8 = vector.broadcast %cst_7 : f32 to vector<64x512xf32>
    %9 = arith.maximumf %7, %8 : vector<64x512xf32>
    %10 = vector.broadcast %4 : vector<64x1xf32> to vector<64x512xf32>
    %11 = arith.mulf %9, %10 : vector<64x512xf32>
    %12 = vector.broadcast %5 : vector<64x1xf32> to vector<64x512xf32>
    %13 = arith.addf %11, %12 : vector<64x512xf32>
    %14 = vector.extract_strided_slice %13 {offsets = [0, 0], sizes = [64, 128], strides = [1, 1]} : vector<64x512xf32> to vector<64x128xf32>
    %15 = vector.extract_strided_slice %13 {offsets = [0, 128], sizes = [64, 128], strides = [1, 1]} : vector<64x512xf32> to vector<64x128xf32>
    %16 = arith.maximumf %14, %15 : vector<64x128xf32>
    %17 = vector.extract_strided_slice %13 {offsets = [0, 256], sizes = [64, 128], strides = [1, 1]} : vector<64x512xf32> to vector<64x128xf32>
    %18 = vector.extract_strided_slice %13 {offsets = [0, 384], sizes = [64, 128], strides = [1, 1]} : vector<64x512xf32> to vector<64x128xf32>
    %19 = arith.maximumf %17, %18 : vector<64x128xf32>
    %20 = arith.maximumf %16, %19 : vector<64x128xf32>
    %21 = arith.truncf %20 : vector<64x128xf32> to vector<64x128xbf16>
    %c0_8 = arith.constant 0 : index
    %c0_9 = arith.constant 0 : index
    %22 = vector.load %arg4[%c0_8, %c0_9] : memref<64x128xbf16, #tpu.memory_space<vmem>>, vector<64x128xbf16>
    tpu.vector_store %arg4[%c0_8, %c0_9], %21 {strides = array<i32>} : memref<64x128xbf16, #tpu.memory_space<vmem>>, vector<64x128xbf16>,
    return
  }
  func.func @transform_0(%arg0: i32) -> (i32, i32) {
    %c0_i32 = arith.constant 0 : i32
    %c0_i32_0 = arith.constant 0 : i32
    return %c0_i32, %arg0 : i32, i32
  }
  func.func @transform_1(%arg0: i32) -> (i32, i32) {
    %c0_i32 = arith.constant 0 : i32
    %c0_i32_0 = arith.constant 0 : i32
    %c0_i32_1 = arith.constant 0 : i32
    return %c0_i32, %c0_i32_0 : i32, i32
  }
  func.func @transform_2(%arg0: i32) -> (i32, i32) {
    %c0_i32 = arith.constant 0 : i32
    %c0_i32_0 = arith.constant 0 : i32
    %c0_i32_1 = arith.constant 0 : i32
    return %c0_i32, %c0_i32_0 : i32, i32
  }
  func.func @transform_3(%arg0: i32) -> (i32, i32) {
    %c0_i32 = arith.constant 0 : i32
    %c0_i32_0 = arith.constant 0 : i32
    return %c0_i32, %arg0 : i32, i32
  }
}

module attributes {stable_mosaic.version = 11 : i64} {
  func.func @_conv_relu_bn_pool_kernel(%arg0: i32, %arg1: memref<576x512xbf16, #tpu.memory_space<vmem>>, %arg2: memref<64x576xbf16, #tpu.memory_space<vmem>>, %arg3: memref<64x3xf32, #tpu.memory_space<vmem>>, %arg4: memref<64x128xbf16, #tpu.memory_space<vmem>>) attributes {dimension_semantics = [#tpu.dimension_semantics<parallel>], iteration_bounds = array<i64: 1>, scalar_prefetch = 0 : i64, scratch_operands = 0 : i64, tpu.core_type = #tpu.core_type<tc>, window_params = [{transform_indices = @transform_0, window_bounds = array<i64: 576, 512>}, {pipeline_mode = #tpu.pipeline_mode<synchronous>, transform_indices = @transform_1, window_bounds = array<i64: 64, 576>}, {pipeline_mode = #tpu.pipeline_mode<synchronous>, transform_indices = @transform_2, window_bounds = array<i64: 64, 3>}, {transform_indices = @transform_3, window_bounds = array<i64: 64, 128>}]} {
    %c0 = arith.constant 0 : index
    %c0_0 = arith.constant 0 : index
    %0 = vector.load %arg2[%c0, %c0_0] : memref<64x576xbf16, #tpu.memory_space<vmem>>, vector<64x576xbf16>
    %c0_1 = arith.constant 0 : index
    %c0_2 = arith.constant 0 : index
    %1 = vector.load %arg1[%c0_1, %c0_2] : memref<576x512xbf16, #tpu.memory_space<vmem>>, vector<576x512xbf16>
    %cst = arith.constant dense<0.000000e+00> : vector<64x512xf32>
    %2 = tpu.matmul %0, %1, %cst {dimension_numbers = #tpu.dot_dimension_numbers<[1], [0], [0], [1], [0, 0, 1, 1], [], []>} : vector<64x576xbf16>, vector<576x512xbf16>, vector<64x512xf32> -> vector<64x512xf32>
    %c0_3 = arith.constant 0 : index
    %c0_4 = arith.constant 0 : index
    %3 = vector.load %arg3[%c0_3, %c0_4] : memref<64x3xf32, #tpu.memory_space<vmem>>, vector<64x1xf32>
    %c0_5 = arith.constant 0 : index
    %c1 = arith.constant 1 : index
    %4 = vector.load %arg3[%c0_5, %c1] : memref<64x3xf32, #tpu.memory_space<vmem>>, vector<64x1xf32>
    %c0_6 = arith.constant 0 : index
    %c2 = arith.constant 2 : index
    %5 = vector.load %arg3[%c0_6, %c2] : memref<64x3xf32, #tpu.memory_space<vmem>>, vector<64x1xf32>
    %6 = vector.broadcast %3 : vector<64x1xf32> to vector<64x512xf32>
    %7 = arith.addf %2, %6 : vector<64x512xf32>
    %cst_7 = arith.constant 0.000000e+00 : f32
    %8 = vector.broadcast %cst_7 : f32 to vector<64x512xf32>
    %9 = arith.maximumf %7, %8 : vector<64x512xf32>
    %10 = vector.broadcast %4 : vector<64x1xf32> to vector<64x512xf32>
    %11 = arith.mulf %9, %10 : vector<64x512xf32>
    %12 = vector.broadcast %5 : vector<64x1xf32> to vector<64x512xf32>
    %13 = arith.addf %11, %12 : vector<64x512xf32>
    %14 = vector.extract_strided_slice %13 {offsets = [0, 0], sizes = [64, 128], strides = [1, 1]} : vector<64x512xf32> to vector<64x128xf32>
    %15 = vector.extract_strided_slice %13 {offsets = [0, 128], sizes = [64, 128], strides = [1, 1]} : vector<64x512xf32> to vector<64x128xf32>
    %16 = arith.maximumf %14, %15 : vector<64x128xf32>
    %17 = vector.extract_strided_slice %13 {offsets = [0, 256], sizes = [64, 128], strides = [1, 1]} : vector<64x512xf32> to vector<64x128xf32>
    %18 = vector.extract_strided_slice %13 {offsets = [0, 384], sizes = [64, 128], strides = [1, 1]} : vector<64x512xf32> to vector<64x128xf32>
    %19 = arith.maximumf %17, %18 : vector<64x128xf32>
    %20 = arith.maximumf %16, %19 : vector<64x128xf32>
    %21 = arith.truncf %20 : vector<64x128xf32> to vector<64x128xbf16>
    %c0_8 = arith.constant 0 : index
    %c0_9 = arith.constant 0 : index
    %22 = vector.load %arg4[%c0_8, %c0_9] : memref<64x128xbf16, #tpu.memory_space<vmem>>, vector<64x128xbf16>
    tpu.vector_store %arg4[%c0_8, %c0_9], %21 {strides = array<i32>} : memref<64x128xbf16, #tpu.memory_space<vmem>>, vector<64x128xbf16>,
    return
  }
  func.func @transform_0(%arg0: i32) -> (i32, i32) {
    %c0_i32 = arith.constant 0 : i32
    %c0_i32_0 = arith.constant 0 : i32
    return %c0_i32, %arg0 : i32, i32
  }
  func.func @transform_1(%arg0: i32) -> (i32, i32) {
    %c0_i32 = arith.constant 0 : i32
    %c0_i32_0 = arith.constant 0 : i32
    %c0_i32_1 = arith.constant 0 : i32
    return %c0_i32, %c0_i32_0 : i32, i32
  }
  func.func @transform_2(%arg0: i32) -> (i32, i32) {
    %c0_i32 = arith.constant 0 : i32
    %c0_i32_0 = arith.constant 0 : i32
    %c0_i32_1 = arith.constant 0 : i32
    return %c0_i32, %c0_i32_0 : i32, i32
  }
  func.func @transform_3(%arg0: i32) -> (i32, i32) {
    %c0_i32 = arith.constant 0 : i32
    %c0_i32_0 = arith.constant 0 : i32
    return %c0_i32, %arg0 : i32, i32
  }
}

module attributes {stable_mosaic.version = 11 : i64} {
  func.func @_mlp_kernel(%arg0: i32, %arg1: memref<8x576xbf16, #tpu.memory_space<vmem>>, %arg2: memref<576x512xbf16, #tpu.memory_space<vmem>>, %arg3: memref<1x512xf32, #tpu.memory_space<vmem>>, %arg4: memref<512x128xbf16, #tpu.memory_space<vmem>>, %arg5: memref<1x128xf32, #tpu.memory_space<vmem>>, %arg6: memref<8x128xf32, #tpu.memory_space<vmem>>) attributes {dimension_semantics = [#tpu.dimension_semantics<parallel>], iteration_bounds = array<i64: 1>, scalar_prefetch = 0 : i64, scratch_operands = 0 : i64, tpu.core_type = #tpu.core_type<tc>, window_params = [{transform_indices = @transform_0, window_bounds = array<i64: 8, 576>}, {pipeline_mode = #tpu.pipeline_mode<synchronous>, transform_indices = @transform_1, window_bounds = array<i64: 576, 512>}, {pipeline_mode = #tpu.pipeline_mode<synchronous>, transform_indices = @transform_2, window_bounds = array<i64: 1, 512>}, {pipeline_mode = #tpu.pipeline_mode<synchronous>, transform_indices = @transform_3, window_bounds = array<i64: 512, 128>}, {pipeline_mode = #tpu.pipeline_mode<synchronous>, transform_indices = @transform_4, window_bounds = array<i64: 1, 128>}, {transform_indices = @transform_5, window_bounds = array<i64: 8, 128>}]} {
    %c0 = arith.constant 0 : index
    %c0_0 = arith.constant 0 : index
    %0 = vector.load %arg1[%c0, %c0_0] : memref<8x576xbf16, #tpu.memory_space<vmem>>, vector<8x576xbf16>
    %c0_1 = arith.constant 0 : index
    %c0_2 = arith.constant 0 : index
    %1 = vector.load %arg2[%c0_1, %c0_2] : memref<576x512xbf16, #tpu.memory_space<vmem>>, vector<576x512xbf16>
    %cst = arith.constant dense<0.000000e+00> : vector<8x512xf32>
    %2 = tpu.matmul %0, %1, %cst {dimension_numbers = #tpu.dot_dimension_numbers<[1], [0], [0], [1], [0, 0, 1, 1], [], []>} : vector<8x576xbf16>, vector<576x512xbf16>, vector<8x512xf32> -> vector<8x512xf32>
    %c0_3 = arith.constant 0 : index
    %c0_4 = arith.constant 0 : index
    %3 = vector.load %arg3[%c0_3, %c0_4] : memref<1x512xf32, #tpu.memory_space<vmem>>, vector<1x512xf32>
    %4 = vector.broadcast %3 : vector<1x512xf32> to vector<8x512xf32>
    %5 = arith.addf %2, %4 : vector<8x512xf32>
    %cst_5 = arith.constant 0.000000e+00 : f32
    %6 = vector.broadcast %cst_5 : f32 to vector<8x512xf32>
    %7 = arith.maximumf %5, %6 : vector<8x512xf32>
    %8 = arith.truncf %7 : vector<8x512xf32> to vector<8x512xbf16>
    %c0_6 = arith.constant 0 : index
    %c0_7 = arith.constant 0 : index
    %9 = vector.load %arg4[%c0_6, %c0_7] : memref<512x128xbf16, #tpu.memory_space<vmem>>, vector<512x128xbf16>
    %cst_8 = arith.constant dense<0.000000e+00> : vector<8x128xf32>
    %10 = tpu.matmul %8, %9, %cst_8 {dimension_numbers = #tpu.dot_dimension_numbers<[1], [0], [0], [1], [0, 0, 1, 1], [], []>} : vector<8x512xbf16>, vector<512x128xbf16>, vector<8x128xf32> -> vector<8x128xf32>
    %c0_9 = arith.constant 0 : index
    %c0_10 = arith.constant 0 : index
    %11 = vector.load %arg5[%c0_9, %c0_10] : memref<1x128xf32, #tpu.memory_space<vmem>>, vector<1x128xf32>
    %12 = vector.broadcast %11 : vector<1x128xf32> to vector<8x128xf32>
    %13 = arith.addf %10, %12 : vector<8x128xf32>
    %c0_11 = arith.constant 0 : index
    %c0_12 = arith.constant 0 : index
    %14 = vector.load %arg6[%c0_11, %c0_12] : memref<8x128xf32, #tpu.memory_space<vmem>>, vector<8x128xf32>
    tpu.vector_store %arg6[%c0_11, %c0_12], %13 {strides = array<i32>} : memref<8x128xf32, #tpu.memory_space<vmem>>, vector<8x128xf32>,
    return
  }
  func.func @transform_0(%arg0: i32) -> (i32, i32) {
    %c0_i32 = arith.constant 0 : i32
    %c0_i32_0 = arith.constant 0 : i32
    return %arg0, %c0_i32 : i32, i32
  }
  func.func @transform_1(%arg0: i32) -> (i32, i32) {
    %c0_i32 = arith.constant 0 : i32
    %c0_i32_0 = arith.constant 0 : i32
    %c0_i32_1 = arith.constant 0 : i32
    return %c0_i32, %c0_i32_0 : i32, i32
  }
  func.func @transform_2(%arg0: i32) -> (i32, i32) {
    %c0_i32 = arith.constant 0 : i32
    %c0_i32_0 = arith.constant 0 : i32
    %c0_i32_1 = arith.constant 0 : i32
    return %c0_i32, %c0_i32_0 : i32, i32
  }
  func.func @transform_3(%arg0: i32) -> (i32, i32) {
    %c0_i32 = arith.constant 0 : i32
    %c0_i32_0 = arith.constant 0 : i32
    %c0_i32_1 = arith.constant 0 : i32
    return %c0_i32, %c0_i32_0 : i32, i32
  }
  func.func @transform_4(%arg0: i32) -> (i32, i32) {
    %c0_i32 = arith.constant 0 : i32
    %c0_i32_0 = arith.constant 0 : i32
    %c0_i32_1 = arith.constant 0 : i32
    return %c0_i32, %c0_i32_0 : i32, i32
  }
  func.func @transform_5(%arg0: i32) -> (i32, i32) {
    %c0_i32 = arith.constant 0 : i32
    %c0_i32_0 = arith.constant 0 : i32
    return %arg0, %c0_i32 : i32, i32
  }
}

</mosaic_0001>

<bundles_post_ra>
// kernel: cnn_forward.6
= control target key start
LH: loop header
LB: loop body
LE: loop exit
PB: predicated region body
PF: predicated region fallthrough
CT: control target
= control target key end

     0   :  { %s905_s12 = smov 0   ;;  %s907_s13 = smov 0   ;;  %s1158_s0 = inlined_call_operand.vmem [shape: bf16[9,2048], index: 0, kind: input, shape index: {}]   ;;  %s1159_s1 = inlined_call_operand.vmem [shape: bf16[32,9], index: 1, kind: input, shape index: {}]   ;;  %s1160_s2 = inlined_call_operand.vmem [shape: f32[32,3], index: 2, kind: input, shape index: {}]   ;;  %s1161_s3 = inlined_call_operand.vmem [shape: bf16[32,512], index: 3, kind: output, shape index: {}]  }
   0x1   :  { %s909_s14 = smov 0  }
   0x2 LB: > { %s738_s15 = sadd.s32 4294967295, %s879_s14   ;;  %s922_s16 = sadd.s32 1, %s879_s14   ;;  %s879_s14 = sphi %s909_s14, %s1165_s14   ;;  %s875_s13 = sphi %s907_s13, %s1164_s13   ;;  %s871_s12 = sphi %s905_s12, %s1163_s12  }
   0x3   : > { %s17_s17 = ssub.s32 %s879_s14, %s922_s16  ;;  %s20_s18 = sadd.s32 1, %s875_s13 }
   0x4   : > { %p18_p0 = scmp.eq.s32.totalorder %s17_s17, 0  ;;  %p27_p1 = scmp.ne.s32.totalorder %s875_s13, %s871_s12 }
   0x5   : > { %p28_p2 = scmp.eq.s32.totalorder %s879_s14, 0  ;;  %p99_p3 = scmp.eq.s32.totalorder %s738_s15, 1 }
   0x6   : > { %s933_s19 = scalar_select %p18_p0, %s875_s13, %s20_s18  }
   0x7   : > { %p29_p4 = por %p28_p2, %p27_p1  ;;  %p935_p5 = por %p99_p3, %p27_p1 }
   0x8   : > { %p741_p6 = scmp.ge.s32.totalorder %s879_s14, 2 }
   0xa   : > { %127 = sbr.rel (%p741_p6) target bundleno = 27 (0x1b), region = 24 }
   0xf   : > { %130 = sbr.rel (!%p29_p4) target bundleno = 27 (0x1b), region = 28  ;;  %s132_s21 = sand.u32 (%p29_p4), 1, %s875_s13  }
  0x10   : > { %s809_s22 = sshll.u32 (%p29_p4), %s879_s14, 5  ;;  %s742_s23 = sshll.u32 (%p29_p4), %s132_s21, 6 }
  0x11   : > { %s137_s26 = scalar_lea.vmem (%p29_p4), %s1158_s0, %s809_s22  ;;  %s134_s27 = scalar_lea.vmem (%p29_p4), [#allocation2], %s742_s23 }
  0x12   : > { %v150_v0 = vld [vmem:[%s137_s26] sm:$0xff] (%p29_p4)  ;;  %v152_v1 = vld [vmem:[%s137_s26 + $0x8] sm:$0xff] (%p29_p4)  ;;  %v154_v2 = vld [vmem:[%s137_s26 + $0x10] sm:$0xff] (%p29_p4) }
  0x13   : > { %151 = vst [vmem:[%s134_s27] sm:$0xff] (%p29_p4), %v150_v0  ;;  %v156_v3 = vld [vmem:[%s137_s26 + $0x18] sm:$0xff] (%p29_p4)  ;;  %v158_v4 = vld [vmem:[%s137_s26 + $0x40] sm:$0xff] (%p29_p4)  ;;  %v160_v5 = vld [vmem:[%s137_s26 + $0x48] sm:$0xff] (%p29_p4) }
  0x14   : > { %153 = vst [vmem:[%s134_s27 + $0x8] sm:$0xff] %v152_v1  ;;  %v162_v6 = vld [vmem:[%s137_s26 + $0x50] sm:$0xff]  ;;  %v164_v7 = vld [vmem:[%s137_s26 + $0x58] sm:$0xff] }
  0x15   : > { %155 = vst [vmem:[%s134_s27 + $0x10] sm:$0xff] %v154_v2 }
  0x16   : > { %157 = vst [vmem:[%s134_s27 + $0x18] sm:$0xff] %v156_v3 }
  0x17   : > { %159 = vst [vmem:[%s134_s27 + $0x20] sm:$0xff] %v158_v4 }
  0x18   : > { %161 = vst [vmem:[%s134_s27 + $0x28] sm:$0xff] %v160_v5 }
  0x19   : > { %163 = vst [vmem:[%s134_s27 + $0x30] sm:$0xff] %v162_v6 }
  0x1a   : > { %165 = vst [vmem:[%s134_s27 + $0x38] sm:$0xff] %v164_v7 }
  0x1b PF: > { %p745_p7 = scmp.ge.s32.totalorder %s879_s14, 1  ;;  %p170_p8 = scmp.lt.s32.totalorder %s879_s14, 3 }
  0x1d   : > { %p171_p9 = pnand %p745_p7, %p170_p8 }
  0x1e   : > { %s177_s28 = sand.u32 (!%p171_p9), 1, %s871_s12  }
  0x1f   : > { %174 = sbr.rel (%p171_p9) target bundleno = 259 (0x103), region = 51  ;;  %s746_s4 = sshll.u32 (!%p171_p9), %s177_s28, 6 }
  0x20   : > { %s962_s7 = scalar_lea.vmem (!%p171_p9), [#allocation2], %s746_s4  ;;  %s747_s23 = sshll.u32 (!%p171_p9), %s177_s28, 5 }
  0x21   : > { %s1097_s12 = scalar_lea.vmem (!%p171_p9), [#allocation3], %s747_s23 }
  0x24   : > { %vm287_vm0 = vcmask 1043456   ;;  %vm288_vm1 = vcmask 1044480   ;;  %v951_v8 = vld [vmem:[%s1160_s2 + $0x10] sm:$0xff]  ;;  %v881_v9 = vmov 65535   ;;  %v882_v11 = vmov 0   ;;  %v958_v12 = vld [vmem:[%s1160_s2] sm:$0xff] }
  0x25   : > { %v289_v10 = vsel %vm287_vm0, 4294967295, %v881_v9  ;;  %850 = vset.pattern.permute.xlu1 %v882_v11  ;;  %849 = vset.pattern.permute.xlu0 %v882_v11  ;;  %v758_v14 = vld [vmem:[%s962_s7] sm:$0xf]  ;;  %v812_v16 = vld [vmem:[%s962_s7 + $0x4] sm:$0xf]  ;;  %v883_v17 = vmov 1  }
  0x26   : > { %v290_v13 = vsel %vm288_vm1, %v289_v10, 0  ;;  %230 = vperm.xlu1 %850, %v951_v8   ;;  %220 = vperm.xlu0 %849, %v958_v12   ;;  %v816_v15 = vld [vmem:[%s962_s7 + $0x1c] sm:$0x10]  ;;  %v760_v19 = vld [vmem:[%s962_s7 + $0x20] sm:$0x10]  ;;  %v217_v28 = vld [vmem:[%s1160_s2 + $0x18] sm:$0xff] }
  0x27   : > { %851 = vset.pattern.permute.xlu2 %v883_v17  ;;  %v759_v18 = vor.u32 %v816_v15, %v758_v14  ;;  %v766_v20 = vld [vmem:[%s962_s7 + $0x8] sm:$0xf]  ;;  %v763_v22 = vor.u32 %v812_v16, %v760_v19  ;;  %v813_v24 = vld [vmem:[%s962_s7 + $0xc] sm:$0xf]  ;;  %v810_v26 = vld [vmem:[%s1159_s1] sm:$0xff]  ;;  %vm280_vm2 = vcmask 72704  }
  0x28   : > { %v817_v21 = vld [vmem:[%s962_s7 + $0x24] sm:$0x10]  ;;  %500 = vperm.xlu2 %851, %v958_v12   ;;  %v768_v25 = vld [vmem:[%s962_s7 + $0x28] sm:$0x10]  ;;  %v782_v27 = vld [vmem:[%s962_s7 + $0x18] sm:$0xf] }
  0x29   : > { %v767_v23 = vor.u32 %v817_v21, %v766_v20  ;;  %v292_v29 = vand.u32 %v759_v18, %v290_v13  ;;  %v771_v30 = vor.u32 %v813_v24, %v768_v25  ;;  %v819_v31 = vld [vmem:[%s962_s7 + $0x34] sm:$0x10]  ;;  %v815_v32 = vld [vmem:[%s962_s7 + $0x1c] sm:$0xf]  ;;  %v295_v34 = vand.u32 %v763_v22, %v290_v13  ;;  %v774_v38 = vld [vmem:[%s962_s7 + $0x10] sm:$0xf] }
  0x2a   : > { %v784_v33 = vld [vmem:[%s962_s7 + $0x38] sm:$0x10]  ;;  %v783_v36 = vor.u32 %v819_v31, %v782_v27  ;;  %v818_v39 = vld [vmem:[%s962_s7 + $0x2c] sm:$0x10]  ;;  %v814_v40 = vld [vmem:[%s962_s7 + $0x14] sm:$0xf] }
  0x2b   : > { %v298_v35 = vand.u32 %v767_v23, %v290_v13  ;;  %v787_v37 = vor.u32 %v815_v32, %v784_v33  ;;  %322 = vmatpush.bf16.msra.mxu0 %v292_v29  ;;  %v301_v41 = vand.u32 %v771_v30, %v290_v13  ;;  %v775_v42 = vor.u32 %v818_v39, %v774_v38  ;;  %v776_v43 = vld [vmem:[%s962_s7 + $0x30] sm:$0x10]  ;;  %v215_v49 = vld [vmem:[%s1160_s2 + $0x8] sm:$0xff]  ;;  %s820_s24 = sshll.u32 (%p935_p5), %s738_s15, 3 }
  0x2c   : > { %341 = vmatpush.bf16.msra.mxu1 %v295_v34  ;;  %v310_v44 = vand.u32 %v783_v36, %v290_v13  ;;  %v779_v45 = vor.u32 %v814_v40, %v776_v43  ;;  %v811_v50 = vld [vmem:[%s1159_s1 + $0x8] sm:$0xff]  ;;  %v884_v51 = vmov 2   ;;  %s636_s27 = scalar_lea.vmem (%p935_p5), %s1161_s3, %s820_s24 }
  0x2d   : > { %360 = vmatpush.bf16.msra.mxu2 %v298_v35  ;;  %379 = vmatpush.bf16.msra.mxu3 %v301_v41  ;;  %v313_v46 = vand.u32 %v787_v37, %v290_v13  ;;  %v304_v47 = vand.u32 %v775_v42, %v290_v13 }
  0x2e   : > { %235 = vperm.xlu1 %850, %v217_v28   ;;  %788 = vmatmul.msk.bf16.vlgmr.msra.gmra.mxu0 %vm280_vm2, %v810_v26  ;;  %v307_v48 = vand.u32 %v779_v45, %v290_v13 }
  0x2f   : > { %790 = vmatmul.msk.bf16.vlgmr.msra.gmra.mxu1 %vm280_vm2, %v810_v26  ;;  %398 = vmatpush.bf16.msrb.mxu0 %v304_v47 }
  0x30   : > { %792 = vmatmul.msk.bf16.vlgmr.msra.gmra.mxu2 %vm280_vm2, %v810_v26  ;;  %794 = vmatmul.msk.bf16.vlgmr.msra.gmra.mxu3 %vm280_vm2, %v810_v26 }
  0x31   : > { %436 = vmatpush.bf16.msrb.mxu2 %v310_v44  ;;  %455 = vmatpush.bf16.msrb.mxu3 %v313_v46 }
  0x32   : > { %417 = vmatpush.bf16.msrb.mxu1 %v307_v48  ;;  %225 = vperm.xlu0 %849, %v215_v49  }
  0x33   : > { %504 = vperm.xlu2 %851, %v215_v49  }
  0x36   : > { %853 = vset.pattern.permute.xlu1 %v883_v17 }
  0x37   : > { %512 = vperm.xlu1 %853, %v217_v28  }
  0x3a   : > { %852 = vset.pattern.permute.xlu0 %v883_v17 }
  0x3b   : > { %854 = vset.pattern.permute.xlu2 %v884_v51  ;;  %508 = vperm.xlu0 %852, %v951_v8  }
  0x3c   : > { %548 = vperm.xlu2 %854, %v958_v12  }
  0x3e   : > { %789 = vmatmul.msk.bf16.gmra.mxu0 %vm280_vm2, %v811_v50 }
  0x3f   : > { %855 = vset.pattern.permute.xlu1 %v884_v51  ;;  %791 = vmatmul.msk.bf16.gmra.mxu1 %vm280_vm2, %v811_v50 }
  0x40   : > { %793 = vmatmul.msk.bf16.gmra.mxu2 %vm280_vm2, %v811_v50  ;;  %795 = vmatmul.msk.bf16.gmra.mxu3 %vm280_vm2, %v811_v50 }
  0x41   : > { %552 = vperm.xlu1 %855, %v215_v49  }
  0x43   : > { %856 = vset.pattern.permute.xlu0 %v884_v51 }
  0x44   : > { %556 = vperm.xlu2 %854, %v951_v8   ;;  %560 = vperm.xlu0 %856, %v217_v28  }
  0x4e   : > { %796 = vmatmul.msk.bf16.vlgmr.msrb.gmra.mxu0 %vm280_vm2, %v810_v26 }
  0x4f   : > { %798 = vmatmul.msk.bf16.vlgmr.msrb.gmra.mxu1 %vm280_vm2, %v810_v26 }
  0x50   : > { %800 = vmatmul.msk.bf16.vlgmr.msrb.gmra.mxu2 %vm280_vm2, %v810_v26  ;;  %802 = vmatmul.msk.bf16.vlgmr.msrb.gmra.mxu3 %vm280_vm2, %v810_v26 }
  0x5e   : > { %797 = vmatmul.msk.bf16.gmra.mxu0 %vm280_vm2, %v811_v50 }
  0x5f   : > { %799 = vmatmul.msk.bf16.gmra.mxu1 %vm280_vm2, %v811_v50 }
  0x60   : > { %801 = vmatmul.msk.bf16.gmra.mxu2 %vm280_vm2, %v811_v50  ;;  %803 = vmatmul.msk.bf16.gmra.mxu3 %vm280_vm2, %v811_v50 }
  0x82   : > { %v1014_v59 = vpop.permute.xlu2 %500 }
  0x8d   : > { %v1026_v6 = vpop.permute.xlu2 %504 }
  0x96   : > { %v549_v29 = vpop.permute.xlu2 %548 }
  0x98   : > { %v1012_v58 = vpop.permute.xlu1 %230  ;;  %v221_v0 = vpop.permute.xlu0 %220 }
  0xa0   : > { %v1016_v1 = vpop.permute.xlu1 %235 }
  0xa4   : > { %v1028_v9 = vpop.permute.xlu0 %225 }
  0xa9   : > { %v1030_v14 = vpop.permute.xlu1 %512 }
  0xab   : > { %v324_v52 = vpop.f32.mrf.mxu0 }
  0xac   : > { %v343_v53 = vpop.f32.mrf.mxu1  ;;  %v325_v7 = vadd.f32 %v324_v52, %v221_v0 }
  0xad   : > { %v344_v8 = vadd.f32 %v343_v53, %v221_v0 }
  0xae   : > { %v467_v12 = vmax.f32 %v325_v7, 0.0 }
  0xaf   : > { %v468_v13 = vmax.f32 %v344_v8, 0.0 }
  0xb0   : > { %v515_v25 = vmul.f32 %v1014_v59, %v467_v12 }
  0xb1   : > { %v516_v26 = vmul.f32 %v1014_v59, %v468_v13 }
  0xb2   : > { %v563_v39 = vadd.f32 %v549_v29, %v515_v25 }
  0xb3   : > { %v362_v54 = vpop.f32.mrf.mxu2  ;;  %v381_v55 = vpop.f32.mrf.mxu3  ;;  %v564_v40 = vadd.f32 %v549_v29, %v516_v26 }
  0xb4   : > { %v326_v56 = vpop.f32.mrf.mxu0  ;;  %v345_v57 = vpop.f32.mrf.mxu1  ;;  %v363_v10 = vadd.f32 %v362_v54, %v221_v0  ;;  %v382_v11 = vadd.f32 %v381_v55, %v221_v0 }
  0xb5   : > { %v327_v16 = vadd.f32 %v326_v56, %v1028_v9  ;;  %v346_v19 = vadd.f32 %v345_v57, %v1028_v9  ;;  %v1049_v48 = vpop.permute.xlu1 %552 }
  0xb6   : > { %v469_v22 = vmax.f32 %v363_v10, 0.0  ;;  %v470_v23 = vmax.f32 %v382_v11, 0.0 }
  0xb7   : > { %v475_v28 = vmax.f32 %v327_v16, 0.0  ;;  %v476_v31 = vmax.f32 %v346_v19, 0.0  ;;  %v1064_v16 = vpop.permute.xlu0 %508 }
  0xb8   : > { %v517_v34 = vmul.f32 %v1014_v59, %v469_v22  ;;  %v518_v35 = vmul.f32 %v1014_v59, %v470_v23 }
  0xb9   : > { %v523_v41 = vmul.f32 %v1026_v6, %v475_v28  ;;  %v524_v47 = vmul.f32 %v1026_v6, %v476_v31 }
  0xba   : > { %v565_v54 = vadd.f32 %v549_v29, %v517_v34  ;;  %v566_v55 = vadd.f32 %v549_v29, %v518_v35 }
  0xbb   : > { %v364_v60 = vpop.f32.mrf.mxu2  ;;  %v383_v61 = vpop.f32.mrf.mxu3  ;;  %v1061_v11 = vadd.f32 %v1049_v48, %v524_v47 }
  0xbc   : > { %v329_v62 = vpop.f32.mrf.mxu0  ;;  %v348_v63 = vpop.f32.mrf.mxu1  ;;  %v365_v27 = vadd.f32 %v364_v60, %v1028_v9  ;;  %v384_v32 = vadd.f32 %v383_v61, %v1028_v9  ;;  %v595_v19 = vmax.f32 %v563_v39, %v565_v54 }
  0xbd   : > { %v330_v37 = vadd.f32 %v329_v62, %v1012_v58  ;;  %v349_v42 = vadd.f32 %v348_v63, %v1012_v58  ;;  %v1056_v63 = vadd.f32 %v1049_v48, %v523_v41 }
  0xbe   : > { %v477_v36 = vmax.f32 %v365_v27, 0.0  ;;  %v478_v49 = vmax.f32 %v384_v32, 0.0 }
  0xbf   : > { %v483_v60 = vmax.f32 %v330_v37, 0.0  ;;  %v484_v7 = vmax.f32 %v349_v42, 0.0 }
  0xc0   : > { %v525_v57 = vmul.f32 %v1026_v6, %v477_v36 }
  0xc1   : > { %v531_v26 = vmul.f32 %v1064_v16, %v483_v60  ;;  %v532_v32 = vmul.f32 %v1064_v16, %v484_v7 }
  0xc2   : > { %v573_v22 = vadd.f32 %v1049_v48, %v525_v57 }
  0xc3   : > { %v1018_v2 = vpop.f32.mrf.mxu2  ;;  %v1020_v3 = vpop.f32.mrf.mxu3 }
  0xc4   : > { %v1022_v4 = vpop.f32.mrf.mxu0  ;;  %v1024_v5 = vpop.f32.mrf.mxu1  ;;  %v368_v27 = vadd.f32 %v1018_v2, %v1012_v58  ;;  %v387_v34 = vadd.f32 %v1020_v3, %v1012_v58 }
  0xcb   : > { %v1032_v15 = vpop.f32.mrf.mxu2  ;;  %v1035_v17 = vpop.f32.mrf.mxu3 }
  0xcc   : > { %v400_v18 = vpop.f32.mrf.mxu0  ;;  %v419_v21 = vpop.f32.mrf.mxu1 }
  0xcd   : > { %v401_v20 = vadd.f32 %v400_v18, %v221_v0  ;;  %v420_v24 = vadd.f32 %v419_v21, %v221_v0 }
  0xcf   : > { %v471_v30 = vmax.f32 %v401_v20, 0.0  ;;  %v472_v33 = vmax.f32 %v420_v24, 0.0  ;;  %v596_v20 = vmax.f32 %v564_v40, %v566_v55 }
  0xd1   : > { %v519_v43 = vmul.f32 %v1014_v59, %v471_v30  ;;  %v520_v50 = vmul.f32 %v1014_v59, %v472_v33 }
  0xd3   : > { %v438_v38 = vpop.f32.mrf.mxu2  ;;  %v457_v45 = vpop.f32.mrf.mxu3  ;;  %v567_v8 = vadd.f32 %v549_v29, %v519_v43  ;;  %v568_v12 = vadd.f32 %v549_v29, %v520_v50 }
  0xd4   : > { %v439_v44 = vadd.f32 %v438_v38, %v221_v0  ;;  %v402_v46 = vpop.f32.mrf.mxu0  ;;  %v458_v51 = vadd.f32 %v457_v45, %v221_v0  ;;  %v421_v52 = vpop.f32.mrf.mxu1  ;;  %v526_v0 = vmul.f32 %v1026_v6, %v478_v49  ;;  %v485_v45 = vmax.f32 %v368_v27, 0.0 }
  0xd5   : > { %v403_v56 = vadd.f32 %v402_v46, %v1028_v9  ;;  %v422_v62 = vadd.f32 %v421_v52, %v1028_v9  ;;  %v486_v49 = vmax.f32 %v387_v34, 0.0  ;;  %v332_v52 = vadd.f32 %v1022_v4, %v1016_v1 }
  0xd6   : > { %v473_v53 = vmax.f32 %v439_v44, 0.0  ;;  %v474_v61 = vmax.f32 %v458_v51, 0.0  ;;  %v574_v33 = vadd.f32 %v1049_v48, %v526_v0  ;;  %v597_v44 = vmax.f32 %v1056_v63, %v573_v22 }
  0xd7   : > { %v479_v21 = vmax.f32 %v403_v56, 0.0  ;;  %v480_v24 = vmax.f32 %v422_v62, 0.0  ;;  %v351_v56 = vadd.f32 %v1024_v5, %v1016_v1  ;;  %v533_v4 = vmul.f32 %v1064_v16, %v485_v45 }
  0xd8   : > { %v521_v10 = vmul.f32 %v1014_v59, %v473_v53  ;;  %v522_v13 = vmul.f32 %v1014_v59, %v474_v61  ;;  %v598_v47 = vmax.f32 %v1061_v11, %v574_v33  ;;  %v370_v62 = vadd.f32 %v1032_v15, %v1016_v1 }
  0xd9   : > { %v527_v38 = vmul.f32 %v1026_v6, %v479_v21  ;;  %v528_v42 = vmul.f32 %v1026_v6, %v480_v24  ;;  %v389_v0 = vadd.f32 %v1035_v17, %v1016_v1 }
  0xda   : > { %v569_v18 = vadd.f32 %v549_v29, %v521_v10  ;;  %v570_v23 = vadd.f32 %v549_v29, %v522_v13  ;;  %v1075_v29 = vpop.permute.xlu2 %556  ;;  %v534_v10 = vmul.f32 %v1064_v16, %v486_v49  ;;  %v493_v24 = vmax.f32 %v370_v62, 0.0 }
  0xdb   : > { %v440_v25 = vpop.f32.mrf.mxu2  ;;  %v459_v30 = vpop.f32.mrf.mxu3  ;;  %v575_v53 = vadd.f32 %v1049_v48, %v527_v38  ;;  %v576_v57 = vadd.f32 %v1049_v48, %v528_v42 }
  0xdc   : > { %v603_v28 = vmax.f32 %v567_v8, %v569_v18  ;;  %v441_v59 = vadd.f32 %v440_v25, %v1028_v9  ;;  %v405_v31 = vpop.f32.mrf.mxu0  ;;  %v604_v35 = vmax.f32 %v568_v12, %v570_v23  ;;  %v460_v36 = vadd.f32 %v459_v30, %v1028_v9  ;;  %v424_v2 = vpop.f32.mrf.mxu1 }
  0xdd   : > { %v406_v40 = vadd.f32 %v405_v31, %v1012_v58  ;;  %v425_v3 = vadd.f32 %v424_v2, %v1012_v58  ;;  %v1087_v9 = vadd.f32 %v1075_v29, %v531_v26  ;;  %v581_v25 = vadd.f32 %v1075_v29, %v533_v4 }
  0xde   : > { %v611_v37 = vmax.f32 %v595_v19, %v603_v28  ;;  %v481_v39 = vmax.f32 %v441_v59, 0.0  ;;  %v612_v41 = vmax.f32 %v596_v20, %v604_v35  ;;  %v482_v43 = vmax.f32 %v460_v36, 0.0 }
  0xdf   : > { %v487_v55 = vmax.f32 %v406_v40, 0.0  ;;  %v494_v26 = vmax.f32 %v389_v0, 0.0  ;;  %v582_v59 = vadd.f32 %v1075_v29, %v534_v10  ;;  %v491_v30 = vmax.f32 %v332_v52, 0.0 }
  0xe0   : > { %v529_v46 = vmul.f32 %v1026_v6, %v481_v39  ;;  %v619_v50 = vpack.c.bf16 %v612_v41, %v611_v37  ;;  %v530_v51 = vmul.f32 %v1026_v6, %v482_v43  ;;  %v488_v6 = vmax.f32 %v425_v3, 0.0 }
  0xe1   : > { %v535_v18 = vmul.f32 %v1064_v16, %v487_v55  ;;  %v492_v35 = vmax.f32 %v351_v56, 0.0  ;;  %v541_v38 = vmul.f32 %v1030_v14, %v493_v24  ;;  %v542_v42 = vmul.f32 %v1030_v14, %v494_v26 }
  0xe2   : > { %v577_v54 = vadd.f32 %v1049_v48, %v529_v46  ;;  %623 = vst [vmem:[%s1097_s12] sm:$0xff] %v619_v50  ;;  %v578_v60 = vadd.f32 %v1049_v48, %v530_v51  ;;  %v536_v21 = vmul.f32 %v1064_v16, %v488_v6  ;;  %v539_v45 = vmul.f32 %v1030_v14, %v491_v30 }
  0xe3   : > { %v443_v61 = vpop.f32.mrf.mxu2  ;;  %v462_v8 = vpop.f32.mrf.mxu3  ;;  %v583_v31 = vadd.f32 %v1075_v29, %v535_v18  ;;  %v540_v49 = vmul.f32 %v1030_v14, %v492_v35 }
  0xe4   : > { %v605_v63 = vmax.f32 %v575_v53, %v577_v54  ;;  %v444_v7 = vadd.f32 %v443_v61, %v1012_v58  ;;  %v407_v5 = vpop.f32.mrf.mxu0  ;;  %v606_v11 = vmax.f32 %v576_v57, %v578_v60  ;;  %v463_v48 = vadd.f32 %v462_v8, %v1012_v58  ;;  %v426_v12 = vpop.f32.mrf.mxu1 }
  0xe5   : > { %v408_v15 = vadd.f32 %v407_v5, %v1016_v1  ;;  %v427_v23 = vadd.f32 %v426_v12, %v1016_v1  ;;  %v580_v58 = vadd.f32 %v1075_v29, %v532_v32  ;;  %v584_v36 = vadd.f32 %v1075_v29, %v536_v21 }
  0xe6   : > { %v613_v13 = vmax.f32 %v597_v44, %v605_v63  ;;  %v489_v19 = vmax.f32 %v444_v7, 0.0  ;;  %v614_v20 = vmax.f32 %v598_v47, %v606_v11  ;;  %v490_v22 = vmax.f32 %v463_v48, 0.0 }
  0xe7   : > { %v495_v34 = vmax.f32 %v408_v15, 0.0  ;;  %v496_v37 = vmax.f32 %v427_v23, 0.0  ;;  %v600_v43 = vmax.f32 %v580_v58, %v582_v59 }
  0xe8   : > { %v537_v17 = vmul.f32 %v1064_v16, %v489_v19  ;;  %v620_v27 = vpack.c.bf16 %v614_v20, %v613_v13  ;;  %v538_v28 = vmul.f32 %v1064_v16, %v490_v22  ;;  %v599_v16 = vmax.f32 %v1087_v9, %v581_v25  ;;  %v561_v9 = vpop.permute.xlu0 %560 }
  0xe9   : > { %v544_v51 = vmul.f32 %v1030_v14, %v496_v37  ;;  %v589_v53 = vadd.f32 %v561_v9, %v541_v38  ;;  %v590_v55 = vadd.f32 %v561_v9, %v542_v42  ;;  %v587_v57 = vadd.f32 %v561_v9, %v539_v45 }
  0xea   : > { %v585_v33 = vadd.f32 %v1075_v29, %v537_v17  ;;  %624 = vst [vmem:[%s1097_s12 + $0x8] sm:$0xff] %v620_v27  ;;  %v586_v2 = vadd.f32 %v1075_v29, %v538_v28  ;;  %v543_v29 = vmul.f32 %v1030_v14, %v495_v34  ;;  %v588_v61 = vadd.f32 %v561_v9, %v540_v49 }
  0xeb   : > { %v445_v32 = vpop.f32.mrf.mxu2  ;;  %v464_v41 = vpop.f32.mrf.mxu3  ;;  %v592_v4 = vadd.f32 %v561_v9, %v544_v51  ;;  %v601_v63 = vmax.f32 %v587_v57, %v589_v53 }
  0xec   : > { %v607_v39 = vmax.f32 %v583_v31, %v585_v33  ;;  %v446_v40 = vadd.f32 %v445_v32, %v1016_v1  ;;  %v608_v3 = vmax.f32 %v584_v36, %v586_v2  ;;  %v465_v44 = vadd.f32 %v464_v41, %v1016_v1 }
  0xed   : > { %v591_v60 = vadd.f32 %v561_v9, %v543_v29  ;;  %v602_v8 = vmax.f32 %v588_v61, %v590_v55 }
  0xee   : > { %v615_v46 = vmax.f32 %v599_v16, %v607_v39  ;;  %v497_v47 = vmax.f32 %v446_v40, 0.0  ;;  %v616_v50 = vmax.f32 %v600_v43, %v608_v3  ;;  %v498_v52 = vmax.f32 %v465_v44, 0.0 }
  0xf0   : > { %v545_v54 = vmul.f32 %v1030_v14, %v497_v47  ;;  %v621_v56 = vpack.c.bf16 %v616_v50, %v615_v46  ;;  %v546_v1 = vmul.f32 %v1030_v14, %v498_v52  ;;  %v671_v14 = vld [vmem:[%s1097_s12] sm:$0xff] (%p935_p5) }
  0xf1   : > { %v673_v48 = vld [vmem:[%s1097_s12 + $0x8] sm:$0xff] (%p935_p5)  ;;  %672 = vst [vmem:[%s636_s27] sm:$0xff] (%p935_p5), %v671_v14 }
  0xf2   : > { %v593_v6 = vadd.f32 %v561_v9, %v545_v54  ;;  %625 = vst [vmem:[%s1097_s12 + $0x10] sm:$0xff] %v621_v56  ;;  %v594_v62 = vadd.f32 %v561_v9, %v546_v1 }
  0xf3   : > { %674 = vst [vmem:[%s636_s27 + $0x10] sm:$0xff] (%p935_p5), %v673_v48 }
  0xf4   : > { %v609_v7 = vmax.f32 %v591_v60, %v593_v6  ;;  %v610_v5 = vmax.f32 %v592_v4, %v594_v62 }
  0xf6   : > { %v617_v10 = vmax.f32 %v601_v63, %v609_v7  ;;  %v618_v0 = vmax.f32 %v602_v8, %v610_v5  ;;  %633 = sbr.rel (!%p935_p5) target bundleno = 259 (0x103), region = 59 }
  0xf8   : > { %v622_v11 = vpack.c.bf16 %v618_v0, %v617_v10 }
  0xf9   : > { %v675_v12 = vld [vmem:[%s1097_s12 + $0x10] sm:$0xff] (%p935_p5) }
  0xfa   : > { %626 = vst [vmem:[%s1097_s12 + $0x18] sm:$0xff] %v622_v11 }
  0xfb   : > { %676 = vst [vmem:[%s636_s27 + $0x20] sm:$0xff] %v675_v12 }
 0x101   : > { %v677_v13 = vld [vmem:[%s1097_s12 + $0x18] sm:$0xff] }
 0x102   : > { %678 = vst [vmem:[%s636_s27 + $0x30] sm:$0xff] %v677_v13 }
 0x103 PF: > { %p10_p10 = scmp.ge.s32.totalorder %s922_s16, 4   ;;  %s1163_s12 = smov %s875_s13 }
 0x104   : > { %s1164_s13 = smov %s933_s19  ;;  %s1165_s14 = smov %s922_s16 }
 0x105   :  { %12 = sbr.rel (!%p10_p10) target bundleno = 2 (0x2), region = 128 }

// kernel: cnn_forward.9
= control target key start
LH: loop header
LB: loop body
LE: loop exit
PB: predicated region body
PF: predicated region fallthrough
CT: control target
= control target key end

     0   :  { %v3754_v7 = vmov 0   ;;  %vm1865_vm0 = vcmask 261120   ;;  %s4529_s0 = inlined_call_operand.vmem [shape: bf16[64,288], index: 0, kind: input, shape index: {}]   ;;  %s4530_s1 = inlined_call_operand.vmem [shape: f32[64,3], index: 1, kind: input, shape index: {}]   ;;  %s4531_s2 = inlined_call_operand.vmem [shape: bf16[36,8,4,128], index: 2, kind: input, shape index: {}]   ;;  %s4532_s3 = inlined_call_operand.vmem [shape: bf16[64,128], index: 3, kind: output, shape index: {}]  }
   0x1   :  { %v3698_v0 = vld [vmem:[%s4531_s2 + $0xe0] sm:$0xff]  ;;  %v3700_v1 = vld [vmem:[%s4531_s2 + $0xf0] sm:$0xff]  ;;  %3745 = vset.pattern.permute.xlu0 %v3754_v7  ;;  %3746 = vset.pattern.permute.xlu1 %v3754_v7  ;;  %v3849_v38 = vld [vmem:[%s4530_s1 + $0x8] sm:$0xff] }
   0x2   :  { %v3730_v2 = vld [vmem:[%s4531_s2 + $0x1e0] sm:$0xff]  ;;  %v3732_v3 = vld [vmem:[%s4531_s2 + $0x1f0] sm:$0xff]  ;;  %3148 = vst [vmem:[#allocation2 + $0xe0] sm:$0xff] %v3698_v0   ;;  %3747 = vset.pattern.permute.xlu2 %v3754_v7  ;;  %v3858_v43 = vld [vmem:[%s4530_s1 + $0x18] sm:$0xff] }
   0x3   :  { %v3738_v4 = vld [vmem:[%s4531_s2 + $0x220] sm:$0xff]  ;;  %3158 = vst [vmem:[#allocation2 + $0xf0] sm:$0xff] %v3700_v1   ;;  %v3740_v5 = vld [vmem:[%s4531_s2 + $0x230] sm:$0xff]  ;;  %v2583_v45 = vld [vmem:[%s4529_s0 + $0x8] sm:$0xf] }
   0x4   :  { %3308 = vst [vmem:[#allocation2 + $0x1e0] sm:$0xff] %v3730_v2   ;;  %v3694_v6 = vld [vmem:[%s4531_s2 + $0xc0] sm:$0xff]  ;;  %v3696_v8 = vld [vmem:[%s4531_s2 + $0xd0] sm:$0xff] }
   0x5   :  { %3318 = vst [vmem:[#allocation2 + $0x1f0] sm:$0xff] %v3732_v3   ;;  %v3726_v9 = vld [vmem:[%s4531_s2 + $0x1c0] sm:$0xff]  ;;  %v3728_v10 = vld [vmem:[%s4531_s2 + $0x1d0] sm:$0xff] }
   0x6   :  { %3348 = vst [vmem:[#allocation2 + $0x220] sm:$0xff] %v3738_v4   ;;  %v3734_v11 = vld [vmem:[%s4531_s2 + $0x200] sm:$0xff]  ;;  %v3736_v12 = vld [vmem:[%s4531_s2 + $0x210] sm:$0xff] }
   0x7   :  { %3358 = vst [vmem:[#allocation2 + $0x230] sm:$0xff] %v3740_v5   ;;  %v3816_v13 = vld [vmem:[%s4530_s1] sm:$0xff]  ;;  %v3822_v16 = vld [vmem:[%s4530_s1 + $0x10] sm:$0xff] }
   0x8   :  { %3128 = vst [vmem:[#allocation2 + $0xc0] sm:$0xff] %v3694_v6   ;;  %1407 = vperm.xlu0 %3745, %v3816_v13   ;;  %v3690_v19 = vld [vmem:[%s4531_s2 + $0xa0] sm:$0xff]  ;;  %1417 = vperm.xlu1 %3746, %v3822_v16   ;;  %v3692_v23 = vld [vmem:[%s4531_s2 + $0xb0] sm:$0xff] }
   0x9   :  { %v2735_v14 = vld [vmem:[#allocation2 + $0xe0] sm:$0xf]  ;;  %v2965_v15 = vld [vmem:[#allocation2 + $0xe4] sm:$0xf]  ;;  %3138 = vst [vmem:[#allocation2 + $0xd0] sm:$0xff] %v3696_v8   ;;  %v3724_v28 = vld [vmem:[%s4531_s2 + $0x1b0] sm:$0xff] }
   0xa   :  { %v2967_v17 = vld [vmem:[#allocation2 + $0xec] sm:$0xf0]  ;;  %v2737_v18 = vld [vmem:[#allocation2 + $0xf0] sm:$0xf0]  ;;  %3288 = vst [vmem:[#allocation2 + $0x1c0] sm:$0xff] %v3726_v9   ;;  %v3722_v25 = vld [vmem:[%s4531_s2 + $0x1a0] sm:$0xff] }
   0xb   :  { %v2736_v20 = vor.u32 %v2967_v17, %v2735_v14  ;;  %v2863_v21 = vld [vmem:[#allocation2 + $0x1e0] sm:$0xf]  ;;  %v2740_v22 = vor.u32 %v2965_v15, %v2737_v18  ;;  %3298 = vst [vmem:[#allocation2 + $0x1d0] sm:$0xff] %v3728_v10   ;;  %v3688_v31 = vld [vmem:[%s4531_s2 + $0x90] sm:$0xff] }
   0xc   :  { %v2999_v24 = vld [vmem:[#allocation2 + $0x1ec] sm:$0xf0]  ;;  %3328 = vst [vmem:[#allocation2 + $0x200] sm:$0xff] %v3734_v11   ;;  %v3686_v30 = vld [vmem:[%s4531_s2 + $0x80] sm:$0xff]  ;;  %v2927_v49 = vld [vmem:[%s4529_s0 + $0x10] sm:$0xf0] }
   0xd   :  { %1878 = vmatpush.bf16.msra.mxu0 %v2736_v20  ;;  %v2864_v26 = vor.u32 %v2999_v24, %v2863_v21  ;;  %v2895_v27 = vld [vmem:[#allocation2 + $0x220] sm:$0xf]  ;;  %1965 = vmatpush.bf16.msra.mxu3 %v2740_v22  ;;  %3338 = vst [vmem:[#allocation2 + $0x210] sm:$0xff] %v3736_v12   ;;  %v3720_v42 = vld [vmem:[%s4531_s2 + $0x190] sm:$0xff]  ;;  %v3882_v58 = vor.u32 %v2927_v49, %v2583_v45  ;;  %v3912_v12 = vld [vmem:[%s4530_s1 + $0x38] sm:$0xff] }
   0xe   :  { %v3007_v29 = vld [vmem:[#allocation2 + $0x22c] sm:$0xf0]  ;;  %3108 = vst [vmem:[#allocation2 + $0xa0] sm:$0xff] %v3690_v19   ;;  %v3718_v35 = vld [vmem:[%s4531_s2 + $0x180] sm:$0xff]  ;;  %v2865_v22 = vld [vmem:[#allocation2 + $0x1f0] sm:$0xf0] }
   0xf   :  { %1907 = vmatpush.bf16.msra.mxu1 %v2864_v26  ;;  %v2896_v32 = vor.u32 %v3007_v29, %v2895_v27  ;;  %v2719_v33 = vld [vmem:[#allocation2 + $0xc0] sm:$0xf]  ;;  %v2961_v34 = vld [vmem:[#allocation2 + $0xc4] sm:$0xf]  ;;  %3118 = vst [vmem:[#allocation2 + $0xb0] sm:$0xff] %v3692_v23   ;;  %v3684_v50 = vld [vmem:[%s4531_s2 + $0x70] sm:$0xff] }
  0x10   :  { %v2963_v36 = vld [vmem:[#allocation2 + $0xcc] sm:$0xf0]  ;;  %v2721_v37 = vld [vmem:[#allocation2 + $0xd0] sm:$0xf0]  ;;  %3268 = vst [vmem:[#allocation2 + $0x1a0] sm:$0xff] %v3722_v25   ;;  %1412 = vperm.xlu0 %3745, %v3849_v38   ;;  %v3682_v46 = vld [vmem:[%s4531_s2 + $0x60] sm:$0xff]  ;;  %1422 = vperm.xlu1 %3746, %v3858_v43  }
  0x11   :  { %1942 = vmatpush.bf16.msra.mxu2 %v2896_v32  ;;  %v2720_v39 = vor.u32 %v2963_v36, %v2719_v33  ;;  %v2847_v40 = vld [vmem:[#allocation2 + $0x1c0] sm:$0xf]  ;;  %v2724_v41 = vor.u32 %v2961_v34, %v2721_v37  ;;  %3278 = vst [vmem:[#allocation2 + $0x1b0] sm:$0xff] %v3724_v28   ;;  %v3716_v53 = vld [vmem:[%s4531_s2 + $0x170] sm:$0xff]  ;;  %v2997_v19 = vld [vmem:[#allocation2 + $0x1e4] sm:$0xf] }
  0x12   :  { %v2995_v44 = vld [vmem:[#allocation2 + $0x1cc] sm:$0xf0]  ;;  %3088 = vst [vmem:[#allocation2 + $0x80] sm:$0xff] %v3686_v30   ;;  %v3714_v52 = vld [vmem:[%s4531_s2 + $0x160] sm:$0xff]  ;;  %v2868_v27 = vor.u32 %v2997_v19, %v2865_v22 }
  0x13   :  { %1879 = vmatpush.bf16.msra.mxu0 %v2720_v39  ;;  %v2848_v47 = vor.u32 %v2995_v44, %v2847_v40  ;;  %v2879_v48 = vld [vmem:[#allocation2 + $0x200] sm:$0xf]  ;;  %1966 = vmatpush.bf16.msra.mxu3 %v2724_v41  ;;  %3098 = vst [vmem:[#allocation2 + $0x90] sm:$0xff] %v3688_v31   ;;  %v3680_v61 = vld [vmem:[%s4531_s2 + $0x50] sm:$0xff]  ;;  %v3943_v44 = vld [vmem:[%s4530_s1 + $0x28] sm:$0xff] }
  0x14   :  { %v3003_v51 = vld [vmem:[#allocation2 + $0x20c] sm:$0xf0]  ;;  %3248 = vst [vmem:[#allocation2 + $0x180] sm:$0xff] %v3718_v35   ;;  %v3678_v57 = vld [vmem:[%s4531_s2 + $0x40] sm:$0xff] }
  0x15   :  { %1908 = vmatpush.bf16.msra.mxu1 %v2848_v47  ;;  %v2880_v54 = vor.u32 %v3003_v51, %v2879_v48  ;;  %v2703_v55 = vld [vmem:[#allocation2 + $0xa0] sm:$0xf]  ;;  %v2957_v56 = vld [vmem:[#allocation2 + $0xa4] sm:$0xf]  ;;  %3258 = vst [vmem:[#allocation2 + $0x190] sm:$0xff] %v3720_v42   ;;  %v3893_v2 = vld [vmem:[%s4530_s1 + $0x30] sm:$0xff] }
  0x16   :  { %v2959_v59 = vld [vmem:[#allocation2 + $0xac] sm:$0xf0]  ;;  %v2705_v60 = vld [vmem:[#allocation2 + $0xb0] sm:$0xf0]  ;;  %3068 = vst [vmem:[#allocation2 + $0x60] sm:$0xff] %v3682_v46   ;;  %v3710_v1 = vld [vmem:[%s4531_s2 + $0x140] sm:$0xff] }
  0x17   :  { %1943 = vmatpush.bf16.msra.mxu2 %v2880_v54  ;;  %v2704_v62 = vor.u32 %v2959_v59, %v2703_v55  ;;  %v2831_v63 = vld [vmem:[#allocation2 + $0x1a0] sm:$0xf]  ;;  %v2708_v0 = vor.u32 %v2957_v56, %v2705_v60  ;;  %3078 = vst [vmem:[#allocation2 + $0x70] sm:$0xff] %v3684_v50   ;;  %v3712_v4 = vld [vmem:[%s4531_s2 + $0x150] sm:$0xff]  ;;  %v3731_v47 = vld [vmem:[%s4531_s2 + $0x1e8] sm:$0xff]  ;;  %v3755_v48 = vmov 1  }
  0x18   :  { %v2991_v3 = vld [vmem:[#allocation2 + $0x1ac] sm:$0xf0]  ;;  %3228 = vst [vmem:[#allocation2 + $0x160] sm:$0xff] %v3714_v52   ;;  %v3674_v5 = vld [vmem:[%s4531_s2 + $0x20] sm:$0xff]  ;;  %1437 = vperm.xlu0 %3745, %v3893_v2   ;;  %1442 = vperm.xlu1 %3746, %v3912_v12   ;;  %v2930_v52 = vld [vmem:[%s4529_s0 + $0x28] sm:$0xf0] }
  0x19   :  { %1880 = vmatpush.bf16.msra.mxu0 %v2704_v62  ;;  %v2832_v6 = vor.u32 %v2991_v3, %v2831_v63  ;;  %1967 = vmatpush.bf16.msra.mxu3 %v2708_v0  ;;  %v2687_v7 = vld [vmem:[#allocation2 + $0x80] sm:$0xf]  ;;  %v2953_v8 = vld [vmem:[#allocation2 + $0x84] sm:$0xf]  ;;  %3238 = vst [vmem:[#allocation2 + $0x170] sm:$0xff] %v3716_v53   ;;  %v3676_v18 = vld [vmem:[%s4531_s2 + $0x30] sm:$0xff] }
  0x1a   :  { %v3904_v9 = vld [vmem:[%s4530_s1 + $0x20] sm:$0xff]  ;;  %2909 = vmatmul.msk.bf16.vlgmr.msra.gmra.mxu2 %vm1865_vm0, %v3882_v58  ;;  %v2955_v10 = vld [vmem:[#allocation2 + $0x8c] sm:$0xf0]  ;;  %v2689_v11 = vld [vmem:[#allocation2 + $0x90] sm:$0xf0]  ;;  %3048 = vst [vmem:[#allocation2 + $0x40] sm:$0xff] %v3678_v57  }
  0x1b   :  { %1909 = vmatpush.bf16.msra.mxu1 %v2832_v6  ;;  %v2688_v14 = vor.u32 %v2955_v10, %v2687_v7  ;;  %v2815_v15 = vld [vmem:[#allocation2 + $0x180] sm:$0xf]  ;;  %v2692_v17 = vor.u32 %v2953_v8, %v2689_v11  ;;  %3058 = vst [vmem:[#allocation2 + $0x50] sm:$0xff] %v3680_v61   ;;  %1427 = vperm.xlu2 %3747, %v3904_v9   ;;  %v3708_v26 = vld [vmem:[%s4531_s2 + $0x130] sm:$0xff]  ;;  %v3733_v53 = vld [vmem:[%s4531_s2 + $0x1f8] sm:$0xff] }
  0x1c   :  { %v2987_v20 = vld [vmem:[#allocation2 + $0x18c] sm:$0xf0]  ;;  %3208 = vst [vmem:[#allocation2 + $0x140] sm:$0xff] %v3710_v1   ;;  %v3706_v21 = vld [vmem:[%s4531_s2 + $0x120] sm:$0xff]  ;;  %1994 = vmatpush.bf16.msrb.mxu2 %v2868_v27  ;;  %v3699_v55 = vld [vmem:[%s4531_s2 + $0xe8] sm:$0xff] }
  0x1d   :  { %1881 = vmatpush.bf16.msra.mxu0 %v2688_v14  ;;  %v2816_v23 = vor.u32 %v2987_v20, %v2815_v15  ;;  %1968 = vmatpush.bf16.msra.mxu3 %v2692_v17  ;;  %v2671_v24 = vld [vmem:[#allocation2 + $0x60] sm:$0xf]  ;;  %v2949_v25 = vld [vmem:[#allocation2 + $0x64] sm:$0xf]  ;;  %3218 = vst [vmem:[#allocation2 + $0x150] sm:$0xff] %v3712_v4   ;;  %v3672_v34 = vld [vmem:[%s4531_s2 + $0x10] sm:$0xff] }
  0x1e   :  { %v2951_v28 = vld [vmem:[#allocation2 + $0x6c] sm:$0xf0]  ;;  %v2673_v29 = vld [vmem:[#allocation2 + $0x70] sm:$0xf0]  ;;  %3028 = vst [vmem:[#allocation2 + $0x20] sm:$0xff] %v3674_v5   ;;  %v14_v33 = vld [vmem:[%s4531_s2] sm:$0xff]  }
  0x1f   :  { %1910 = vmatpush.bf16.msra.mxu1 %v2816_v23  ;;  %v2672_v30 = vor.u32 %v2951_v28, %v2671_v24  ;;  %v2799_v31 = vld [vmem:[#allocation2 + $0x160] sm:$0xf]  ;;  %v2676_v32 = vor.u32 %v2949_v25, %v2673_v29  ;;  %3038 = vst [vmem:[#allocation2 + $0x30] sm:$0xff] %v3676_v18   ;;  %v3704_v37 = vld [vmem:[%s4531_s2 + $0x110] sm:$0xff]  ;;  %v3005_v60 = vld [vmem:[#allocation2 + $0x224] sm:$0xf] }
  0x20   :  { %v2983_v35 = vld [vmem:[#allocation2 + $0x16c] sm:$0xf0]  ;;  %3188 = vst [vmem:[#allocation2 + $0x120] sm:$0xff] %v3706_v21   ;;  %v3702_v36 = vld [vmem:[%s4531_s2 + $0x100] sm:$0xff]  ;;  %3749 = vset.pattern.permute.xlu0 %v3755_v48  ;;  %3750 = vset.pattern.permute.xlu1 %v3755_v48  ;;  %v2897_v61 = vld [vmem:[#allocation2 + $0x230] sm:$0xf0] }
  0x21   :  { %1882 = vmatpush.bf16.msra.mxu0 %v2672_v30  ;;  %v2800_v39 = vor.u32 %v2983_v35, %v2799_v31  ;;  %1969 = vmatpush.bf16.msra.mxu3 %v2676_v32  ;;  %v2655_v40 = vld [vmem:[#allocation2 + $0x40] sm:$0xf]  ;;  %v2945_v41 = vld [vmem:[#allocation2 + $0x44] sm:$0xf]  ;;  %3198 = vst [vmem:[#allocation2 + $0x130] sm:$0xff] %v3708_v26   ;;  %v3701_v62 = vld [vmem:[%s4531_s2 + $0xf8] sm:$0xff]  ;;  %v2900_v26 = vor.u32 %v3005_v60, %v2897_v61 }
  0x22   :  { %v2595_v42 = vld [vmem:[%s4529_s0 + $0x20] sm:$0xf]  ;;  %v2947_v45 = vld [vmem:[#allocation2 + $0x4c] sm:$0xf0]  ;;  %v2657_v46 = vld [vmem:[#allocation2 + $0x50] sm:$0xf0]  ;;  %2263 = vperm.xlu0 %3749, %v3849_v38   ;;  %2267 = vperm.xlu1 %3750, %v3822_v16  }
  0x23   :  { %20 = vst [vmem:[#allocation2] sm:$0xff] %v14_v33   ;;  %1911 = vmatpush.bf16.msra.mxu1 %v2800_v39  ;;  %v2656_v49 = vor.u32 %v2947_v45, %v2655_v40  ;;  %v2783_v50 = vld [vmem:[#allocation2 + $0x140] sm:$0xf]  ;;  %v2660_v51 = vor.u32 %v2945_v41, %v2657_v46  ;;  %1432 = vperm.xlu2 %3747, %v3943_v44   ;;  %v3727_v3 = vld [vmem:[%s4531_s2 + $0x1c8] sm:$0xff]  ;;  %v2993_v10 = vld [vmem:[#allocation2 + $0x1c4] sm:$0xf] }
  0x24   :  { %3018 = vst [vmem:[#allocation2 + $0x10] sm:$0xff] %v3672_v34   ;;  %v2979_v54 = vld [vmem:[#allocation2 + $0x14c] sm:$0xf0]  ;;  %v3964_v63 = vor.u32 %v2930_v52, %v2595_v42  ;;  %v2575_v7 = vld [vmem:[%s4529_s0] sm:$0xf]  ;;  %v3729_v11 = vld [vmem:[%s4531_s2 + $0x1d8] sm:$0xff] }
  0x25   :  { %3168 = vst [vmem:[#allocation2 + $0x100] sm:$0xff] %v3702_v36   ;;  %1883 = vmatpush.bf16.msra.mxu0 %v2656_v49  ;;  %v2784_v56 = vor.u32 %v2979_v54, %v2783_v50  ;;  %1970 = vmatpush.bf16.msra.mxu3 %v2660_v51  ;;  %v2639_v57 = vld [vmem:[#allocation2 + $0x20] sm:$0xf]  ;;  %v2941_v59 = vld [vmem:[#allocation2 + $0x24] sm:$0xf]  ;;  %v3695_v17 = vld [vmem:[%s4531_s2 + $0xc8] sm:$0xff] }
  0x26   :  { %3178 = vst [vmem:[#allocation2 + $0x110] sm:$0xff] %v3704_v37   ;;  %v2943_v0 = vld [vmem:[#allocation2 + $0x2c] sm:$0xf0]  ;;  %v2641_v1 = vld [vmem:[#allocation2 + $0x30] sm:$0xf0]  ;;  %v3697_v23 = vld [vmem:[%s4531_s2 + $0xd8] sm:$0xff] }
  0x27   :  { %3313 = vst [vmem:[#allocation2 + $0x1e8] sm:$0xff] %v3731_v47   ;;  %1912 = vmatpush.bf16.msra.mxu1 %v2784_v56  ;;  %v2640_v4 = vor.u32 %v2943_v0, %v2639_v57  ;;  %v2767_v5 = vld [vmem:[#allocation2 + $0x120] sm:$0xf]  ;;  %v2644_v6 = vor.u32 %v2941_v59, %v2641_v1  ;;  %v2926_v8 = vld [vmem:[%s4529_s0 + $0x8] sm:$0xf0]  ;;  %v3725_v34 = vld [vmem:[%s4531_s2 + $0x1b8] sm:$0xff] }
  0x28   :  { %3323 = vst [vmem:[#allocation2 + $0x1f8] sm:$0xff] %v3733_v53   ;;  %v2975_v14 = vld [vmem:[#allocation2 + $0x12c] sm:$0xf0]  ;;  %v2849_v15 = vld [vmem:[#allocation2 + $0x1d0] sm:$0xf0]  ;;  %v3723_v31 = vld [vmem:[%s4531_s2 + $0x1a8] sm:$0xff]  ;;  %v3996_v33 = vor.u32 %v2926_v8, %v2575_v7 }
  0x29   :  { %3153 = vst [vmem:[#allocation2 + $0xe8] sm:$0xff] %v3699_v55   ;;  %1884 = vmatpush.bf16.msra.mxu0 %v2640_v4  ;;  %v2768_v18 = vor.u32 %v2975_v14, %v2767_v5  ;;  %1971 = vmatpush.bf16.msra.mxu3 %v2644_v6  ;;  %v2925_v21 = vld [vmem:[%s4529_s0 + $0x4] sm:$0xf]  ;;  %v2852_v22 = vor.u32 %v2993_v10, %v2849_v15  ;;  %v2577_v30 = vld [vmem:[%s4529_s0 + $0xc] sm:$0xf0]  ;;  %v3691_v37 = vld [vmem:[%s4531_s2 + $0xa8] sm:$0xff] }
  0x2a   :  { %v2623_v19 = vld [vmem:[#allocation2] sm:$0xf]  ;;  %v2937_v20 = vld [vmem:[#allocation2 + $0x4] sm:$0xf]  ;;  %3163 = vst [vmem:[#allocation2 + $0xf8] sm:$0xff] %v3701_v62   ;;  %2910 = vmatmul.msk.bf16.gmra.mxu2 %vm1865_vm0, %v3964_v63  ;;  %2283 = vperm.xlu0 %3749, %v3893_v2   ;;  %v3693_v39 = vld [vmem:[%s4531_s2 + $0xb8] sm:$0xff]  ;;  %v4009_v40 = vor.u32 %v2925_v21, %v2577_v30 }
  0x2b   :  { %v2939_v24 = vld [vmem:[#allocation2 + $0xc] sm:$0xf0]  ;;  %v2625_v25 = vld [vmem:[#allocation2 + $0x10] sm:$0xf0]  ;;  %3293 = vst [vmem:[#allocation2 + $0x1c8] sm:$0xff] %v3727_v3   ;;  %1913 = vmatpush.bf16.msra.mxu1 %v2768_v18  ;;  %1995 = vmatpush.bf16.msrb.mxu2 %v2852_v22  ;;  %v3719_v45 = vld [vmem:[%s4531_s2 + $0x188] sm:$0xff] }
  0x2c   :  { %v2624_v27 = vor.u32 %v2939_v24, %v2623_v19  ;;  %v2751_v28 = vld [vmem:[#allocation2 + $0x100] sm:$0xf]  ;;  %v2628_v29 = vor.u32 %v2937_v20, %v2625_v25  ;;  %3303 = vst [vmem:[#allocation2 + $0x1d8] sm:$0xff] %v3729_v11   ;;  %3748 = vset.pattern.permute.xlu2 %v3755_v48  ;;  %v2989_v42 = vld [vmem:[#allocation2 + $0x1a4] sm:$0xf]  ;;  %2275 = vperm.xlu1 %3750, %v3904_v9   ;;  %v3721_v49 = vld [vmem:[%s4531_s2 + $0x198] sm:$0xff] }
  0x2d   :  { %v2971_v32 = vld [vmem:[#allocation2 + $0x10c] sm:$0xf0]  ;;  %3133 = vst [vmem:[#allocation2 + $0xc8] sm:$0xff] %v3695_v17   ;;  %v2833_v48 = vld [vmem:[#allocation2 + $0x1b0] sm:$0xf0]  ;;  %2259 = vperm.xlu2 %3748, %v3816_v13   ;;  %v3687_v56 = vld [vmem:[%s4531_s2 + $0x88] sm:$0xff] }
  0x2e   :  { %1885 = vmatpush.bf16.msra.mxu0 %v2624_v27  ;;  %v2752_v35 = vor.u32 %v2971_v32, %v2751_v28  ;;  %1972 = vmatpush.bf16.msra.mxu3 %v2628_v29  ;;  %v2871_v36 = vld [vmem:[#allocation2 + $0x1e8] sm:$0xf]  ;;  %3143 = vst [vmem:[#allocation2 + $0xd8] sm:$0xff] %v3697_v23   ;;  %v2836_v51 = vor.u32 %v2989_v42, %v2833_v48  ;;  %v2985_v52 = vld [vmem:[#allocation2 + $0x184] sm:$0xf]  ;;  %v3689_v61 = vld [vmem:[%s4531_s2 + $0x98] sm:$0xff] }
  0x2f   :  { %v3000_v41 = vld [vmem:[#allocation2 + $0x1f4] sm:$0xf0]  ;;  %3273 = vst [vmem:[#allocation2 + $0x1a8] sm:$0xff] %v3723_v31   ;;  %v2817_v55 = vld [vmem:[#allocation2 + $0x190] sm:$0xf0]  ;;  %v3756_v5 = vmov 2  }
  0x30   :  { %1914 = vmatpush.bf16.msra.mxu1 %v2752_v35  ;;  %v2872_v46 = vor.u32 %v3000_v41, %v2871_v36  ;;  %v2743_v47 = vld [vmem:[#allocation2 + $0xe8] sm:$0xf]  ;;  %3283 = vst [vmem:[#allocation2 + $0x1b8] sm:$0xff] %v3725_v34   ;;  %v2607_v57 = vld [vmem:[%s4529_s0 + $0x38] sm:$0xf]  ;;  %1996 = vmatpush.bf16.msrb.mxu2 %v2836_v51  ;;  %v2820_v60 = vor.u32 %v2985_v52, %v2817_v55 }
  0x31   :  { %1886 = vmatmul.bf16.vlgmr.msra.gmra.mxu0 %v3996_v33  ;;  %1973 = vmatmul.bf16.vlgmr.msra.gmra.mxu3 %v3996_v33  ;;  %v2968_v50 = vld [vmem:[#allocation2 + $0xf4] sm:$0xf0]  ;;  %3113 = vst [vmem:[#allocation2 + $0xa8] sm:$0xff] %v3691_v37   ;;  %v2933_v62 = vld [vmem:[%s4529_s0 + $0x40] sm:$0xf0]  ;;  %v3715_v8 = vld [vmem:[%s4531_s2 + $0x168] sm:$0xff] }
  0x32   :  { %2029 = vmatpush.bf16.msrb.mxu0 %v2900_v26  ;;  %2081 = vmatpush.bf16.msrb.mxu3 %v2872_v46  ;;  %v2744_v53 = vor.u32 %v2968_v50, %v2743_v47  ;;  %v2855_v54 = vld [vmem:[#allocation2 + $0x1c8] sm:$0xf]  ;;  %3123 = vst [vmem:[#allocation2 + $0xb8] sm:$0xff] %v3693_v39   ;;  %v2981_v4 = vld [vmem:[#allocation2 + $0x164] sm:$0xf]  ;;  %v4039_v10 = vor.u32 %v2933_v62, %v2607_v57  ;;  %v3717_v14 = vld [vmem:[%s4531_s2 + $0x178] sm:$0xff] }
  0x33   :  { %1915 = vmatmul.bf16.vlgmr.msra.gmra.mxu1 %v4009_v40  ;;  %v2996_v59 = vld [vmem:[#allocation2 + $0x1d4] sm:$0xf0]  ;;  %3253 = vst [vmem:[#allocation2 + $0x188] sm:$0xff] %v3719_v45   ;;  %3752 = vset.pattern.permute.xlu0 %v3756_v5  ;;  %v2801_v7 = vld [vmem:[#allocation2 + $0x170] sm:$0xf0]  ;;  %v3683_v19 = vld [vmem:[%s4531_s2 + $0x68] sm:$0xff] }
  0x34   :  { %2052 = vmatpush.bf16.msrb.mxu1 %v2744_v53  ;;  %v2856_v0 = vor.u32 %v2996_v59, %v2855_v54  ;;  %v2727_v1 = vld [vmem:[#allocation2 + $0xc8] sm:$0xf]  ;;  %3263 = vst [vmem:[#allocation2 + $0x198] sm:$0xff] %v3721_v49   ;;  %2327 = vperm.xlu0 %3752, %v3849_v38   ;;  %v2587_v38 = vld [vmem:[%s4529_s0 + $0x18] sm:$0xf]  ;;  %v2804_v18 = vor.u32 %v2981_v4, %v2801_v7 }
  0x35   :  { %v2964_v3 = vld [vmem:[#allocation2 + $0xd4] sm:$0xf0]  ;;  %3093 = vst [vmem:[#allocation2 + $0x88] sm:$0xff] %v3687_v56   ;;  %1997 = vmatpush.bf16.msrb.mxu2 %v2820_v60  ;;  %2287 = vperm.xlu1 %3750, %v3912_v12   ;;  %v2929_v15 = vld [vmem:[%s4529_s0 + $0x20] sm:$0xf0]  ;;  %v3711_v31 = vld [vmem:[%s4531_s2 + $0x148] sm:$0xff] }
  0x36   :  { %2082 = vmatpush.bf16.msrb.mxu3 %v2856_v0  ;;  %v2728_v6 = vor.u32 %v2964_v3, %v2727_v1  ;;  %v2839_v11 = vld [vmem:[#allocation2 + $0x1a8] sm:$0xf]  ;;  %3103 = vst [vmem:[#allocation2 + $0x98] sm:$0xff] %v3689_v61   ;;  %2271 = vperm.xlu2 %3748, %v3858_v43   ;;  %v2977_v22 = vld [vmem:[#allocation2 + $0x144] sm:$0xf]  ;;  %v3685_v27 = vld [vmem:[%s4531_s2 + $0x78] sm:$0xff]  ;;  %v4069_v37 = vor.u32 %v2929_v15, %v2587_v38 }
  0x37   :  { %v2992_v17 = vld [vmem:[#allocation2 + $0x1b4] sm:$0xf0]  ;;  %v2785_v23 = vld [vmem:[#allocation2 + $0x150] sm:$0xf0]  ;;  %v2928_v24 = vld [vmem:[%s4529_s0 + $0x1c] sm:$0xf] }
  0x38   :  { %2053 = vmatpush.bf16.msrb.mxu1 %v2728_v6  ;;  %v2840_v20 = vor.u32 %v2992_v17, %v2839_v11  ;;  %v2711_v21 = vld [vmem:[#allocation2 + $0xa8] sm:$0xf]  ;;  %3233 = vst [vmem:[#allocation2 + $0x168] sm:$0xff] %v3715_v8   ;;  %v2973_v30 = vld [vmem:[#allocation2 + $0x124] sm:$0xf]  ;;  %v2788_v34 = vor.u32 %v2977_v22, %v2785_v23  ;;  %v3713_v46 = vld [vmem:[%s4531_s2 + $0x158] sm:$0xff] }
  0x39   :  { %v2589_v25 = vld [vmem:[%s4529_s0 + $0x24] sm:$0xf0]  ;;  %v2960_v26 = vld [vmem:[#allocation2 + $0xb4] sm:$0xf0]  ;;  %3243 = vst [vmem:[#allocation2 + $0x178] sm:$0xff] %v3717_v14   ;;  %1998 = vmatpush.bf16.msrb.mxu2 %v2804_v18 }
  0x3a   :  { %2911 = vmatmul.msk.bf16.gmra.mxu2 %vm1865_vm0, %v4039_v10  ;;  %2083 = vmatpush.bf16.msrb.mxu3 %v2840_v20  ;;  %v2712_v28 = vor.u32 %v2960_v26, %v2711_v21  ;;  %v2823_v29 = vld [vmem:[#allocation2 + $0x188] sm:$0xf]  ;;  %v3001_v35 = vld [vmem:[#allocation2 + $0x204] sm:$0xf]  ;;  %v2881_v36 = vld [vmem:[#allocation2 + $0x210] sm:$0xf0]  ;;  %v4078_v49 = vor.u32 %v2928_v24, %v2589_v25 }
  0x3b   :  { %v2988_v32 = vld [vmem:[#allocation2 + $0x194] sm:$0xf0]  ;;  %v2769_v42 = vld [vmem:[#allocation2 + $0x130] sm:$0xf0]  ;;  %v2884_v45 = vor.u32 %v3001_v35, %v2881_v36  ;;  %3073 = vst [vmem:[#allocation2 + $0x68] sm:$0xff] %v3683_v19   ;;  %v3679_v48 = vld [vmem:[%s4531_s2 + $0x48] sm:$0xff] }
  0x3c   :  { %2054 = vmatpush.bf16.msrb.mxu1 %v2712_v28  ;;  %v2824_v39 = vor.u32 %v2988_v32, %v2823_v29  ;;  %v2695_v41 = vld [vmem:[#allocation2 + $0x88] sm:$0xf]  ;;  %3083 = vst [vmem:[#allocation2 + $0x78] sm:$0xff] %v3685_v27   ;;  %2347 = vperm.xlu0 %3752, %v3893_v2   ;;  %v3681_v51 = vld [vmem:[%s4531_s2 + $0x58] sm:$0xff]  ;;  %v2772_v52 = vor.u32 %v2973_v30, %v2769_v42  ;;  %v2969_v53 = vld [vmem:[#allocation2 + $0x104] sm:$0xf] }
  0x3d   :  { %v2956_v47 = vld [vmem:[#allocation2 + $0x94] sm:$0xf0]  ;;  %2030 = vmatpush.bf16.msrb.mxu0 %v2884_v45  ;;  %3213 = vst [vmem:[#allocation2 + $0x148] sm:$0xff] %v3711_v31   ;;  %1999 = vmatpush.bf16.msrb.mxu2 %v2788_v34  ;;  %v2753_v54 = vld [vmem:[#allocation2 + $0x110] sm:$0xf0]  ;;  %v3707_v2 = vld [vmem:[%s4531_s2 + $0x128] sm:$0xff] }
  0x3e   :  { %2084 = vmatpush.bf16.msrb.mxu3 %v2824_v39  ;;  %v2696_v50 = vor.u32 %v2956_v47, %v2695_v41  ;;  %3753 = vset.pattern.permute.xlu1 %v3756_v5  ;;  %3223 = vst [vmem:[#allocation2 + $0x158] sm:$0xff] %v3713_v46   ;;  %v3709_v56 = vld [vmem:[%s4531_s2 + $0x138] sm:$0xff]  ;;  %v3675_v57 = vld [vmem:[%s4531_s2 + $0x28] sm:$0xff]  ;;  %v2619_v61 = vld [vmem:[%s4529_s0 + $0x50] sm:$0xf]  ;;  %v2756_v3 = vor.u32 %v2969_v53, %v2753_v54 }
  0x3f   :  { %v2807_v55 = vld [vmem:[#allocation2 + $0x168] sm:$0xf]  ;;  %3053 = vst [vmem:[#allocation2 + $0x48] sm:$0xff] %v3679_v48   ;;  %2279 = vperm.xlu2 %3748, %v3943_v44   ;;  %v3677_v60 = vld [vmem:[%s4531_s2 + $0x38] sm:$0xff]  ;;  %2331 = vperm.xlu1 %3753, %v3822_v16   ;;  %v2599_v19 = vld [vmem:[%s4529_s0 + $0x30] sm:$0xf] }
  0x40   :  { %2055 = vmatpush.bf16.msrb.mxu1 %v2696_v50  ;;  %v2984_v59 = vld [vmem:[#allocation2 + $0x174] sm:$0xf0]  ;;  %3063 = vst [vmem:[#allocation2 + $0x58] sm:$0xff] %v3681_v51   ;;  %v2936_v62 = vld [vmem:[%s4529_s0 + $0x58] sm:$0xf0]  ;;  %v3703_v4 = vld [vmem:[%s4531_s2 + $0x108] sm:$0xff] }
  0x41   :  { %1891 = vmatmul.bf16.gmra.mxu0 %v4069_v37  ;;  %1978 = vmatmul.bf16.gmra.mxu3 %v4069_v37  ;;  %v2808_v0 = vor.u32 %v2984_v59, %v2807_v55  ;;  %3193 = vst [vmem:[#allocation2 + $0x128] sm:$0xff] %v3707_v2   ;;  %v3705_v6 = vld [vmem:[%s4531_s2 + $0x118] sm:$0xff]  ;;  %v3671_v16 = vld [vmem:[%s4531_s2 + $0x8] sm:$0xff]  ;;  %v4119_v38 = vor.u32 %v2936_v62, %v2619_v61  ;;  %v2931_v25 = vld [vmem:[%s4529_s0 + $0x34] sm:$0xf] }
  0x42   :  { %2000 = vmatpush.bf16.msrb.mxu2 %v2772_v52  ;;  %v2679_v1 = vld [vmem:[#allocation2 + $0x68] sm:$0xf]  ;;  %3203 = vst [vmem:[#allocation2 + $0x138] sm:$0xff] %v3709_v56   ;;  %v3673_v14 = vld [vmem:[%s4531_s2 + $0x18] sm:$0xff]  ;;  %v2601_v26 = vld [vmem:[%s4529_s0 + $0x3c] sm:$0xf0] }
  0x43   :  { %1920 = vmatmul.bf16.gmra.mxu1 %v4078_v49  ;;  %2085 = vmatpush.bf16.msrb.mxu3 %v2808_v0  ;;  %v2952_v7 = vld [vmem:[#allocation2 + $0x74] sm:$0xf0]  ;;  %3033 = vst [vmem:[#allocation2 + $0x28] sm:$0xff] %v3675_v57   ;;  %v2932_v21 = vld [vmem:[%s4529_s0 + $0x38] sm:$0xf0]  ;;  %v4140_v31 = vor.u32 %v2931_v25, %v2601_v26 }
  0x44   :  { %v2680_v8 = vor.u32 %v2952_v7, %v2679_v1  ;;  %v2791_v11 = vld [vmem:[#allocation2 + $0x148] sm:$0xf]  ;;  %3043 = vst [vmem:[#allocation2 + $0x38] sm:$0xff] %v3677_v60   ;;  %v3741_v41 = vld [vmem:[%s4531_s2 + $0x238] sm:$0xff]  ;;  %v2966_v42 = vld [vmem:[#allocation2 + $0xec] sm:$0xf] }
  0x45   :  { %v2980_v15 = vld [vmem:[#allocation2 + $0x154] sm:$0xf0]  ;;  %3173 = vst [vmem:[#allocation2 + $0x108] sm:$0xff] %v3703_v4   ;;  %v2745_v45 = vld [vmem:[#allocation2 + $0xf8] sm:$0xf0] }
  0x46   :  { %2056 = vmatpush.bf16.msrb.mxu1 %v2680_v8  ;;  %2001 = vmatpush.bf16.msrb.mxu2 %v2756_v3  ;;  %v2792_v17 = vor.u32 %v2980_v15, %v2791_v11  ;;  %v2663_v18 = vld [vmem:[#allocation2 + $0x48] sm:$0xf]  ;;  %3183 = vst [vmem:[#allocation2 + $0x118] sm:$0xff] %v3705_v6   ;;  %v2998_v46 = vld [vmem:[#allocation2 + $0x1ec] sm:$0xf]  ;;  %v2748_v48 = vor.u32 %v2966_v42, %v2745_v45 }
  0x47   :  { %v2948_v20 = vld [vmem:[#allocation2 + $0x54] sm:$0xf0]  ;;  %3013 = vst [vmem:[#allocation2 + $0x8] sm:$0xff] %v3671_v16   ;;  %3751 = vset.pattern.permute.xlu2 %v3756_v5  ;;  %2339 = vperm.xlu1 %3753, %v3904_v9   ;;  %v4138_v5 = vor.u32 %v2932_v21, %v2599_v19  ;;  %v3739_v9 = vld [vmem:[%s4531_s2 + $0x228] sm:$0xff]  ;;  %v2873_v47 = vld [vmem:[#allocation2 + $0x1f8] sm:$0xf0] }
  0x48   :  { %2086 = vmatpush.bf16.msrb.mxu3 %v2792_v17  ;;  %v2664_v22 = vor.u32 %v2948_v20, %v2663_v18  ;;  %v2775_v23 = vld [vmem:[#allocation2 + $0x128] sm:$0xf]  ;;  %3023 = vst [vmem:[#allocation2 + $0x18] sm:$0xff] %v3673_v14   ;;  %2323 = vperm.xlu2 %3751, %v3816_v13   ;;  %v2876_v50 = vor.u32 %v2998_v46, %v2873_v47  ;;  %v2934_v52 = vld [vmem:[%s4529_s0 + $0x4c] sm:$0xf]  ;;  %v3737_v21 = vld [vmem:[%s4531_s2 + $0x218] sm:$0xff] }
  0x49   :  { %v2976_v24 = vld [vmem:[#allocation2 + $0x134] sm:$0xf0]  ;;  %3353 = vst [vmem:[#allocation2 + $0x228] sm:$0xff] %v3739_v9   ;;  %2139 = vmatpush.bf16.msra.mxu0 %v2748_v48  ;;  %v2611_v51 = vld [vmem:[%s4529_s0 + $0x48] sm:$0xf] }
  0x4a   :  { %2912 = vmatmul.msk.bf16.gmra.mxu2 %vm1865_vm0, %v4119_v38  ;;  %2057 = vmatpush.bf16.msrb.mxu1 %v2664_v22  ;;  %v2776_v27 = vor.u32 %v2976_v24, %v2775_v23  ;;  %v2647_v28 = vld [vmem:[#allocation2 + $0x28] sm:$0xf]  ;;  %3363 = vst [vmem:[#allocation2 + $0x238] sm:$0xff] %v3741_v41   ;;  %v2962_v53 = vld [vmem:[#allocation2 + $0xcc] sm:$0xf] }
  0x4b   :  { %v2944_v29 = vld [vmem:[#allocation2 + $0x34] sm:$0xf0]  ;;  %v2729_v54 = vld [vmem:[#allocation2 + $0xd8] sm:$0xf0]  ;;  %v2994_v2 = vld [vmem:[#allocation2 + $0x1cc] sm:$0xf] }
  0x4c   :  { %2087 = vmatpush.bf16.msrb.mxu3 %v2776_v27  ;;  %v2648_v30 = vor.u32 %v2944_v29, %v2647_v28  ;;  %v2759_v13 = vld [vmem:[#allocation2 + $0x108] sm:$0xf]  ;;  %v2732_v57 = vor.u32 %v2962_v53, %v2729_v54  ;;  %v2857_v59 = vld [vmem:[#allocation2 + $0x1d8] sm:$0xf0]  ;;  %v2990_v7 = vld [vmem:[#allocation2 + $0x1ac] sm:$0xf] }
  0x4d   :  { %v2972_v32 = vld [vmem:[#allocation2 + $0x114] sm:$0xf0]  ;;  %v2860_v0 = vor.u32 %v2994_v2, %v2857_v59  ;;  %v2713_v6 = vld [vmem:[#allocation2 + $0xb8] sm:$0xf0]  ;;  %v2954_v14 = vld [vmem:[#allocation2 + $0x8c] sm:$0xf] }
  0x4e   :  { %2058 = vmatpush.bf16.msrb.mxu1 %v2648_v30  ;;  %v2760_v34 = vor.u32 %v2972_v32, %v2759_v13  ;;  %v2631_v35 = vld [vmem:[#allocation2 + $0x8] sm:$0xf]  ;;  %2140 = vmatpush.bf16.msra.mxu0 %v2732_v57  ;;  %v2841_v8 = vld [vmem:[#allocation2 + $0x1b8] sm:$0xf0]  ;;  %v2986_v17 = vld [vmem:[#allocation2 + $0x18c] sm:$0xf] }
  0x4f   :  { %v2940_v36 = vld [vmem:[#allocation2 + $0x14] sm:$0xf0]  ;;  %2351 = vperm.xlu1 %3753, %v3912_v12   ;;  %v2844_v11 = vor.u32 %v2990_v7, %v2841_v8  ;;  %v2697_v15 = vld [vmem:[#allocation2 + $0x98] sm:$0xf0]  ;;  %v3735_v20 = vld [vmem:[%s4531_s2 + $0x208] sm:$0xff]  ;;  %3343 = vst [vmem:[#allocation2 + $0x218] sm:$0xff] %v3737_v21  }
  0x50   :  { %2088 = vmatpush.bf16.msrb.mxu3 %v2760_v34  ;;  %v2632_v39 = vor.u32 %v2940_v36, %v2631_v35  ;;  %2335 = vperm.xlu2 %3751, %v3858_v43   ;;  %v2935_v43 = vld [vmem:[%s4529_s0 + $0x50] sm:$0xf0]  ;;  %v2613_v12 = vld [vmem:[%s4529_s0 + $0x54] sm:$0xf0]  ;;  %v2903_v55 = vld [vmem:[#allocation2 + $0x228] sm:$0xf]  ;;  %v2700_v18 = vor.u32 %v2954_v14, %v2697_v15 }
  0x51   :  { %1896 = vmatmul.bf16.gmra.mxu0 %v4138_v5  ;;  %1983 = vmatmul.bf16.gmra.mxu3 %v4138_v5  ;;  %v3006_v56 = vld [vmem:[#allocation2 + $0x22c] sm:$0xf]  ;;  %v4167_v60 = vor.u32 %v2935_v43, %v2611_v51  ;;  %v3008_v61 = vld [vmem:[#allocation2 + $0x234] sm:$0xf0]  ;;  %v2905_v62 = vld [vmem:[#allocation2 + $0x238] sm:$0xf0]  ;;  %v4169_v4 = vor.u32 %v2934_v52, %v2613_v12 }
  0x52   :  { %2059 = vmatpush.bf16.msrb.mxu1 %v2632_v39  ;;  %v2904_v1 = vor.u32 %v3008_v61, %v2903_v55  ;;  %v2908_v3 = vor.u32 %v3006_v56, %v2905_v62  ;;  %v2825_v19 = vld [vmem:[#allocation2 + $0x198] sm:$0xf0]  ;;  %3333 = vst [vmem:[#allocation2 + $0x208] sm:$0xff] %v3735_v20   ;;  %v2950_v23 = vld [vmem:[#allocation2 + $0x6c] sm:$0xf] }
  0x53   :  { %1925 = vmatmul.bf16.gmra.mxu1 %v4140_v31  ;;  %v2828_v22 = vor.u32 %v2986_v17, %v2825_v19  ;;  %v2681_v24 = vld [vmem:[#allocation2 + $0x78] sm:$0xf0]  ;;  %v2982_v25 = vld [vmem:[#allocation2 + $0x16c] sm:$0xf] }
  0x54   :  { %2116 = vmatpush.bf16.msra.mxu2 %v2904_v1  ;;  %2203 = vmatpush.bf16.msra.mxu3 %v2908_v3  ;;  %v2684_v26 = vor.u32 %v2950_v23, %v2681_v24  ;;  %v2809_v27 = vld [vmem:[#allocation2 + $0x178] sm:$0xf0]  ;;  %v2946_v36 = vld [vmem:[#allocation2 + $0x4c] sm:$0xf] }
  0x55   :  { %v2812_v30 = vor.u32 %v2982_v25, %v2809_v27  ;;  %v2665_v39 = vld [vmem:[#allocation2 + $0x58] sm:$0xf0]  ;;  %v2978_v41 = vld [vmem:[#allocation2 + $0x14c] sm:$0xf] }
  0x56   :  { %2168 = vmatpush.bf16.msra.mxu1 %v2876_v50  ;;  %v3004_v13 = vld [vmem:[#allocation2 + $0x214] sm:$0xf0]  ;;  %v2889_v32 = vld [vmem:[#allocation2 + $0x218] sm:$0xf0]  ;;  %v2668_v9 = vor.u32 %v2946_v36, %v2665_v39  ;;  %v2942_v46 = vld [vmem:[#allocation2 + $0x2c] sm:$0xf] }
  0x57   :  { %v2793_v42 = vld [vmem:[#allocation2 + $0x158] sm:$0xf0]  ;;  %v2974_v50 = vld [vmem:[#allocation2 + $0x12c] sm:$0xf] }
  0x58   :  { %2343 = vperm.xlu2 %3751, %v3943_v44   ;;  %v2958_v44 = vld [vmem:[#allocation2 + $0xac] sm:$0xf]  ;;  %v2796_v45 = vor.u32 %v2978_v41, %v2793_v42  ;;  %v2649_v47 = vld [vmem:[#allocation2 + $0x38] sm:$0xf0] }
  0x59   :  { %v2716_v16 = vor.u32 %v2958_v44, %v2713_v6  ;;  %v2887_v28 = vld [vmem:[#allocation2 + $0x208] sm:$0xf]  ;;  %v3002_v29 = vld [vmem:[#allocation2 + $0x20c] sm:$0xf]  ;;  %v2652_v48 = vor.u32 %v2942_v46, %v2649_v47  ;;  %v2777_v51 = vld [vmem:[#allocation2 + $0x138] sm:$0xf0] }
  0x5a   :  { %2002 = vmatmul.bf16.vlgmr.msrb.gmra.mxu2 %v4009_v40  ;;  %2169 = vmatpush.bf16.msra.mxu1 %v2860_v0  ;;  %v2888_v34 = vor.u32 %v3004_v13, %v2887_v28  ;;  %v2892_v35 = vor.u32 %v3002_v29, %v2889_v32  ;;  %v2780_v43 = vor.u32 %v2974_v50, %v2777_v51  ;;  %v2938_v52 = vld [vmem:[#allocation2 + $0xc] sm:$0xf]  ;;  %v2633_v12 = vld [vmem:[#allocation2 + $0x18] sm:$0xf0] }
  0x5b   :  { %2141 = vmatpush.bf16.msra.mxu0 %v2716_v16  ;;  %v2636_v53 = vor.u32 %v2938_v52, %v2633_v12  ;;  %v2970_v54 = vld [vmem:[#allocation2 + $0x10c] sm:$0xf]  ;;  %v2761_v2 = vld [vmem:[#allocation2 + $0x118] sm:$0xf0] }
  0x5c   :  { %2117 = vmatpush.bf16.msra.mxu2 %v2888_v34  ;;  %2204 = vmatpush.bf16.msra.mxu3 %v2892_v35  ;;  %v2764_v55 = vor.u32 %v2970_v54, %v2761_v2 }
  0x5e   :  { %2170 = vmatpush.bf16.msra.mxu1 %v2844_v11 }
  0x5f   :  { %2142 = vmatpush.bf16.msra.mxu0 %v2700_v18 }
  0x61   :  { %1901 = vmatmul.bf16.gmra.mxu0 %v4167_v60  ;;  %1988 = vmatmul.bf16.gmra.mxu3 %v4167_v60 }
  0x62   :  { %2171 = vmatpush.bf16.msra.mxu1 %v2828_v22 }
  0x63   :  { %1930 = vmatmul.bf16.gmra.mxu1 %v4169_v4  ;;  %2143 = vmatpush.bf16.msra.mxu0 %v2684_v26 }
  0x66   :  { %2172 = vmatpush.bf16.msra.mxu1 %v2812_v30 }
  0x67   :  { %2144 = vmatpush.bf16.msra.mxu0 %v2668_v9 }
  0x6a   :  { %2007 = vmatmul.bf16.gmra.mxu2 %v4078_v49  ;;  %2173 = vmatpush.bf16.msra.mxu1 %v2796_v45 }
  0x6b   :  { %2145 = vmatpush.bf16.msra.mxu0 %v2652_v48 }
  0x6e   :  { %2174 = vmatpush.bf16.msra.mxu1 %v2780_v43 }
  0x6f   :  { %2146 = vmatpush.bf16.msra.mxu0 %v2636_v53 }
  0x71   :  { %2913 = vmatmul.msk.bf16.vlgmr.msrb.gmra.mxu0 %vm1865_vm0, %v3882_v58  ;;  %2089 = vmatmul.bf16.vlgmr.msrb.gmra.mxu3 %v4009_v40 }
  0x72   :  { %2175 = vmatpush.bf16.msra.mxu1 %v2764_v55 }
  0x73   :  { %2060 = vmatmul.bf16.vlgmr.msrb.gmra.mxu1 %v3996_v33 }
  0x75   :  { %v4223_v19 = vpop.permute.xlu2 %1427 }
  0x7a   :  { %2012 = vmatmul.bf16.gmra.mxu2 %v4140_v31  ;;  %v4201_v59 = vpop.permute.xlu0 %1407  ;;  %v4215_v17 = vpop.permute.xlu1 %1417 }
  0x7d   :  { %v4235_v30 = vpop.permute.xlu2 %1432 }
  0x81   :  { %2914 = vmatmul.msk.bf16.gmra.mxu0 %vm1865_vm0, %v3964_v63  ;;  %2094 = vmatmul.bf16.gmra.mxu3 %v4078_v49 }
  0x82   :  { %v4212_v7 = vpop.permute.xlu0 %1412  ;;  %v4232_v25 = vpop.permute.xlu1 %1422 }
  0x83   :  { %2065 = vmatmul.bf16.gmra.mxu1 %v4069_v37 }
  0x87   :  { %v4247_v39 = vpop.permute.xlu2 %2259 }
  0x8a   :  { %2017 = vmatmul.bf16.gmra.mxu2 %v4169_v4  ;;  %v4255_v48 = vpop.permute.xlu1 %1442 }
  0x90   :  { %v4263_v43 = vpop.permute.xlu2 %2271 }
  0x91   :  { %2915 = vmatmul.msk.bf16.gmra.mxu0 %vm1865_vm0, %v4039_v10  ;;  %2099 = vmatmul.bf16.gmra.mxu3 %v4140_v31 }
  0x93   :  { %2070 = vmatmul.bf16.gmra.mxu1 %v4138_v5 }
  0x9a   :  { %2917 = vmatmul.msk.bf16.vlgmr.msra.gmra.mxu2 %vm1865_vm0, %v3882_v58 }
  0x9d   :  { %v1945_v56 = vpop.f32.mrf.mxu2 }
  0xa1   :  { %2916 = vmatmul.msk.bf16.gmra.mxu0 %vm1865_vm0, %v4119_v38  ;;  %2104 = vmatmul.bf16.gmra.mxu3 %v4169_v4 }
  0xa3   :  { %2075 = vmatmul.bf16.gmra.mxu1 %v4167_v60 }
  0xa5   :  { %v1947_v57 = vpop.f32.mrf.mxu2 }
  0xaa   :  { %2918 = vmatmul.msk.bf16.gmra.mxu2 %vm1865_vm0, %v3964_v63 }
  0xad   :  { %v1950_v61 = vpop.f32.mrf.mxu2 }
  0xae   :  { %v1887_v62 = vpop.f32.mrf.mxu0 }
  0xaf   :  { %v1888_v0 = vadd.f32 %v1887_v62, %v4201_v59 }
  0xb0   :  { %v1916_v1 = vpop.f32.mrf.mxu1 }
  0xb1   :  { %v1917_v3 = vadd.f32 %v1916_v1, %v1888_v0  ;;  %2147 = vmatmul.bf16.vlgmr.msra.gmra.mxu0 %v3996_v33  ;;  %2921 = vmatmul.msk.bf16.vlgmr.msra.gmra.mxu3 %vm1865_vm0, %v3882_v58 }
  0xb3   :  { %v4209_v44 = vadd.f32 %v1945_v56, %v1917_v3  ;;  %2176 = vmatmul.bf16.vlgmr.msra.gmra.mxu1 %v4009_v40  ;;  %v4270_v56 = vpop.permute.xlu1 %2267  ;;  %v4279_v3 = vpop.permute.xlu2 %2279 }
  0xb4   :  { %v1974_v6 = vpop.f32.mrf.mxu3 }
  0xb5   :  { %v1952_v16 = vpop.f32.mrf.mxu2 }
  0xb6   :  { %v1889_v8 = vpop.f32.mrf.mxu0 }
  0xb7   :  { %v1890_v11 = vadd.f32 %v1889_v8, %v4212_v7 }
  0xb8   :  { %v1918_v14 = vpop.f32.mrf.mxu1 }
  0xb9   :  { %v1919_v15 = vadd.f32 %v1918_v14, %v1890_v11 }
  0xba   :  { %2919 = vmatmul.msk.bf16.gmra.mxu2 %vm1865_vm0, %v4039_v10 }
  0xbb   :  { %v4217_v18 = vadd.f32 %v1947_v57, %v1919_v15  ;;  %v4287_v14 = vpop.permute.xlu1 %2275 }
  0xbc   :  { %v4221_v58 = vpop.f32.mrf.mxu3 }
  0xbd   :  { %v1955_v33 = vpop.f32.mrf.mxu2 }
  0xbe   :  { %v1892_v40 = vpop.f32.mrf.mxu0 }
  0xbf   :  { %v1893_v20 = vadd.f32 %v1892_v40, %v4215_v17 }
  0xc0   :  { %v1921_v21 = vpop.f32.mrf.mxu1 }
  0xc1   :  { %v1922_v22 = vadd.f32 %v1921_v21, %v1893_v20  ;;  %2152 = vmatmul.bf16.gmra.mxu0 %v4069_v37  ;;  %2922 = vmatmul.msk.bf16.gmra.mxu3 %vm1865_vm0, %v3964_v63 }
  0xc3   :  { %v4229_v23 = vadd.f32 %v1950_v61, %v1922_v22  ;;  %2181 = vmatmul.bf16.gmra.mxu1 %v4078_v49 }
  0xc4   :  { %v1979_v24 = vpop.f32.mrf.mxu3 }
  0xc5   :  { %v1957_v26 = vpop.f32.mrf.mxu2 }
  0xc6   :  { %v1894_v27 = vpop.f32.mrf.mxu0 }
  0xc7   :  { %v1895_v28 = vadd.f32 %v1894_v27, %v4232_v25  ;;  %v4293_v27 = vpop.permute.xlu2 %2323 }
  0xc8   :  { %v1923_v29 = vpop.f32.mrf.mxu1 }
  0xc9   :  { %v1924_v13 = vadd.f32 %v1923_v29, %v1895_v28  ;;  %v1977_v29 = vadd.f32 %v4221_v58, %v4212_v7 }
  0xca   :  { %2920 = vmatmul.msk.bf16.gmra.mxu2 %vm1865_vm0, %v4119_v38 }
  0xcb   :  { %v4237_v32 = vadd.f32 %v1952_v16, %v1924_v13 }
  0xcc   :  { %v4241_v63 = vpop.f32.mrf.mxu3 }
  0xcd   :  { %v1960_v37 = vpop.f32.mrf.mxu2 }
  0xce   :  { %v1897_v49 = vpop.f32.mrf.mxu0 }
  0xcf   :  { %v1898_v34 = vadd.f32 %v1897_v49, %v4223_v19  ;;  %v2230_v49 = vmax.f32 %v4217_v18, 0.0 }
  0xd0   :  { %v1926_v35 = vpop.f32.mrf.mxu1 }
  0xd1   :  { %v1927_v36 = vadd.f32 %v1926_v35, %v1898_v34  ;;  %2157 = vmatmul.bf16.gmra.mxu0 %v4138_v5  ;;  %2923 = vmatmul.msk.bf16.gmra.mxu3 %vm1865_vm0, %v4039_v10  ;;  %v4257_v5 = vpop.permute.xlu0 %1437 }
  0xd3   :  { %v4249_v9 = vadd.f32 %v1955_v33, %v1927_v36  ;;  %2186 = vmatmul.bf16.gmra.mxu1 %v4140_v31  ;;  %v1975_v31 = vadd.f32 %v1974_v6, %v4201_v59 }
  0xd4   :  { %v4252_v41 = vpop.f32.mrf.mxu3 }
  0xd5   :  { %v1962_v42 = vpop.f32.mrf.mxu2 }
  0xd6   :  { %v1899_v45 = vpop.f32.mrf.mxu0 }
  0xd7   :  { %v1900_v46 = vadd.f32 %v1899_v45, %v4235_v30 }
  0xd8   :  { %v1928_v47 = vpop.f32.mrf.mxu1 }
  0xd9   :  { %v1929_v50 = vadd.f32 %v1928_v47, %v1900_v46  ;;  %v4277_v62 = vpop.permute.xlu0 %2263  ;;  %v4308_v46 = vpop.permute.xlu1 %2287 }
  0xda   :  { %4541 = vst [vmem:[#allocation3_spill] sm:$0xff] %v4308_v46 }
  0xdb   :  { %v4259_v51 = vadd.f32 %v1957_v26, %v1929_v50 }
  0xdc   :  { %v4261_v10 = vpop.f32.mrf.mxu3 }
  0xdd   :  { %v2003_v52 = vpop.f32.mrf.mxu2 }
  0xde   :  { %v1902_v12 = vpop.f32.mrf.mxu0  ;;  %v2004_v53 = vadd.f32 %v2003_v52, %v1975_v31  ;;  %v2294_v31 = vmul.f32 %v4277_v62, %v2230_v49 }
  0xdf   :  { %v1903_v54 = vadd.f32 %v1902_v12, %v4257_v5 }
  0xe0   :  { %v1931_v2 = vpop.f32.mrf.mxu1 }
  0xe1   :  { %v1932_v55 = vadd.f32 %v1931_v2, %v1903_v54  ;;  %2162 = vmatmul.bf16.gmra.mxu0 %v4167_v60  ;;  %2924 = vmatmul.msk.bf16.gmra.mxu3 %vm1865_vm0, %v4119_v38  ;;  %v2226_v38 = vmax.f32 %v4209_v44, 0.0  ;;  %v4291_v22 = vpop.permute.xlu0 %2283 }
  0xe3   :  { %v4272_v57 = vadd.f32 %v1960_v37, %v1932_v55  ;;  %2191 = vmatmul.bf16.gmra.mxu1 %v4169_v4  ;;  %v1980_v4 = vadd.f32 %v1979_v24, %v4215_v17  ;;  %v2290_v21 = vmul.f32 %v4247_v39, %v2226_v38  ;;  %v1985_v55 = vadd.f32 %v4252_v41, %v4223_v19 }
  0xe4   :  { %v4275_v61 = vpop.f32.mrf.mxu3  ;;  %v1982_v41 = vadd.f32 %v4241_v63, %v4232_v25 }
  0xe5   :  { %v2005_v0 = vpop.f32.mrf.mxu2  ;;  %v4300_v24 = vadd.f32 %v4293_v27, %v2290_v21 }
  0xe6   :  { %v1904_v1 = vpop.f32.mrf.mxu0  ;;  %v2006_v34 = vadd.f32 %v2005_v0, %v1977_v29 }
  0xe7   :  { %v1905_v6 = vadd.f32 %v1904_v1, %v4255_v48 }
  0xe8   :  { %v1933_v60 = vpop.f32.mrf.mxu1 }
  0xe9   :  { %v1934_v16 = vadd.f32 %v1933_v60, %v1905_v6  ;;  %v4315_v18 = vpop.permute.xlu0 %2327 }
  0xea   :  { %v4322_v2 = vadd.f32 %v4315_v18, %v2294_v31 }
  0xeb   :  { %v4282_v8 = vadd.f32 %v1962_v42, %v1934_v16 }
  0xec   :  { %v4285_v11 = vpop.f32.mrf.mxu3 }
  0xed   :  { %v2008_v15 = vpop.f32.mrf.mxu2 }
  0xee   :  { %v2032_v33 = vpop.f32.mrf.mxu0  ;;  %v2009_v40 = vadd.f32 %v2008_v15, %v1980_v4  ;;  %v4332_v15 = vpop.permute.xlu1 %2331 }
  0xef   :  { %v2033_v20 = vadd.f32 %v2032_v33, %v2004_v53  ;;  %v2234_v53 = vmax.f32 %v4229_v23, 0.0 }
  0xf0   :  { %v2061_v26 = vpop.f32.mrf.mxu1 }
  0xf1   :  { %v2227_v28 = vmax.f32 %v2033_v20, 0.0  ;;  %v2062_v44 = vadd.f32 %v2061_v26, %v4201_v59  ;;  %v2298_v23 = vmul.f32 %v4270_v56, %v2234_v53 }
  0xf3   :  { %v2291_v13 = vmul.f32 %v4247_v39, %v2227_v28  ;;  %v4339_v26 = vadd.f32 %v4332_v15, %v2298_v23 }
  0xf4   :  { %v2090_v37 = vpop.f32.mrf.mxu3 }
  0xf5   :  { %v4304_v35 = vadd.f32 %v4293_v27, %v2291_v13  ;;  %v4306_v36 = vadd.f32 %v2090_v37, %v2062_v44  ;;  %v2010_v42 = vpop.f32.mrf.mxu2  ;;  %v2238_v44 = vmax.f32 %v4237_v32, 0.0 }
  0xf6   :  { %v2034_v45 = vpop.f32.mrf.mxu0 }
  0xf7   :  { %v2035_v47 = vadd.f32 %v2034_v45, %v2006_v34 }
  0xf8   :  { %v4312_v50 = vpop.f32.mrf.mxu1 }
  0xf9   :  { %v2231_v52 = vmax.f32 %v2035_v47, 0.0  ;;  %v2302_v47 = vmul.f32 %v4263_v43, %v2238_v44 }
  0xfb   :  { %v2295_v12 = vmul.f32 %v4277_v62, %v2231_v52  ;;  %v4352_v52 = vpop.permute.xlu2 %2335 }
  0xfc   :  { %v4319_v54 = vpop.f32.mrf.mxu3  ;;  %v4359_v53 = vadd.f32 %v4352_v52, %v2302_v47 }
  0xfd   :  { %v4327_v0 = vadd.f32 %v4315_v18, %v2295_v12  ;;  %v2013_v1 = vpop.f32.mrf.mxu2 }
  0xfe   :  { %v2037_v6 = vpop.f32.mrf.mxu0  ;;  %v2014_v16 = vadd.f32 %v2013_v1, %v1985_v55  ;;  %v1990_v55 = vadd.f32 %v4275_v61, %v4257_v5  ;;  %v1987_v61 = vadd.f32 %v4261_v10, %v4235_v30 }
  0xff   :  { %v2038_v38 = vadd.f32 %v2037_v6, %v2009_v40  ;;  %v2011_v40 = vadd.f32 %v2010_v42, %v1982_v41  ;;  %v2242_v42 = vmax.f32 %v4249_v9, 0.0  ;;  %v4369_v41 = vpop.permute.xlu1 %2339 }
 0x100   :  { %v2066_v4 = vpop.f32.mrf.mxu1 }
 0x101   :  { %v2235_v33 = vmax.f32 %v2038_v38, 0.0  ;;  %v2067_v20 = vadd.f32 %v2066_v4, %v4215_v17  ;;  %v2306_v9 = vmul.f32 %v4287_v14, %v2242_v42 }
 0x103   :  { %v2299_v21 = vmul.f32 %v4270_v56, %v2235_v33 }
 0x104   :  { %v2095_v28 = vpop.f32.mrf.mxu3 }
 0x105   :  { %v4343_v29 = vadd.f32 %v4332_v15, %v2299_v21  ;;  %v4345_v13 = vadd.f32 %v2095_v28, %v2067_v20  ;;  %v2015_v37 = vpop.f32.mrf.mxu2 }
 0x106   :  { %v2039_v49 = vpop.f32.mrf.mxu0 }
 0x107   :  { %v2040_v63 = vadd.f32 %v2039_v49, %v2011_v40  ;;  %v4376_v40 = vadd.f32 %v4369_v41, %v2306_v9  ;;  %v4389_v9 = vpop.permute.xlu2 %2343  ;;  %v4424_v58 = vpop.permute.xlu1 %2351 }
 0x108   :  { %v4349_v45 = vpop.f32.mrf.mxu1  ;;  %4544 = vst [vmem:[#allocation6_spill] sm:$0xff] %v4424_v58 }
 0x109   :  { %v2239_v31 = vmax.f32 %v2040_v63, 0.0  ;;  %v2246_v63 = vmax.f32 %v4259_v51, 0.0 }
 0x10b   :  { %v2303_v32 = vmul.f32 %v4263_v43, %v2239_v31 }
 0x10c   :  { %v4356_v12 = vpop.f32.mrf.mxu3 }
 0x10d   :  { %v4364_v1 = vadd.f32 %v4352_v52, %v2303_v32  ;;  %v2018_v6 = vpop.f32.mrf.mxu2 }
 0x10e   :  { %v2042_v38 = vpop.f32.mrf.mxu0  ;;  %v2019_v4 = vadd.f32 %v2018_v6, %v1990_v55 }
 0x10f   :  { %v2043_v33 = vadd.f32 %v2042_v38, %v2014_v16  ;;  %v2016_v16 = vadd.f32 %v2015_v37, %v1987_v61  ;;  %v2310_v38 = vmul.f32 %v4279_v3, %v2246_v63  ;;  %v2250_v37 = vmax.f32 %v4272_v57, 0.0 }
 0x110   :  { %v2071_v20 = vpop.f32.mrf.mxu1 }
 0x111   :  { %v2243_v21 = vmax.f32 %v2043_v33, 0.0  ;;  %v2072_v28 = vadd.f32 %v2071_v20, %v4223_v19 }
 0x113   :  { %v2307_v44 = vmul.f32 %v4287_v14, %v2243_v21  ;;  %v4396_v21 = vadd.f32 %v4389_v9, %v2310_v38  ;;  %v1992_v38 = vadd.f32 %v4285_v11, %v4255_v48 }
 0x114   :  { %v2100_v49 = vpop.f32.mrf.mxu3 }
 0x115   :  { %v4380_v47 = vadd.f32 %v4369_v41, %v2307_v44  ;;  %v4382_v31 = vadd.f32 %v2100_v49, %v2072_v28  ;;  %v2020_v32 = vpop.f32.mrf.mxu2  ;;  %v2254_v49 = vmax.f32 %v4282_v8, 0.0 }
 0x116   :  { %v2044_v42 = vpop.f32.mrf.mxu0 }
 0x117   :  { %v2045_v10 = vadd.f32 %v2044_v42, %v2016_v16  ;;  %v2314_v16 = vmul.f32 %v4291_v22, %v2250_v37 }
 0x118   :  { %v4386_v6 = vpop.f32.mrf.mxu1 }
 0x119   :  { %v2247_v33 = vmax.f32 %v2045_v10, 0.0  ;;  %v4404_v10 = vpop.permute.xlu0 %2347 }
 0x11a   :  { %v4411_v55 = vadd.f32 %v4404_v10, %v2314_v16  ;;  %v2318_v16 = vmul.f32 %v4308_v46, %v2254_v49 }
 0x11b   :  { %v2311_v51 = vmul.f32 %v4279_v3, %v2247_v33 }
 0x11c   :  { %v4393_v20 = vpop.f32.mrf.mxu3  ;;  %4542 = vst [vmem:[#allocation4_spill] sm:$0xff] %v4411_v55 }
 0x11d   :  { %v4399_v28 = vadd.f32 %v4389_v9, %v2311_v51  ;;  %v2119_v61 = vpop.f32.mrf.mxu2 }
 0x11e   :  { %v2047_v44 = vpop.f32.mrf.mxu0 }
 0x11f   :  { %v2048_v63 = vadd.f32 %v2047_v44, %v2019_v4  ;;  %v2021_v4 = vadd.f32 %v2020_v32, %v1992_v38 }
 0x120   :  { %v2076_v42 = vpop.f32.mrf.mxu1 }
 0x121   :  { %v2251_v57 = vmax.f32 %v2048_v63, 0.0  ;;  %v2077_v33 = vadd.f32 %v2076_v42, %v4257_v5 }
 0x123   :  { %v2315_v51 = vmul.f32 %v4291_v22, %v2251_v57 }
 0x124   :  { %v2105_v23 = vpop.f32.mrf.mxu3 }
 0x125   :  { %v4415_v37 = vadd.f32 %v4404_v10, %v2315_v51  ;;  %v4417_v44 = vadd.f32 %v2105_v23, %v2077_v33  ;;  %v2121_v11 = vpop.f32.mrf.mxu2  ;;  %v4430_v23 = vadd.f32 %v4424_v58, %v2318_v16  ;;  %v2120_v51 = vadd.f32 %v2119_v61, %v4306_v36 }
 0x126   :  { %v2049_v63 = vpop.f32.mrf.mxu0 }
 0x127   :  { %4543 = vst [vmem:[#allocation5_spill] sm:$0xff] %v4415_v37  ;;  %v2050_v34 = vadd.f32 %v2049_v63, %v2021_v4  ;;  %v2228_v37 = vmax.f32 %v2120_v51, 0.0 }
 0x128   :  { %v4421_v60 = vpop.f32.mrf.mxu1  ;;  %4545 = vst [vmem:[#allocation7_spill] sm:$0xff] %v4430_v23 }
 0x129   :  { %v2255_v57 = vmax.f32 %v2050_v34, 0.0 }
 0x12b   :  { %v2319_v8 = vmul.f32 %v4308_v46, %v2255_v57  ;;  %v2064_v57 = vadd.f32 %v4312_v50, %v4212_v7  ;;  %v2292_v46 = vmul.f32 %v4247_v39, %v2228_v37 }
 0x12c   :  { %v4427_v32 = vpop.f32.mrf.mxu3 }
 0x12d   :  { %v4433_v33 = vadd.f32 %v4424_v58, %v2319_v8  ;;  %v2124_v42 = vpop.f32.mrf.mxu2  ;;  %v2093_v55 = vadd.f32 %v4319_v54, %v2064_v57 }
 0x12e   :  { %v2148_v38 = vpop.f32.mrf.mxu0  ;;  %v2125_v57 = vadd.f32 %v2124_v42, %v4345_v13 }
 0x12f   :  { %4546 = vst [vmem:[#allocation8_spill] sm:$0xff] %v4433_v33  ;;  %v2149_v34 = vadd.f32 %v2148_v38, %v4201_v59  ;;  %v2122_v36 = vadd.f32 %v2121_v11, %v2093_v55  ;;  %v2356_v38 = vadd.f32 %v4293_v27, %v2292_v46 }
 0x130   :  { %v2177_v49 = vpop.f32.mrf.mxu1 }
 0x131   :  { %v2178_v63 = vadd.f32 %v2177_v49, %v2149_v34  ;;  %v2232_v34 = vmax.f32 %v2122_v36, 0.0 }
 0x133   :  { %v2296_v55 = vmul.f32 %v4277_v62, %v2232_v34 }
 0x134   :  { %v2206_v16 = vpop.f32.mrf.mxu3 }
 0x135   :  { %v2207_v8 = vadd.f32 %v2206_v16, %v2178_v63  ;;  %v2126_v49 = vpop.f32.mrf.mxu2 }
 0x136   :  { %v2150_v58 = vpop.f32.mrf.mxu0 }
 0x137   :  { %v2229_v61 = vmax.f32 %v2207_v8, 0.0  ;;  %v2151_v4 = vadd.f32 %v2150_v58, %v4212_v7  ;;  %v4547_v7 = vmax.f32 %v4300_v24, %v4304_v35 }
 0x138   :  { %v2179_v33 = vpop.f32.mrf.mxu1 }
 0x139   :  { %v2293_v59 = vmul.f32 %v4247_v39, %v2229_v61  ;;  %v2180_v51 = vadd.f32 %v2179_v33, %v2151_v4  ;;  %v2236_v33 = vmax.f32 %v2125_v57, 0.0  ;;  %v2069_v4 = vadd.f32 %v4349_v45, %v4232_v25 }
 0x13b   :  { %v2357_v50 = vadd.f32 %v4293_v27, %v2293_v59  ;;  %v2098_v8 = vadd.f32 %v4356_v12, %v2069_v4  ;;  %v2300_v36 = vmul.f32 %v4270_v56, %v2236_v33  ;;  %v2074_v33 = vadd.f32 %v4386_v6, %v4235_v30 }
 0x13c   :  { %v2208_v23 = vpop.f32.mrf.mxu3 }
 0x13d   :  { %v2394_v54 = vmax.f32 %v2356_v38, %v2357_v50  ;;  %v2209_v63 = vadd.f32 %v2208_v23, %v2180_v51  ;;  %v2360_v23 = vadd.f32 %v4315_v18, %v2296_v55  ;;  %v2127_v59 = vadd.f32 %v2126_v49, %v2098_v8 }
 0x13e   :  { %v2153_v37 = vpop.f32.mrf.mxu0  ;;  %v2364_v12 = vadd.f32 %v4332_v15, %v2300_v36 }
 0x13f   :  { %v2402_v58 = vmax.f32 %v4547_v7, %v2394_v54  ;;  %v2233_v39 = vmax.f32 %v2209_v63, 0.0  ;;  %v2154_v46 = vadd.f32 %v2153_v37, %v4215_v17  ;;  %v2129_v17 = vpop.f32.mrf.mxu2  ;;  %v2240_v54 = vmax.f32 %v2127_v59, 0.0 }
 0x140   :  { %v2182_v11 = vpop.f32.mrf.mxu1  ;;  %v2130_v37 = vadd.f32 %v2129_v17, %v4382_v31 }
 0x141   :  { %v2297_v27 = vmul.f32 %v4277_v62, %v2233_v39  ;;  %v2183_v42 = vadd.f32 %v2182_v11, %v2154_v46  ;;  %v4548_v62 = vmax.f32 %v4322_v2, %v4327_v0  ;;  %v2304_v55 = vmul.f32 %v4263_v43, %v2240_v54 }
 0x143   :  { %v2361_v13 = vadd.f32 %v4315_v18, %v2297_v27  ;;  %v2244_v27 = vmax.f32 %v2130_v37, 0.0  ;;  %v2368_v31 = vadd.f32 %v4352_v52, %v2304_v55 }
 0x144   :  { %v2211_v16 = vpop.f32.mrf.mxu3 }
 0x145   :  { %v2395_v24 = vmax.f32 %v2360_v23, %v2361_v13  ;;  %v2212_v35 = vadd.f32 %v2211_v16, %v2183_v42 }
 0x146   :  { %v2155_v61 = vpop.f32.mrf.mxu0 }
 0x147   :  { %v2403_v38 = vmax.f32 %v4548_v62, %v2395_v24  ;;  %v2237_v45 = vmax.f32 %v2212_v35, 0.0  ;;  %v2156_v34 = vadd.f32 %v2155_v61, %v4232_v25  ;;  %v2131_v46 = vpop.f32.mrf.mxu2 }
 0x148   :  { %v2184_v50 = vpop.f32.mrf.mxu1 }
 0x149   :  { %v3367_v18 = vpack.c.bf16 %v2403_v38, %v2402_v58  ;;  %v2301_v51 = vmul.f32 %v4270_v56, %v2237_v45  ;;  %v2185_v63 = vadd.f32 %v2184_v50, %v2156_v34  ;;  %v4549_v56 = vmax.f32 %v4339_v26, %v4343_v29 }
 0x14a   :  { %v2103_v26 = vadd.f32 %v4393_v20, %v2074_v33 }
 0x14b   :  { %3368 = vst [vmem:[%s4532_s3] sm:$0xff] %v3367_v18   ;;  %v2365_v49 = vadd.f32 %v4332_v15, %v2301_v51 }
 0x14c   :  { %v2213_v57 = vpop.f32.mrf.mxu3  ;;  %v2132_v8 = vadd.f32 %v2131_v46, %v2103_v26 }
 0x14d   :  { %v2396_v2 = vmax.f32 %v2364_v12, %v2365_v49  ;;  %v2214_v0 = vadd.f32 %v2213_v57, %v2185_v63  ;;  %v2079_v63 = vadd.f32 %v4421_v60, %v4255_v48 }
 0x14e   :  { %v2158_v25 = vpop.f32.mrf.mxu0  ;;  %v2248_v59 = vmax.f32 %v2132_v8, 0.0 }
 0x14f   :  { %v2404_v7 = vmax.f32 %v4549_v56, %v2396_v2  ;;  %v2241_v58 = vmax.f32 %v2214_v0, 0.0  ;;  %v2159_v39 = vadd.f32 %v2158_v25, %v4223_v19  ;;  %v2308_v19 = vmul.f32 %v4287_v14, %v2244_v27  ;;  %v2134_v61 = vpop.f32.mrf.mxu2 }
 0x150   :  { %v2187_v11 = vpop.f32.mrf.mxu1  ;;  %v2312_v50 = vmul.f32 %v4279_v3, %v2248_v59 }
 0x151   :  { %v2305_v15 = vmul.f32 %v4263_v43, %v2241_v58  ;;  %v2188_v23 = vadd.f32 %v2187_v11, %v2159_v39  ;;  %v4550_v43 = vmax.f32 %v4359_v53, %v4364_v1  ;;  %v2372_v20 = vadd.f32 %v4369_v41, %v2308_v19 }
 0x152   :  { %v2376_v57 = vadd.f32 %v4389_v9, %v2312_v50 }
 0x153   :  { %v2369_v4 = vadd.f32 %v4352_v52, %v2305_v15 }
 0x154   :  { %v2216_v13 = vpop.f32.mrf.mxu3 }
 0x155   :  { %v2397_v29 = vmax.f32 %v2368_v31, %v2369_v4  ;;  %v2217_v42 = vadd.f32 %v2216_v13, %v2188_v23  ;;  %v4553_v31 = vld [vmem:[#allocation3_spill] sm:$0xff]  ;;  %v4555_v23 = vld [vmem:[#allocation5_spill] sm:$0xff] }
 0x156   :  { %v2160_v16 = vpop.f32.mrf.mxu0 }
 0x157   :  { %v2405_v24 = vmax.f32 %v4550_v43, %v2397_v29  ;;  %v2245_v35 = vmax.f32 %v2217_v42, 0.0  ;;  %v2161_v6 = vadd.f32 %v2160_v16, %v4235_v30  ;;  %v2135_v30 = vadd.f32 %v2134_v61, %v4417_v44  ;;  %v2136_v0 = vpop.f32.mrf.mxu2  ;;  %v4557_v42 = vld [vmem:[#allocation6_spill] sm:$0xff]  ;;  %v4558_v43 = vld [vmem:[#allocation7_spill] sm:$0xff] }
 0x158   :  { %v2189_v36 = vpop.f32.mrf.mxu1 }
 0x159   :  { %v3372_v17 = vpack.c.bf16 %v2405_v24, %v2404_v7  ;;  %v2309_v52 = vmul.f32 %v4287_v14, %v2245_v35  ;;  %v2190_v38 = vadd.f32 %v2189_v36, %v2161_v6  ;;  %v4551_v14 = vmax.f32 %v4376_v40, %v4380_v47 }
 0x15a   :  { %v2108_v40 = vadd.f32 %v4427_v32, %v2079_v63 }
 0x15b   :  { %3668 = vst [vmem:[%s4532_s3 + $0x8] sm:$0xff] %v3372_v17   ;;  %v2373_v62 = vadd.f32 %v4369_v41, %v2309_v52  ;;  %v2252_v41 = vmax.f32 %v2135_v30, 0.0 }
 0x15c   :  { %v2218_v53 = vpop.f32.mrf.mxu3  ;;  %v2137_v56 = vadd.f32 %v2136_v0, %v2108_v40 }
 0x15d   :  { %v2398_v1 = vmax.f32 %v2372_v20, %v2373_v62  ;;  %v2219_v45 = vadd.f32 %v2218_v53, %v2190_v38 }
 0x15e   :  { %v2163_v34 = vpop.f32.mrf.mxu0  ;;  %v2256_v32 = vmax.f32 %v2137_v56, 0.0 }
 0x15f   :  { %v2406_v18 = vmax.f32 %v4551_v14, %v2398_v1  ;;  %v2249_v51 = vmax.f32 %v2219_v45, 0.0  ;;  %v2164_v12 = vadd.f32 %v2163_v34, %v4257_v5  ;;  %v2316_v5 = vmul.f32 %v4291_v22, %v2252_v41 }
 0x160   :  { %v2192_v54 = vpop.f32.mrf.mxu1  ;;  %v2320_v4 = vmul.f32 %v4553_v31, %v2256_v32 }
 0x161   :  { %v2313_v49 = vmul.f32 %v4279_v3, %v2249_v51  ;;  %v2193_v2 = vadd.f32 %v2192_v54, %v2164_v12  ;;  %v4552_v3 = vmax.f32 %v4396_v21, %v4399_v28  ;;  %v2380_v11 = vadd.f32 %v4404_v10, %v2316_v5 }
 0x162   :  { %v2384_v19 = vadd.f32 %v4557_v42, %v2320_v4 }
 0x163   :  { %v2377_v44 = vadd.f32 %v4389_v9, %v2313_v49 }
 0x164   :  { %v2221_v37 = vpop.f32.mrf.mxu3 }
 0x165   :  { %v2399_v47 = vmax.f32 %v2376_v57, %v2377_v44  ;;  %v2222_v25 = vadd.f32 %v2221_v37, %v2193_v2 }
 0x166   :  { %v2165_v55 = vpop.f32.mrf.mxu0 }
 0x167   :  { %v2407_v7 = vmax.f32 %v4552_v3, %v2399_v47  ;;  %v2253_v60 = vmax.f32 %v2222_v25, 0.0  ;;  %v2166_v58 = vadd.f32 %v2165_v55, %v4255_v48  ;;  %v4554_v48 = vld [vmem:[#allocation4_spill] sm:$0xff] }
 0x168   :  { %v2194_v46 = vpop.f32.mrf.mxu1  ;;  %v4556_v13 = vmax.f32 %v4554_v48, %v4555_v23 }
 0x169   :  { %v3377_v39 = vpack.c.bf16 %v2407_v7, %v2406_v18  ;;  %v2317_v9 = vmul.f32 %v4291_v22, %v2253_v60  ;;  %v2195_v27 = vadd.f32 %v2194_v46, %v2166_v58 }
 0x16b   :  { %3669 = vst [vmem:[%s4532_s3 + $0x10] sm:$0xff] %v3377_v39   ;;  %v2381_v15 = vadd.f32 %v4404_v10, %v2317_v9  ;;  %v4559_v10 = vld [vmem:[#allocation8_spill] sm:$0xff] }
 0x16c   :  { %v2223_v33 = vpop.f32.mrf.mxu3  ;;  %v4560_v24 = vmax.f32 %v4558_v43, %v4559_v10 }
 0x16d   :  { %v2400_v21 = vmax.f32 %v2380_v11, %v2381_v15  ;;  %v2224_v28 = vadd.f32 %v2223_v33, %v2195_v27 }
 0x16f   :  { %v2408_v22 = vmax.f32 %v4556_v13, %v2400_v21  ;;  %v2257_v26 = vmax.f32 %v2224_v28, 0.0 }
 0x171   :  { %v2321_v29 = vmul.f32 %v4553_v31, %v2257_v26 }
 0x173   :  { %v2385_v16 = vadd.f32 %v4557_v42, %v2321_v29 }
 0x175   :  { %v2401_v8 = vmax.f32 %v2384_v19, %v2385_v16 }
 0x177   :  { %v2409_v35 = vmax.f32 %v4560_v24, %v2401_v8 }
 0x179   :  { %v3382_v6 = vpack.c.bf16 %v2409_v35, %v2408_v22 }
 0x17b   :  { %3670 = vst [vmem:[%s4532_s3 + $0x18] sm:$0xff] %v3382_v6  }

// kernel: cnn_forward.8
= control target key start
LH: loop header
LB: loop body
LE: loop exit
PB: predicated region body
PF: predicated region fallthrough
CT: control target
= control target key end

     0   :  { %vm3641_vm0 = vcmask 523264   ;;  %s8161_s0 = inlined_call_operand.vmem [shape: bf16[64,576], index: 0, kind: input, shape index: {}]   ;;  %s8162_s1 = inlined_call_operand.vmem [shape: f32[64,3], index: 1, kind: input, shape index: {}]   ;;  %s8163_s2 = inlined_call_operand.vmem [shape: bf16[72,8,4,128], index: 2, kind: input, shape index: {}]   ;;  %s8164_s3 = inlined_call_operand.vmem [shape: bf16[64,128], index: 3, kind: output, shape index: {}]  }
   0x1   :  { %v6898_v0 = vld [vmem:[%s8163_s2 + $0xe0] sm:$0xff]  ;;  %v6900_v1 = vld [vmem:[%s8163_s2 + $0xf0] sm:$0xff] }
   0x2   :  { %v6930_v2 = vld [vmem:[%s8163_s2 + $0x1e0] sm:$0xff]  ;;  %v6932_v3 = vld [vmem:[%s8163_s2 + $0x1f0] sm:$0xff]  ;;  %5700 = vst [vmem:[#allocation2 + $0xe0] sm:$0xff] %v6898_v0  }
   0x3   :  { %v6962_v4 = vld [vmem:[%s8163_s2 + $0x2e0] sm:$0xff]  ;;  %5710 = vst [vmem:[#allocation2 + $0xf0] sm:$0xff] %v6900_v1   ;;  %v6964_v5 = vld [vmem:[%s8163_s2 + $0x2f0] sm:$0xff] }
   0x4   :  { %5860 = vst [vmem:[#allocation2 + $0x1e0] sm:$0xff] %v6930_v2   ;;  %v6994_v6 = vld [vmem:[%s8163_s2 + $0x3e0] sm:$0xff]  ;;  %v6996_v7 = vld [vmem:[%s8163_s2 + $0x3f0] sm:$0xff] }
   0x5   :  { %5870 = vst [vmem:[#allocation2 + $0x1f0] sm:$0xff] %v6932_v3   ;;  %v6894_v8 = vld [vmem:[%s8163_s2 + $0xc0] sm:$0xff]  ;;  %v6896_v9 = vld [vmem:[%s8163_s2 + $0xd0] sm:$0xff] }
   0x6   :  { %6020 = vst [vmem:[#allocation2 + $0x2e0] sm:$0xff] %v6962_v4   ;;  %v6926_v10 = vld [vmem:[%s8163_s2 + $0x1c0] sm:$0xff]  ;;  %v6928_v12 = vld [vmem:[%s8163_s2 + $0x1d0] sm:$0xff] }
   0x7   :  { %6030 = vst [vmem:[#allocation2 + $0x2f0] sm:$0xff] %v6964_v5   ;;  %v6958_v14 = vld [vmem:[%s8163_s2 + $0x2c0] sm:$0xff]  ;;  %v6960_v17 = vld [vmem:[%s8163_s2 + $0x2d0] sm:$0xff] }
   0x8   :  { %6180 = vst [vmem:[#allocation2 + $0x3e0] sm:$0xff] %v6994_v6   ;;  %v6990_v19 = vld [vmem:[%s8163_s2 + $0x3c0] sm:$0xff]  ;;  %v6992_v22 = vld [vmem:[%s8163_s2 + $0x3d0] sm:$0xff] }
   0x9   :  { %v4919_v11 = vld [vmem:[#allocation2 + $0xe0] sm:$0xf]  ;;  %6190 = vst [vmem:[#allocation2 + $0x3f0] sm:$0xff] %v6996_v7   ;;  %v6892_v27 = vld [vmem:[%s8163_s2 + $0xb0] sm:$0xff] }
   0xa   :  { %v5447_v13 = vld [vmem:[#allocation2 + $0xec] sm:$0xf0]  ;;  %5680 = vst [vmem:[#allocation2 + $0xc0] sm:$0xff] %v6894_v8   ;;  %v6890_v24 = vld [vmem:[%s8163_s2 + $0xa0] sm:$0xff] }
   0xb   :  { %v4920_v15 = vor.u32 %v5447_v13, %v4919_v11  ;;  %v5047_v16 = vld [vmem:[#allocation2 + $0x1e0] sm:$0xf]  ;;  %5690 = vst [vmem:[#allocation2 + $0xd0] sm:$0xff] %v6896_v9   ;;  %v6924_v32 = vld [vmem:[%s8163_s2 + $0x1b0] sm:$0xff] }
   0xc   :  { %v5479_v18 = vld [vmem:[#allocation2 + $0x1ec] sm:$0xf0]  ;;  %5840 = vst [vmem:[#allocation2 + $0x1c0] sm:$0xff] %v6926_v10   ;;  %v6922_v29 = vld [vmem:[%s8163_s2 + $0x1a0] sm:$0xff] }
   0xd   :  { %3654 = vmatpush.bf16.msra.mxu0 %v4920_v15  ;;  %v5048_v20 = vor.u32 %v5479_v18, %v5047_v16  ;;  %v5175_v21 = vld [vmem:[#allocation2 + $0x2e0] sm:$0xf]  ;;  %5850 = vst [vmem:[#allocation2 + $0x1d0] sm:$0xff] %v6928_v12   ;;  %v6956_v37 = vld [vmem:[%s8163_s2 + $0x2b0] sm:$0xff] }
   0xe   :  { %v5511_v23 = vld [vmem:[#allocation2 + $0x2ec] sm:$0xf0]  ;;  %6000 = vst [vmem:[#allocation2 + $0x2c0] sm:$0xff] %v6958_v14   ;;  %v6954_v34 = vld [vmem:[%s8163_s2 + $0x2a0] sm:$0xff] }
   0xf   :  { %3683 = vmatpush.bf16.msra.mxu1 %v5048_v20  ;;  %v5176_v25 = vor.u32 %v5511_v23, %v5175_v21  ;;  %v5303_v26 = vld [vmem:[#allocation2 + $0x3e0] sm:$0xf]  ;;  %6010 = vst [vmem:[#allocation2 + $0x2d0] sm:$0xff] %v6960_v17   ;;  %v6988_v42 = vld [vmem:[%s8163_s2 + $0x3b0] sm:$0xff] }
  0x10   :  { %v5543_v28 = vld [vmem:[#allocation2 + $0x3ec] sm:$0xf0]  ;;  %6160 = vst [vmem:[#allocation2 + $0x3c0] sm:$0xff] %v6990_v19   ;;  %v6986_v39 = vld [vmem:[%s8163_s2 + $0x3a0] sm:$0xff] }
  0x11   :  { %3712 = vmatpush.bf16.msra.mxu2 %v5176_v25  ;;  %v5304_v30 = vor.u32 %v5543_v28, %v5303_v26  ;;  %v4903_v31 = vld [vmem:[#allocation2 + $0xc0] sm:$0xf]  ;;  %6170 = vst [vmem:[#allocation2 + $0x3d0] sm:$0xff] %v6992_v22   ;;  %v6888_v47 = vld [vmem:[%s8163_s2 + $0x90] sm:$0xff] }
  0x12   :  { %v5443_v33 = vld [vmem:[#allocation2 + $0xcc] sm:$0xf0]  ;;  %5660 = vst [vmem:[#allocation2 + $0xa0] sm:$0xff] %v6890_v24   ;;  %v6886_v44 = vld [vmem:[%s8163_s2 + $0x80] sm:$0xff] }
  0x13   :  { %3741 = vmatpush.bf16.msra.mxu3 %v5304_v30  ;;  %v4904_v35 = vor.u32 %v5443_v33, %v4903_v31  ;;  %v5031_v36 = vld [vmem:[#allocation2 + $0x1c0] sm:$0xf]  ;;  %5670 = vst [vmem:[#allocation2 + $0xb0] sm:$0xff] %v6892_v27   ;;  %v6920_v52 = vld [vmem:[%s8163_s2 + $0x190] sm:$0xff] }
  0x14   :  { %v5475_v38 = vld [vmem:[#allocation2 + $0x1cc] sm:$0xf0]  ;;  %5820 = vst [vmem:[#allocation2 + $0x1a0] sm:$0xff] %v6922_v29   ;;  %v6918_v49 = vld [vmem:[%s8163_s2 + $0x180] sm:$0xff] }
  0x15   :  { %3655 = vmatpush.bf16.msra.mxu0 %v4904_v35  ;;  %v5032_v40 = vor.u32 %v5475_v38, %v5031_v36  ;;  %v5159_v41 = vld [vmem:[#allocation2 + $0x2c0] sm:$0xf]  ;;  %5830 = vst [vmem:[#allocation2 + $0x1b0] sm:$0xff] %v6924_v32   ;;  %v6952_v57 = vld [vmem:[%s8163_s2 + $0x290] sm:$0xff] }
  0x16   :  { %v5507_v43 = vld [vmem:[#allocation2 + $0x2cc] sm:$0xf0]  ;;  %5980 = vst [vmem:[#allocation2 + $0x2a0] sm:$0xff] %v6954_v34   ;;  %v6950_v54 = vld [vmem:[%s8163_s2 + $0x280] sm:$0xff] }
  0x17   :  { %3684 = vmatpush.bf16.msra.mxu1 %v5032_v40  ;;  %v5160_v45 = vor.u32 %v5507_v43, %v5159_v41  ;;  %v5287_v46 = vld [vmem:[#allocation2 + $0x3c0] sm:$0xf]  ;;  %5990 = vst [vmem:[#allocation2 + $0x2b0] sm:$0xff] %v6956_v37   ;;  %v6984_v62 = vld [vmem:[%s8163_s2 + $0x390] sm:$0xff] }
  0x18   :  { %v5539_v48 = vld [vmem:[#allocation2 + $0x3cc] sm:$0xf0]  ;;  %6140 = vst [vmem:[#allocation2 + $0x3a0] sm:$0xff] %v6986_v39   ;;  %v6982_v59 = vld [vmem:[%s8163_s2 + $0x380] sm:$0xff] }
  0x19   :  { %3713 = vmatpush.bf16.msra.mxu2 %v5160_v45  ;;  %v5288_v50 = vor.u32 %v5539_v48, %v5287_v46  ;;  %v4887_v51 = vld [vmem:[#allocation2 + $0xa0] sm:$0xf]  ;;  %6150 = vst [vmem:[#allocation2 + $0x3b0] sm:$0xff] %v6988_v42   ;;  %v6884_v3 = vld [vmem:[%s8163_s2 + $0x70] sm:$0xff] }
  0x1a   :  { %v5439_v53 = vld [vmem:[#allocation2 + $0xac] sm:$0xf0]  ;;  %5640 = vst [vmem:[#allocation2 + $0x80] sm:$0xff] %v6886_v44   ;;  %v6882_v0 = vld [vmem:[%s8163_s2 + $0x60] sm:$0xff] }
  0x1b   :  { %3742 = vmatpush.bf16.msra.mxu3 %v5288_v50  ;;  %v4888_v55 = vor.u32 %v5439_v53, %v4887_v51  ;;  %v5015_v56 = vld [vmem:[#allocation2 + $0x1a0] sm:$0xf]  ;;  %5650 = vst [vmem:[#allocation2 + $0x90] sm:$0xff] %v6888_v47   ;;  %v6916_v8 = vld [vmem:[%s8163_s2 + $0x170] sm:$0xff] }
  0x1c   :  { %v5471_v58 = vld [vmem:[#allocation2 + $0x1ac] sm:$0xf0]  ;;  %5800 = vst [vmem:[#allocation2 + $0x180] sm:$0xff] %v6918_v49   ;;  %v6914_v5 = vld [vmem:[%s8163_s2 + $0x160] sm:$0xff]  ;;  %v7026_v49 = vmov 0  }
  0x1d   :  { %3656 = vmatpush.bf16.msra.mxu0 %v4888_v55  ;;  %v5016_v60 = vor.u32 %v5471_v58, %v5015_v56  ;;  %v5143_v61 = vld [vmem:[#allocation2 + $0x2a0] sm:$0xf]  ;;  %5810 = vst [vmem:[#allocation2 + $0x190] sm:$0xff] %v6920_v52   ;;  %v6948_v13 = vld [vmem:[%s8163_s2 + $0x270] sm:$0xff]  ;;  %7017 = vset.pattern.permute.xlu0 %v7026_v49 }
  0x1e   :  { %v5503_v63 = vld [vmem:[#allocation2 + $0x2ac] sm:$0xf0]  ;;  %5960 = vst [vmem:[#allocation2 + $0x280] sm:$0xff] %v6950_v54   ;;  %v6946_v10 = vld [vmem:[%s8163_s2 + $0x260] sm:$0xff]  ;;  %7018 = vset.pattern.permute.xlu1 %v7026_v49  ;;  %7019 = vset.pattern.permute.xlu2 %v7026_v49  ;;  %v5398_v49 = vld [vmem:[%s8161_s0 + $0xc] sm:$0xf] }
  0x1f   :  { %3685 = vmatpush.bf16.msra.mxu1 %v5016_v60  ;;  %v5144_v1 = vor.u32 %v5503_v63, %v5143_v61  ;;  %v5271_v2 = vld [vmem:[#allocation2 + $0x3a0] sm:$0xf]  ;;  %5970 = vst [vmem:[#allocation2 + $0x290] sm:$0xff] %v6952_v57   ;;  %v6980_v18 = vld [vmem:[%s8163_s2 + $0x370] sm:$0xff] }
  0x20   :  { %v5535_v4 = vld [vmem:[#allocation2 + $0x3ac] sm:$0xf0]  ;;  %6120 = vst [vmem:[#allocation2 + $0x380] sm:$0xff] %v6982_v59   ;;  %v6978_v15 = vld [vmem:[%s8163_s2 + $0x360] sm:$0xff] }
  0x21   :  { %3714 = vmatpush.bf16.msra.mxu2 %v5144_v1  ;;  %v5272_v6 = vor.u32 %v5535_v4, %v5271_v2  ;;  %v4871_v7 = vld [vmem:[#allocation2 + $0x80] sm:$0xf]  ;;  %6130 = vst [vmem:[#allocation2 + $0x390] sm:$0xff] %v6984_v62   ;;  %v6880_v23 = vld [vmem:[%s8163_s2 + $0x50] sm:$0xff] }
  0x22   :  { %v5435_v9 = vld [vmem:[#allocation2 + $0x8c] sm:$0xf0]  ;;  %5620 = vst [vmem:[#allocation2 + $0x60] sm:$0xff] %v6882_v0   ;;  %v6878_v20 = vld [vmem:[%s8163_s2 + $0x40] sm:$0xff] }
  0x23   :  { %3743 = vmatpush.bf16.msra.mxu3 %v5272_v6  ;;  %v4872_v11 = vor.u32 %v5435_v9, %v4871_v7  ;;  %v4999_v12 = vld [vmem:[#allocation2 + $0x180] sm:$0xf]  ;;  %5630 = vst [vmem:[#allocation2 + $0x70] sm:$0xff] %v6884_v3   ;;  %v6912_v28 = vld [vmem:[%s8163_s2 + $0x150] sm:$0xff] }
  0x24   :  { %v5467_v14 = vld [vmem:[#allocation2 + $0x18c] sm:$0xf0]  ;;  %5780 = vst [vmem:[#allocation2 + $0x160] sm:$0xff] %v6914_v5   ;;  %v6910_v25 = vld [vmem:[%s8163_s2 + $0x140] sm:$0xff] }
  0x25   :  { %3657 = vmatpush.bf16.msra.mxu0 %v4872_v11  ;;  %v5000_v16 = vor.u32 %v5467_v14, %v4999_v12  ;;  %v5127_v17 = vld [vmem:[#allocation2 + $0x280] sm:$0xf]  ;;  %5790 = vst [vmem:[#allocation2 + $0x170] sm:$0xff] %v6916_v8   ;;  %v6944_v33 = vld [vmem:[%s8163_s2 + $0x250] sm:$0xff] }
  0x26   :  { %v5499_v19 = vld [vmem:[#allocation2 + $0x28c] sm:$0xf0]  ;;  %5940 = vst [vmem:[#allocation2 + $0x260] sm:$0xff] %v6946_v10   ;;  %v6942_v30 = vld [vmem:[%s8163_s2 + $0x240] sm:$0xff] }
  0x27   :  { %3686 = vmatpush.bf16.msra.mxu1 %v5000_v16  ;;  %v5128_v21 = vor.u32 %v5499_v19, %v5127_v17  ;;  %v5255_v22 = vld [vmem:[#allocation2 + $0x380] sm:$0xf]  ;;  %5950 = vst [vmem:[#allocation2 + $0x270] sm:$0xff] %v6948_v13   ;;  %v6976_v38 = vld [vmem:[%s8163_s2 + $0x350] sm:$0xff] }
  0x28   :  { %v5531_v24 = vld [vmem:[#allocation2 + $0x38c] sm:$0xf0]  ;;  %6100 = vst [vmem:[#allocation2 + $0x360] sm:$0xff] %v6978_v15   ;;  %v6974_v35 = vld [vmem:[%s8163_s2 + $0x340] sm:$0xff] }
  0x29   :  { %3715 = vmatpush.bf16.msra.mxu2 %v5128_v21  ;;  %v5256_v26 = vor.u32 %v5531_v24, %v5255_v22  ;;  %v4855_v27 = vld [vmem:[#allocation2 + $0x60] sm:$0xf]  ;;  %6110 = vst [vmem:[#allocation2 + $0x370] sm:$0xff] %v6980_v18   ;;  %v6876_v43 = vld [vmem:[%s8163_s2 + $0x30] sm:$0xff] }
  0x2a   :  { %v5431_v29 = vld [vmem:[#allocation2 + $0x6c] sm:$0xf0]  ;;  %5600 = vst [vmem:[#allocation2 + $0x40] sm:$0xff] %v6878_v20   ;;  %v6874_v40 = vld [vmem:[%s8163_s2 + $0x20] sm:$0xff]  ;;  %v5399_v22 = vld [vmem:[%s8161_s0 + $0x10] sm:$0xf0] }
  0x2b   :  { %3744 = vmatpush.bf16.msra.mxu3 %v5256_v26  ;;  %v4856_v31 = vor.u32 %v5431_v29, %v4855_v27  ;;  %v4983_v32 = vld [vmem:[#allocation2 + $0x160] sm:$0xf]  ;;  %5610 = vst [vmem:[#allocation2 + $0x50] sm:$0xff] %v6880_v23   ;;  %v6908_v48 = vld [vmem:[%s8163_s2 + $0x130] sm:$0xff]  ;;  %v7262_v26 = vld [vmem:[%s8162_s1 + $0x8] sm:$0xff] }
  0x2c   :  { %v5463_v34 = vld [vmem:[#allocation2 + $0x16c] sm:$0xf0]  ;;  %5760 = vst [vmem:[#allocation2 + $0x140] sm:$0xff] %v6910_v25   ;;  %v6906_v45 = vld [vmem:[%s8163_s2 + $0x120] sm:$0xff] }
  0x2d   :  { %3658 = vmatpush.bf16.msra.mxu0 %v4856_v31  ;;  %v4984_v36 = vor.u32 %v5463_v34, %v4983_v32  ;;  %v5111_v37 = vld [vmem:[#allocation2 + $0x260] sm:$0xf]  ;;  %5770 = vst [vmem:[#allocation2 + $0x150] sm:$0xff] %v6912_v28   ;;  %v6940_v55 = vld [vmem:[%s8163_s2 + $0x230] sm:$0xff]  ;;  %v5445_v25 = vld [vmem:[#allocation2 + $0xe4] sm:$0xf] }
  0x2e   :  { %v5495_v39 = vld [vmem:[#allocation2 + $0x26c] sm:$0xf0]  ;;  %5920 = vst [vmem:[#allocation2 + $0x240] sm:$0xff] %v6942_v30   ;;  %v7208_v50 = vld [vmem:[%s8162_s1] sm:$0xff]  ;;  %v4729_v30 = vld [vmem:[%s8161_s0 + $0x14] sm:$0xf0] }
  0x2f   :  { %3687 = vmatpush.bf16.msra.mxu1 %v4984_v36  ;;  %v5112_v41 = vor.u32 %v5495_v39, %v5111_v37  ;;  %v5239_v42 = vld [vmem:[#allocation2 + $0x360] sm:$0xf]  ;;  %5930 = vst [vmem:[#allocation2 + $0x250] sm:$0xff] %v6944_v33   ;;  %2783 = vperm.xlu0 %7017, %v7208_v50   ;;  %v6972_v60 = vld [vmem:[%s8163_s2 + $0x330] sm:$0xff]  ;;  %v5397_v29 = vld [vmem:[%s8161_s0 + $0x4] sm:$0xf] }
  0x30   :  { %v5527_v44 = vld [vmem:[#allocation2 + $0x36c] sm:$0xf0]  ;;  %6080 = vst [vmem:[#allocation2 + $0x340] sm:$0xff] %v6974_v35   ;;  %v6938_v52 = vld [vmem:[%s8163_s2 + $0x220] sm:$0xff]  ;;  %v4921_v31 = vld [vmem:[#allocation2 + $0xf0] sm:$0xf0] }
  0x31   :  { %3716 = vmatpush.bf16.msra.mxu2 %v5112_v41  ;;  %v5240_v46 = vor.u32 %v5527_v44, %v5239_v42  ;;  %v4839_v47 = vld [vmem:[#allocation2 + $0x40] sm:$0xf]  ;;  %6090 = vst [vmem:[#allocation2 + $0x350] sm:$0xff] %v6976_v38   ;;  %v6872_v1 = vld [vmem:[%s8163_s2 + $0x10] sm:$0xff]  ;;  %v5477_v34 = vld [vmem:[#allocation2 + $0x1e4] sm:$0xf] }
  0x32   :  { %v5427_v51 = vld [vmem:[#allocation2 + $0x4c] sm:$0xf0]  ;;  %5580 = vst [vmem:[#allocation2 + $0x20] sm:$0xff] %v6874_v40   ;;  %v6970_v57 = vld [vmem:[%s8163_s2 + $0x320] sm:$0xff]  ;;  %v4735_v38 = vld [vmem:[%s8161_s0 + $0x8] sm:$0xf] }
  0x33   :  { %3745 = vmatpush.bf16.msra.mxu3 %v5240_v46  ;;  %v4840_v53 = vor.u32 %v5427_v51, %v4839_v47  ;;  %v4967_v54 = vld [vmem:[#allocation2 + $0x140] sm:$0xf]  ;;  %5590 = vst [vmem:[#allocation2 + $0x30] sm:$0xff] %v6876_v43   ;;  %v6904_v6 = vld [vmem:[%s8163_s2 + $0x110] sm:$0xff]  ;;  %v5400_v39 = vld [vmem:[%s8161_s0 + $0x18] sm:$0xf0]  ;;  %v4924_v46 = vor.u32 %v5445_v25, %v4921_v31 }
  0x34   :  { %v5459_v56 = vld [vmem:[#allocation2 + $0x14c] sm:$0xf0]  ;;  %5740 = vst [vmem:[#allocation2 + $0x120] sm:$0xff] %v6906_v45   ;;  %v14_v0 = vld [vmem:[%s8163_s2] sm:$0xff]   ;;  %v5049_v40 = vld [vmem:[#allocation2 + $0x1f0] sm:$0xf0] }
  0x35   :  { %3659 = vmatpush.bf16.msra.mxu0 %v4840_v53  ;;  %v4968_v58 = vor.u32 %v5459_v56, %v4967_v54  ;;  %v5095_v59 = vld [vmem:[#allocation2 + $0x240] sm:$0xf]  ;;  %5750 = vst [vmem:[#allocation2 + $0x130] sm:$0xff] %v6908_v48   ;;  %v6936_v11 = vld [vmem:[%s8163_s2 + $0x210] sm:$0xff]  ;;  %v5509_v44 = vld [vmem:[#allocation2 + $0x2e4] sm:$0xf]  ;;  %v5052_v56 = vor.u32 %v5477_v34, %v5049_v40 }
  0x36   :  { %v5491_v61 = vld [vmem:[#allocation2 + $0x24c] sm:$0xf0]  ;;  %5900 = vst [vmem:[#allocation2 + $0x220] sm:$0xff] %v6938_v52   ;;  %v6902_v3 = vld [vmem:[%s8163_s2 + $0x100] sm:$0xff]  ;;  %v5177_v45 = vld [vmem:[#allocation2 + $0x2f0] sm:$0xf0] }
  0x37   :  { %3688 = vmatpush.bf16.msra.mxu1 %v4968_v58  ;;  %v5096_v62 = vor.u32 %v5491_v61, %v5095_v59  ;;  %v5223_v63 = vld [vmem:[#allocation2 + $0x340] sm:$0xf]  ;;  %5910 = vst [vmem:[#allocation2 + $0x230] sm:$0xff] %v6940_v55   ;;  %v6968_v16 = vld [vmem:[%s8163_s2 + $0x310] sm:$0xff]  ;;  %2788 = vperm.xlu0 %7017, %v7262_v26   ;;  %v5473_v52 = vld [vmem:[#allocation2 + $0x1c4] sm:$0xf]  ;;  %v7297_v55 = vor.u32 %v5397_v29, %v4729_v30 }
  0x38   :  { %v5523_v2 = vld [vmem:[#allocation2 + $0x34c] sm:$0xf0]  ;;  %6060 = vst [vmem:[#allocation2 + $0x320] sm:$0xff] %v6970_v57   ;;  %v6934_v8 = vld [vmem:[%s8163_s2 + $0x200] sm:$0xff]  ;;  %v4905_v57 = vld [vmem:[#allocation2 + $0xd0] sm:$0xf0] }
  0x39   :  { %3717 = vmatpush.bf16.msra.mxu2 %v5096_v62  ;;  %v5224_v4 = vor.u32 %v5523_v2, %v5223_v63  ;;  %v4823_v5 = vld [vmem:[#allocation2 + $0x20] sm:$0xf]  ;;  %6070 = vst [vmem:[#allocation2 + $0x330] sm:$0xff] %v6972_v60   ;;  %v7012_v23 = vld [vmem:[%s8163_s2 + $0x470] sm:$0xff]  ;;  %v5441_v53 = vld [vmem:[#allocation2 + $0xc4] sm:$0xf]  ;;  %v7300_v62 = vor.u32 %v5400_v39, %v4735_v38  ;;  %v5180_v63 = vor.u32 %v5509_v44, %v5177_v45 }
  0x3a   :  { %v5423_v7 = vld [vmem:[#allocation2 + $0x2c] sm:$0xf0]  ;;  %20 = vst [vmem:[#allocation2] sm:$0xff] %v14_v0   ;;  %v6966_v13 = vld [vmem:[%s8163_s2 + $0x300] sm:$0xff]  ;;  %v5033_v60 = vld [vmem:[#allocation2 + $0x1d0] sm:$0xf0] }
  0x3b   :  { %3746 = vmatpush.bf16.msra.mxu3 %v5224_v4  ;;  %v4824_v9 = vor.u32 %v5423_v7, %v4823_v5  ;;  %v4951_v10 = vld [vmem:[#allocation2 + $0x120] sm:$0xf]  ;;  %5570 = vst [vmem:[#allocation2 + $0x10] sm:$0xff] %v6872_v1   ;;  %v7274_v32 = vld [vmem:[%s8162_s1 + $0x10] sm:$0xff]  ;;  %v5505_v2 = vld [vmem:[#allocation2 + $0x2c4] sm:$0xf]  ;;  %v4908_v4 = vor.u32 %v5441_v53, %v4905_v57  ;;  %v5036_v7 = vor.u32 %v5473_v52, %v5033_v60 }
  0x3c   :  { %v5455_v12 = vld [vmem:[#allocation2 + $0x12c] sm:$0xf0]  ;;  %5720 = vst [vmem:[#allocation2 + $0x100] sm:$0xff] %v6902_v3   ;;  %v7010_v18 = vld [vmem:[%s8163_s2 + $0x460] sm:$0xff]  ;;  %2793 = vperm.xlu1 %7018, %v7274_v32   ;;  %v5161_v3 = vld [vmem:[#allocation2 + $0x2d0] sm:$0xf0] }
  0x3d   :  { %3660 = vmatpush.bf16.msra.mxu0 %v4824_v9  ;;  %v4952_v14 = vor.u32 %v5455_v12, %v4951_v10  ;;  %v5079_v15 = vld [vmem:[#allocation2 + $0x220] sm:$0xf]  ;;  %5730 = vst [vmem:[#allocation2 + $0x110] sm:$0xff] %v6904_v6   ;;  %v7008_v41 = vld [vmem:[%s8163_s2 + $0x450] sm:$0xff]  ;;  %v5402_v31 = vld [vmem:[%s8161_s0 + $0x2c] sm:$0xf] }
  0x3e   :  { %v5487_v17 = vld [vmem:[#allocation2 + $0x22c] sm:$0xf0]  ;;  %5880 = vst [vmem:[#allocation2 + $0x200] sm:$0xff] %v6934_v8   ;;  %v4727_v21 = vld [vmem:[%s8161_s0] sm:$0xf] }
  0x3f   :  { %3689 = vmatpush.bf16.msra.mxu1 %v4952_v14  ;;  %v5080_v19 = vor.u32 %v5487_v17, %v5079_v15  ;;  %v5207_v20 = vld [vmem:[#allocation2 + $0x320] sm:$0xf]  ;;  %5890 = vst [vmem:[#allocation2 + $0x210] sm:$0xff] %v6936_v11   ;;  %v7289_v43 = vor.u32 %v5399_v22, %v4727_v21  ;;  %v5437_v8 = vld [vmem:[#allocation2 + $0xa4] sm:$0xf]  ;;  %v7004_v30 = vld [vmem:[%s8163_s2 + $0x430] sm:$0xff] }
  0x40   :  { %v5519_v24 = vld [vmem:[#allocation2 + $0x32c] sm:$0xf0]  ;;  %6040 = vst [vmem:[#allocation2 + $0x300] sm:$0xff] %v6966_v13   ;;  %v7006_v35 = vld [vmem:[%s8163_s2 + $0x440] sm:$0xff]  ;;  %v4889_v9 = vld [vmem:[#allocation2 + $0xb0] sm:$0xf0]  ;;  %v5164_v13 = vor.u32 %v5505_v2, %v5161_v3 }
  0x41   :  { %3718 = vmatpush.bf16.msra.mxu2 %v5080_v19  ;;  %v5208_v27 = vor.u32 %v5519_v24, %v5207_v20  ;;  %v4807_v28 = vld [vmem:[#allocation2] sm:$0xf]  ;;  %6050 = vst [vmem:[#allocation2 + $0x310] sm:$0xff] %v6968_v16   ;;  %v5469_v11 = vld [vmem:[#allocation2 + $0x1a4] sm:$0xf]  ;;  %v4892_v17 = vor.u32 %v5437_v8, %v4889_v9 }
  0x42   :  { %v5419_v33 = vld [vmem:[#allocation2 + $0xc] sm:$0xf0]  ;;  %6260 = vst [vmem:[#allocation2 + $0x460] sm:$0xff] %v7010_v18   ;;  %v4737_v51 = vld [vmem:[%s8161_s0 + $0x1c] sm:$0xf0] }
  0x43   :  { %3747 = vmatpush.bf16.msra.mxu3 %v5208_v27  ;;  %v4808_v36 = vor.u32 %v5419_v33, %v4807_v28  ;;  %v4935_v37 = vld [vmem:[#allocation2 + $0x100] sm:$0xf]  ;;  %6270 = vst [vmem:[#allocation2 + $0x470] sm:$0xff] %v7012_v23   ;;  %v7303_v5 = vor.u32 %v5398_v49, %v4737_v51  ;;  %v5017_v12 = vld [vmem:[#allocation2 + $0x1b0] sm:$0xf0] }
  0x44   :  { %v5451_v42 = vld [vmem:[#allocation2 + $0x10c] sm:$0xf0]  ;;  %6240 = vst [vmem:[#allocation2 + $0x440] sm:$0xff] %v7006_v35   ;;  %v5501_v15 = vld [vmem:[#allocation2 + $0x2a4] sm:$0xf]  ;;  %v5020_v18 = vor.u32 %v5469_v11, %v5017_v12 }
  0x45   :  { %3661 = vmatpush.bf16.msra.mxu0 %v4808_v36  ;;  %v4936_v47 = vor.u32 %v5451_v42, %v4935_v37  ;;  %v5063_v48 = vld [vmem:[#allocation2 + $0x200] sm:$0xf]  ;;  %6250 = vst [vmem:[#allocation2 + $0x450] sm:$0xff] %v7008_v41   ;;  %v5145_v16 = vld [vmem:[#allocation2 + $0x2b0] sm:$0xf0]  ;;  %v7328_v37 = vld [vmem:[%s8162_s1 + $0x18] sm:$0xff] }
  0x46   :  { %v5483_v54 = vld [vmem:[#allocation2 + $0x20c] sm:$0xf0]  ;;  %v5433_v20 = vld [vmem:[#allocation2 + $0x84] sm:$0xf]  ;;  %v4873_v21 = vld [vmem:[#allocation2 + $0x90] sm:$0xf0]  ;;  %v5148_v28 = vor.u32 %v5501_v15, %v5145_v16  ;;  %2798 = vperm.xlu1 %7018, %v7328_v37  }
  0x47   :  { %3690 = vmatpush.bf16.msra.mxu1 %v4936_v47  ;;  %v5064_v58 = vor.u32 %v5483_v54, %v5063_v48  ;;  %v5191_v59 = vld [vmem:[#allocation2 + $0x300] sm:$0xf]  ;;  %v4747_v22 = vld [vmem:[%s8161_s0 + $0x28] sm:$0xf]  ;;  %v5465_v24 = vld [vmem:[#allocation2 + $0x184] sm:$0xf]  ;;  %v4876_v36 = vor.u32 %v5433_v20, %v4873_v21 }
  0x48   :  { %v5515_v61 = vld [vmem:[#allocation2 + $0x30c] sm:$0xf0]  ;;  %3662 = vmatmul.bf16.vlgmr.msra.gmra.mxu0 %v7289_v43  ;;  %v5001_v25 = vld [vmem:[#allocation2 + $0x190] sm:$0xf0]  ;;  %v5404_v27 = vld [vmem:[%s8161_s0 + $0x38] sm:$0xf0] }
  0x49   :  { %3719 = vmatpush.bf16.msra.mxu2 %v5064_v58  ;;  %v5192_v0 = vor.u32 %v5515_v61, %v5191_v59  ;;  %v5367_v1 = vld [vmem:[#allocation2 + $0x460] sm:$0xf]  ;;  %v5497_v34 = vld [vmem:[#allocation2 + $0x284] sm:$0xf]  ;;  %v5129_v35 = vld [vmem:[#allocation2 + $0x290] sm:$0xf0]  ;;  %v5004_v38 = vor.u32 %v5465_v24, %v5001_v25  ;;  %v7331_v44 = vor.u32 %v5404_v27, %v4747_v22 }
  0x4a   :  { %3691 = vmatmul.bf16.vlgmr.msra.gmra.mxu1 %v7297_v55  ;;  %v5559_v6 = vld [vmem:[#allocation2 + $0x46c] sm:$0xf0]  ;;  %v7002_v29 = vld [vmem:[%s8163_s2 + $0x420] sm:$0xff]  ;;  %v4857_v40 = vld [vmem:[#allocation2 + $0x70] sm:$0xf0]  ;;  %6230 = vst [vmem:[#allocation2 + $0x430] sm:$0xff] %v7004_v30  }
  0x4b   :  { %3799 = vmatpush.bf16.msrb.mxu1 %v4924_v46  ;;  %3748 = vmatpush.bf16.msra.mxu3 %v5192_v0  ;;  %v5368_v10 = vor.u32 %v5559_v6, %v5367_v1  ;;  %v5351_v14 = vld [vmem:[#allocation2 + $0x440] sm:$0xf]  ;;  %6220 = vst [vmem:[#allocation2 + $0x420] sm:$0xff] %v7002_v29   ;;  %v5429_v39 = vld [vmem:[#allocation2 + $0x64] sm:$0xf]  ;;  %v5132_v46 = vor.u32 %v5497_v34, %v5129_v35  ;;  %v7000_v16 = vld [vmem:[%s8163_s2 + $0x410] sm:$0xff] }
  0x4c   :  { %3720 = vmatmul.bf16.vlgmr.msra.gmra.mxu2 %v7300_v62  ;;  %v5555_v19 = vld [vmem:[#allocation2 + $0x44c] sm:$0xf0]  ;;  %v4749_v33 = vld [vmem:[%s8161_s0 + $0x3c] sm:$0xf0]  ;;  %v5461_v41 = vld [vmem:[#allocation2 + $0x164] sm:$0xf]  ;;  %v4860_v51 = vor.u32 %v5429_v39, %v4857_v40 }
  0x4d   :  { %3828 = vmatpush.bf16.msrb.mxu2 %v5052_v56  ;;  %3774 = vmatpush.bf16.msrb.mxu0 %v5368_v10  ;;  %v5352_v23 = vor.u32 %v5555_v19, %v5351_v14  ;;  %v4985_v42 = vld [vmem:[#allocation2 + $0x170] sm:$0xf0]  ;;  %v4755_v45 = vld [vmem:[%s8161_s0 + $0x30] sm:$0xf]  ;;  %v5405_v47 = vld [vmem:[%s8161_s0 + $0x40] sm:$0xf0]  ;;  %v7339_v52 = vor.u32 %v5402_v31, %v4749_v33 }
  0x4e   :  { %3749 = vmatmul.bf16.vlgmr.msra.gmra.mxu3 %v7303_v5  ;;  %v5493_v48 = vld [vmem:[#allocation2 + $0x264] sm:$0xf]  ;;  %v5113_v49 = vld [vmem:[#allocation2 + $0x270] sm:$0xf0]  ;;  %v4988_v54 = vor.u32 %v5461_v41, %v4985_v42  ;;  %v4757_v58 = vld [vmem:[%s8161_s0 + $0x44] sm:$0xf0]  ;;  %v7348_v61 = vor.u32 %v5405_v47, %v4755_v45 }
  0x4f   :  { %3857 = vmatpush.bf16.msrb.mxu3 %v5180_v63  ;;  %3800 = vmatpush.bf16.msrb.mxu1 %v4908_v4  ;;  %v5403_v53 = vld [vmem:[%s8161_s0 + $0x34] sm:$0xf]  ;;  %v5425_v56 = vld [vmem:[#allocation2 + $0x44] sm:$0xf]  ;;  %v5116_v63 = vor.u32 %v5493_v48, %v5113_v49  ;;  %6210 = vst [vmem:[#allocation2 + $0x410] sm:$0xff] %v7000_v16  }
  0x50   :  { %v4841_v57 = vld [vmem:[#allocation2 + $0x50] sm:$0xf0]  ;;  %v5457_v59 = vld [vmem:[#allocation2 + $0x144] sm:$0xf]  ;;  %v7351_v4 = vor.u32 %v5403_v53, %v4757_v58  ;;  %v4769_v34 = vld [vmem:[%s8161_s0 + $0x64] sm:$0xf0] }
  0x51   :  { %3829 = vmatpush.bf16.msrb.mxu2 %v5036_v7  ;;  %3775 = vmatpush.bf16.msrb.mxu0 %v5352_v23  ;;  %v4969_v60 = vld [vmem:[#allocation2 + $0x150] sm:$0xf0]  ;;  %v5489_v1 = vld [vmem:[#allocation2 + $0x244] sm:$0xf]  ;;  %v4844_v3 = vor.u32 %v5425_v56, %v4841_v57  ;;  %v5551_v6 = vld [vmem:[#allocation2 + $0x42c] sm:$0xf0] }
  0x52   :  { %v5335_v0 = vld [vmem:[#allocation2 + $0x420] sm:$0xf]  ;;  %v5097_v2 = vld [vmem:[#allocation2 + $0x250] sm:$0xf0]  ;;  %v4972_v7 = vor.u32 %v5457_v59, %v4969_v60  ;;  %v5453_v10 = vld [vmem:[#allocation2 + $0x124] sm:$0xf] }
  0x53   :  { %3858 = vmatpush.bf16.msrb.mxu3 %v5164_v13  ;;  %3801 = vmatpush.bf16.msrb.mxu1 %v4892_v17  ;;  %v5336_v8 = vor.u32 %v5551_v6, %v5335_v0  ;;  %v5100_v9 = vor.u32 %v5489_v1, %v5097_v2  ;;  %v4953_v11 = vld [vmem:[#allocation2 + $0x130] sm:$0xf0]  ;;  %v6998_v12 = vld [vmem:[%s8163_s2 + $0x400] sm:$0xff]  ;;  %v4767_v13 = vld [vmem:[%s8161_s0 + $0x50] sm:$0xf]  ;;  %v7027_v2 = vmov 1  }
  0x54   :  { %v5409_v14 = vld [vmem:[%s8161_s0 + $0x60] sm:$0xf0]  ;;  %v4956_v15 = vor.u32 %v5453_v10, %v4953_v11  ;;  %6200 = vst [vmem:[#allocation2 + $0x400] sm:$0xff] %v6998_v12   ;;  %v4825_v21 = vld [vmem:[#allocation2 + $0x30] sm:$0xf0]  ;;  %v6899_v56 = vld [vmem:[%s8163_s2 + $0xe8] sm:$0xff] }
  0x55   :  { %3830 = vmatpush.bf16.msrb.mxu2 %v5020_v18  ;;  %3776 = vmatpush.bf16.msrb.mxu0 %v5336_v8  ;;  %v5485_v17 = vld [vmem:[#allocation2 + $0x224] sm:$0xf]  ;;  %v5081_v18 = vld [vmem:[#allocation2 + $0x230] sm:$0xf0]  ;;  %v4775_v41 = vld [vmem:[%s8161_s0 + $0x58] sm:$0xf] }
  0x56   :  { %v5084_v19 = vor.u32 %v5485_v17, %v5081_v18  ;;  %v5421_v20 = vld [vmem:[#allocation2 + $0x24] sm:$0xf]  ;;  %v7370_v22 = vld [vmem:[%s8162_s1 + $0x30] sm:$0xff]  ;;  %v5410_v42 = vld [vmem:[%s8161_s0 + $0x68] sm:$0xf0]  ;;  %5705 = vst [vmem:[#allocation2 + $0xe8] sm:$0xff] %v6899_v56  }
  0x57   :  { %3859 = vmatpush.bf16.msrb.mxu3 %v5148_v28  ;;  %3802 = vmatpush.bf16.msrb.mxu1 %v4876_v36  ;;  %v5407_v23 = vld [vmem:[%s8161_s0 + $0x54] sm:$0xf]  ;;  %v4828_v24 = vor.u32 %v5421_v20, %v4825_v21  ;;  %v5449_v25 = vld [vmem:[#allocation2 + $0x104] sm:$0xf]  ;;  %v7388_v36 = vld [vmem:[%s8162_s1 + $0x38] sm:$0xff]  ;;  %v7408_v49 = vor.u32 %v5410_v42, %v4775_v41 }
  0x58   :  { %3667 = vmatmul.bf16.gmra.mxu0 %v7331_v44  ;;  %v4937_v27 = vld [vmem:[#allocation2 + $0x110] sm:$0xf0]  ;;  %2813 = vperm.xlu0 %7017, %v7370_v22   ;;  %v7379_v28 = vld [vmem:[%s8162_s1 + $0x20] sm:$0xff]  ;;  %v7399_v45 = vor.u32 %v5407_v23, %v4769_v34  ;;  %v4777_v47 = vld [vmem:[%s8161_s0 + $0x6c] sm:$0xf0] }
  0x59   :  { %3831 = vmatpush.bf16.msrb.mxu2 %v5004_v38  ;;  %v4940_v29 = vor.u32 %v5449_v25, %v4937_v27  ;;  %v5481_v30 = vld [vmem:[#allocation2 + $0x204] sm:$0xf]  ;;  %v5065_v31 = vld [vmem:[#allocation2 + $0x210] sm:$0xf0]  ;;  %2803 = vperm.xlu2 %7019, %v7379_v28   ;;  %v7390_v38 = vor.u32 %v5409_v14, %v4767_v13  ;;  %v6901_v57 = vld [vmem:[%s8163_s2 + $0xf8] sm:$0xff] }
  0x5a   :  { %3696 = vmatmul.bf16.gmra.mxu1 %v7339_v52  ;;  %v5417_v33 = vld [vmem:[#allocation2 + $0x4] sm:$0xf]  ;;  %v4809_v35 = vld [vmem:[#allocation2 + $0x10] sm:$0xf0]  ;;  %v5068_v39 = vor.u32 %v5481_v30, %v5065_v31  ;;  %2818 = vperm.xlu1 %7018, %v7388_v36   ;;  %v4787_v59 = vld [vmem:[%s8161_s0 + $0x78] sm:$0xf] }
  0x5b   :  { %3860 = vmatpush.bf16.msrb.mxu3 %v5132_v46  ;;  %3803 = vmatpush.bf16.msrb.mxu1 %v4860_v51  ;;  %v4812_v40 = vor.u32 %v5417_v33, %v4809_v35  ;;  %v5408_v46 = vld [vmem:[%s8161_s0 + $0x5c] sm:$0xf]  ;;  %v5319_v48 = vld [vmem:[#allocation2 + $0x400] sm:$0xf]  ;;  %v5547_v51 = vld [vmem:[#allocation2 + $0x40c] sm:$0xf0] }
  0x5c   :  { %3725 = vmatmul.bf16.gmra.mxu2 %v7348_v61  ;;  %v5320_v53 = vor.u32 %v5547_v51, %v5319_v48  ;;  %v5541_v58 = vld [vmem:[#allocation2 + $0x3e4] sm:$0xf]  ;;  %v5414_v60 = vld [vmem:[%s8161_s0 + $0x88] sm:$0xf0]  ;;  %v6933_v1 = vld [vmem:[%s8163_s2 + $0x1f8] sm:$0xff]  ;;  %5715 = vst [vmem:[#allocation2 + $0xf8] sm:$0xff] %v6901_v57  }
  0x5d   :  { %3832 = vmatpush.bf16.msrb.mxu2 %v4988_v54  ;;  %v7411_v54 = vor.u32 %v5408_v46, %v4777_v47  ;;  %v6931_v0 = vld [vmem:[%s8163_s2 + $0x1e8] sm:$0xff]  ;;  %v5557_v6 = vld [vmem:[#allocation2 + $0x464] sm:$0xf]  ;;  %v6897_v11 = vld [vmem:[%s8163_s2 + $0xd8] sm:$0xff]  ;;  %5875 = vst [vmem:[#allocation2 + $0x1f8] sm:$0xff] %v6933_v1  }
  0x5e   :  { %3754 = vmatmul.bf16.gmra.mxu3 %v7351_v4  ;;  %3777 = vmatpush.bf16.msrb.mxu0 %v5320_v53  ;;  %v7436_v8 = vld [vmem:[%s8162_s1 + $0x28] sm:$0xff]  ;;  %v5537_v12 = vld [vmem:[#allocation2 + $0x3c4] sm:$0xf]  ;;  %5865 = vst [vmem:[#allocation2 + $0x1e8] sm:$0xff] %v6931_v0   ;;  %v5289_v13 = vld [vmem:[#allocation2 + $0x3d0] sm:$0xf0] }
  0x5f   :  { %3861 = vmatpush.bf16.msrb.mxu3 %v5116_v63  ;;  %3804 = vmatpush.bf16.msrb.mxu1 %v4844_v3  ;;  %v5305_v63 = vld [vmem:[#allocation2 + $0x3f0] sm:$0xf0]  ;;  %v6895_v10 = vld [vmem:[%s8163_s2 + $0xc8] sm:$0xff]  ;;  %v4789_v16 = vld [vmem:[%s8161_s0 + $0x8c] sm:$0xf0]  ;;  %v5292_v17 = vor.u32 %v5537_v12, %v5289_v13  ;;  %5695 = vst [vmem:[#allocation2 + $0xd8] sm:$0xff] %v6897_v11  }
  0x60   :  { %7021 = vset.pattern.permute.xlu0 %v7027_v2  ;;  %v5308_v3 = vor.u32 %v5541_v58, %v5305_v63  ;;  %v6927_v14 = vld [vmem:[%s8163_s2 + $0x1c8] sm:$0xff]  ;;  %v6929_v18 = vld [vmem:[%s8163_s2 + $0x1d8] sm:$0xff]  ;;  %5685 = vst [vmem:[#allocation2 + $0xc8] sm:$0xff] %v6895_v10   ;;  %v4795_v20 = vld [vmem:[%s8161_s0 + $0x80] sm:$0xf] }
  0x61   :  { %3833 = vmatpush.bf16.msrb.mxu2 %v4972_v7  ;;  %v5369_v7 = vld [vmem:[#allocation2 + $0x470] sm:$0xf0]  ;;  %4271 = vperm.xlu0 %7021, %v7262_v26   ;;  %5845 = vst [vmem:[#allocation2 + $0x1c8] sm:$0xff] %v6927_v14   ;;  %v4797_v25 = vld [vmem:[%s8161_s0 + $0x94] sm:$0xf0]  ;;  %v6891_v48 = vld [vmem:[%s8163_s2 + $0xa8] sm:$0xff] }
  0x62   :  { %7022 = vset.pattern.permute.xlu1 %v7027_v2  ;;  %2808 = vperm.xlu2 %7019, %v7436_v8   ;;  %v5415_v21 = vld [vmem:[%s8161_s0 + $0x90] sm:$0xf0]  ;;  %v4927_v27 = vld [vmem:[#allocation2 + $0xe8] sm:$0xf]  ;;  %5855 = vst [vmem:[#allocation2 + $0x1d8] sm:$0xff] %v6929_v18   ;;  %v6893_v51 = vld [vmem:[%s8163_s2 + $0xb8] sm:$0xff] }
  0x63   :  { %3862 = vmatpush.bf16.msrb.mxu3 %v5100_v9  ;;  %3805 = vmatpush.bf16.msrb.mxu1 %v4828_v24  ;;  %v5372_v9 = vor.u32 %v5557_v6, %v5369_v7  ;;  %v5413_v24 = vld [vmem:[%s8161_s0 + $0x84] sm:$0xf]  ;;  %v5448_v30 = vld [vmem:[#allocation2 + $0xf4] sm:$0xf0]  ;;  %v4743_v53 = vld [vmem:[%s8161_s0 + $0x10] sm:$0xf] }
  0x64   :  { %4275 = vperm.xlu1 %7022, %v7274_v32   ;;  %3886 = vmatpush.bf16.msra.mxu0 %v5308_v3  ;;  %v4928_v31 = vor.u32 %v5448_v30, %v4927_v27  ;;  %v7481_v34 = vor.u32 %v5413_v24, %v4797_v25  ;;  %v5480_v35 = vld [vmem:[#allocation2 + $0x1f4] sm:$0xf0]  ;;  %v5401_v56 = vld [vmem:[%s8161_s0 + $0x20] sm:$0xf0]  ;;  %5665 = vst [vmem:[#allocation2 + $0xa8] sm:$0xff] %v6891_v48   ;;  %v7028_v6 = vmov 2  }
  0x65   :  { %3834 = vmatpush.bf16.msrb.mxu2 %v4956_v15  ;;  %v5412_v15 = vld [vmem:[%s8161_s0 + $0x7c] sm:$0xf]  ;;  %v5055_v33 = vld [vmem:[#allocation2 + $0x1e8] sm:$0xf]  ;;  %v5533_v58 = vld [vmem:[#allocation2 + $0x3a4] sm:$0xf] }
  0x66   :  { %v7467_v23 = vor.u32 %v5412_v15, %v4789_v16  ;;  %v5444_v41 = vld [vmem:[#allocation2 + $0xd4] sm:$0xf0]  ;;  %v5553_v1 = vld [vmem:[#allocation2 + $0x444] sm:$0xf]  ;;  %5675 = vst [vmem:[#allocation2 + $0xb8] sm:$0xff] %v6893_v51   ;;  %v6887_v7 = vld [vmem:[%s8163_s2 + $0x88] sm:$0xff]  ;;  %v7520_v15 = vor.u32 %v5401_v56, %v4743_v53 }
  0x67   :  { %3863 = vmatpush.bf16.msrb.mxu3 %v5084_v19  ;;  %3806 = vmatpush.bf16.msrb.mxu1 %v4812_v40  ;;  %v7459_v19 = vor.u32 %v5414_v60, %v4787_v59  ;;  %v4911_v40 = vld [vmem:[#allocation2 + $0xc8] sm:$0xf]  ;;  %v5273_v59 = vld [vmem:[#allocation2 + $0x3b0] sm:$0xf0]  ;;  %v6925_v0 = vld [vmem:[%s8163_s2 + $0x1b8] sm:$0xff]  ;;  %5645 = vst [vmem:[#allocation2 + $0x88] sm:$0xff] %v6887_v7  }
  0x68   :  { %3672 = vmatmul.bf16.gmra.mxu0 %v7390_v38  ;;  %v4912_v42 = vor.u32 %v5444_v41, %v4911_v40  ;;  %v5039_v46 = vld [vmem:[#allocation2 + $0x1c8] sm:$0xf]  ;;  %v5276_v63 = vor.u32 %v5533_v58, %v5273_v59  ;;  %v5529_v10 = vld [vmem:[#allocation2 + $0x384] sm:$0xf]  ;;  %v5257_v11 = vld [vmem:[#allocation2 + $0x390] sm:$0xf0] }
  0x69   :  { %3835 = vmatpush.bf16.msrb.mxu2 %v4940_v29  ;;  %3887 = vmatpush.bf16.msra.mxu0 %v5292_v17  ;;  %v7476_v29 = vor.u32 %v5415_v21, %v4795_v20  ;;  %v5476_v47 = vld [vmem:[#allocation2 + $0x1d4] sm:$0xf0]  ;;  %v6923_v60 = vld [vmem:[%s8163_s2 + $0x1a8] sm:$0xff]  ;;  %5835 = vst [vmem:[#allocation2 + $0x1b8] sm:$0xff] %v6925_v0   ;;  %v5260_v13 = vor.u32 %v5529_v10, %v5257_v11  ;;  %v5525_v40 = vld [vmem:[#allocation2 + $0x364] sm:$0xf] }
  0x6a   :  { %3701 = vmatmul.bf16.gmra.mxu1 %v7399_v45  ;;  %7020 = vset.pattern.permute.xlu2 %v7027_v2  ;;  %v5040_v57 = vor.u32 %v5476_v47, %v5039_v46  ;;  %v5353_v2 = vld [vmem:[#allocation2 + $0x450] sm:$0xf0]  ;;  %5825 = vst [vmem:[#allocation2 + $0x1a8] sm:$0xff] %v6923_v60   ;;  %v6919_v12 = vld [vmem:[%s8163_s2 + $0x188] sm:$0xff]  ;;  %v6921_v14 = vld [vmem:[%s8163_s2 + $0x198] sm:$0xff] }
  0x6b   :  { %3864 = vmatpush.bf16.msrb.mxu3 %v5068_v39  ;;  %3919 = vmatpush.bf16.msra.mxu1 %v5372_v9  ;;  %v5056_v39 = vor.u32 %v5480_v35, %v5055_v33  ;;  %v5356_v3 = vor.u32 %v5553_v1, %v5353_v2  ;;  %v6889_v9 = vld [vmem:[%s8163_s2 + $0x98] sm:$0xff]  ;;  %5805 = vst [vmem:[#allocation2 + $0x188] sm:$0xff] %v6919_v12   ;;  %v4895_v16 = vld [vmem:[#allocation2 + $0xa8] sm:$0xf]  ;;  %v5406_v35 = vld [vmem:[%s8161_s0 + $0x48] sm:$0xf0] }
  0x6c   :  { %3730 = vmatmul.bf16.gmra.mxu2 %v7408_v49  ;;  %4283 = vperm.xlu1 %7022, %v7379_v28   ;;  %5655 = vst [vmem:[#allocation2 + $0x98] sm:$0xff] %v6889_v9   ;;  %v6885_v33 = vld [vmem:[%s8163_s2 + $0x78] sm:$0xff]  ;;  %v5241_v41 = vld [vmem:[#allocation2 + $0x370] sm:$0xf0]  ;;  %v5549_v48 = vld [vmem:[#allocation2 + $0x424] sm:$0xf] }
  0x6d   :  { %4291 = vperm.xlu0 %7021, %v7370_v22   ;;  %4267 = vperm.xlu2 %7020, %v7208_v50   ;;  %5815 = vst [vmem:[#allocation2 + $0x198] sm:$0xff] %v6921_v14   ;;  %v5440_v17 = vld [vmem:[#allocation2 + $0xb4] sm:$0xf0]  ;;  %v5244_v46 = vor.u32 %v5525_v40, %v5241_v41  ;;  %v5337_v51 = vld [vmem:[#allocation2 + $0x430] sm:$0xf0]  ;;  %v6879_v56 = vld [vmem:[%s8163_s2 + $0x48] sm:$0xff] }
  0x6e   :  { %3759 = vmatmul.bf16.gmra.mxu3 %v7411_v54  ;;  %3944 = vmatpush.bf16.msra.mxu2 %v4928_v31  ;;  %v4879_v24 = vld [vmem:[#allocation2 + $0x88] sm:$0xf]  ;;  %v6917_v47 = vld [vmem:[%s8163_s2 + $0x178] sm:$0xff]  ;;  %5635 = vst [vmem:[#allocation2 + $0x78] sm:$0xff] %v6885_v33   ;;  %v5340_v53 = vor.u32 %v5549_v48, %v5337_v51  ;;  %v5521_v58 = vld [vmem:[#allocation2 + $0x344] sm:$0xf] }
  0x6f   :  { %3973 = vmatpush.bf16.msra.mxu3 %v5056_v39  ;;  %3888 = vmatpush.bf16.msra.mxu0 %v5276_v63  ;;  %v5225_v59 = vld [vmem:[#allocation2 + $0x350] sm:$0xf0]  ;;  %v6911_v60 = vld [vmem:[%s8163_s2 + $0x148] sm:$0xff]  ;;  %5795 = vst [vmem:[#allocation2 + $0x178] sm:$0xff] %v6917_v47   ;;  %v6913_v0 = vld [vmem:[%s8163_s2 + $0x158] sm:$0xff] }
  0x70   :  { %3920 = vmatpush.bf16.msra.mxu1 %v5356_v3  ;;  %v5472_v20 = vld [vmem:[#allocation2 + $0x1b4] sm:$0xf0]  ;;  %v5228_v63 = vor.u32 %v5521_v58, %v5225_v59  ;;  %5605 = vst [vmem:[#allocation2 + $0x48] sm:$0xff] %v6879_v56   ;;  %v6875_v10 = vld [vmem:[%s8163_s2 + $0x28] sm:$0xff]  ;;  %v5411_v33 = vld [vmem:[%s8161_s0 + $0x70] sm:$0xf0] }
  0x71   :  { %v5023_v18 = vld [vmem:[#allocation2 + $0x1a8] sm:$0xf]  ;;  %5765 = vst [vmem:[#allocation2 + $0x148] sm:$0xff] %v6911_v60   ;;  %v6877_v11 = vld [vmem:[%s8163_s2 + $0x38] sm:$0xff] }
  0x72   :  { %3945 = vmatpush.bf16.msra.mxu2 %v4912_v42  ;;  %v5024_v21 = vor.u32 %v5472_v20, %v5023_v18  ;;  %v5007_v30 = vld [vmem:[#allocation2 + $0x188] sm:$0xf]  ;;  %5775 = vst [vmem:[#allocation2 + $0x158] sm:$0xff] %v6913_v0   ;;  %v4783_v18 = vld [vmem:[%s8161_s0 + $0x60] sm:$0xf]  ;;  %v7013_v0 = vld [vmem:[%s8163_s2 + $0x478] sm:$0xff] }
  0x73   :  { %3974 = vmatpush.bf16.msra.mxu3 %v5040_v57  ;;  %3889 = vmatpush.bf16.msra.mxu0 %v5260_v13  ;;  %v5436_v25 = vld [vmem:[#allocation2 + $0x94] sm:$0xf0]  ;;  %v6915_v42 = vld [vmem:[%s8163_s2 + $0x168] sm:$0xff]  ;;  %5585 = vst [vmem:[#allocation2 + $0x28] sm:$0xff] %v6875_v10   ;;  %v7604_v41 = vor.u32 %v5411_v33, %v4783_v18 }
  0x74   :  { %4295 = vperm.xlu1 %7022, %v7388_v36   ;;  %v4880_v27 = vor.u32 %v5436_v25, %v4879_v24  ;;  %v5468_v31 = vld [vmem:[#allocation2 + $0x194] sm:$0xf0]  ;;  %5785 = vst [vmem:[#allocation2 + $0x168] sm:$0xff] %v6915_v42   ;;  %3921 = vmatpush.bf16.msra.mxu1 %v5340_v53  ;;  %v5545_v24 = vld [vmem:[#allocation2 + $0x404] sm:$0xf]  ;;  %v6995_v10 = vld [vmem:[%s8163_s2 + $0x3e8] sm:$0xff] }
  0x75   :  { %7024 = vset.pattern.permute.xlu0 %v7028_v6  ;;  %4279 = vperm.xlu2 %7020, %v7328_v37   ;;  %v5008_v39 = vor.u32 %v5468_v31, %v5007_v30  ;;  %v6881_v57 = vld [vmem:[%s8163_s2 + $0x58] sm:$0xff]  ;;  %5595 = vst [vmem:[#allocation2 + $0x38] sm:$0xff] %v6877_v11   ;;  %v5321_v30 = vld [vmem:[#allocation2 + $0x410] sm:$0xf0]  ;;  %v5513_v31 = vld [vmem:[#allocation2 + $0x304] sm:$0xf] }
  0x76   :  { %4335 = vperm.xlu0 %7024, %v7262_v26   ;;  %v4896_v26 = vor.u32 %v5440_v17, %v4895_v16  ;;  %5615 = vst [vmem:[#allocation2 + $0x58] sm:$0xff] %v6881_v57   ;;  %v5432_v2 = vld [vmem:[#allocation2 + $0x74] sm:$0xf0] }
  0x77   :  { %3975 = vmatpush.bf16.msra.mxu3 %v5024_v21  ;;  %3890 = vmatpush.bf16.msra.mxu0 %v5244_v46  ;;  %v4847_v9 = vld [vmem:[#allocation2 + $0x48] sm:$0xf]  ;;  %v6909_v13 = vld [vmem:[%s8163_s2 + $0x138] sm:$0xff]  ;;  %v5209_v21 = vld [vmem:[#allocation2 + $0x330] sm:$0xf0]  ;;  %6275 = vst [vmem:[#allocation2 + $0x478] sm:$0xff] %v7013_v0  }
  0x78   :  { %3677 = vmatmul.bf16.gmra.mxu0 %v7459_v19  ;;  %3946 = vmatpush.bf16.msra.mxu2 %v4896_v26  ;;  %v4975_v16 = vld [vmem:[#allocation2 + $0x148] sm:$0xf]  ;;  %v6873_v25 = vld [vmem:[%s8163_s2 + $0x18] sm:$0xff]  ;;  %5755 = vst [vmem:[#allocation2 + $0x138] sm:$0xff] %v6909_v13   ;;  %v5442_v13 = vld [vmem:[#allocation2 + $0xcc] sm:$0xf] }
  0x79   :  { %v5460_v17 = vld [vmem:[#allocation2 + $0x154] sm:$0xf0]  ;;  %v6871_v26 = vld [vmem:[%s8163_s2 + $0x8] sm:$0xff]  ;;  %5575 = vst [vmem:[#allocation2 + $0x18] sm:$0xff] %v6873_v25   ;;  %v4881_v0 = vld [vmem:[#allocation2 + $0x98] sm:$0xf0] }
  0x7a   :  { %3706 = vmatmul.bf16.gmra.mxu1 %v7467_v23  ;;  %v4976_v20 = vor.u32 %v5460_v17, %v4975_v16  ;;  %5565 = vst [vmem:[#allocation2 + $0x8] sm:$0xff] %v6871_v26   ;;  %v4831_v42 = vld [vmem:[#allocation2 + $0x28] sm:$0xf]  ;;  %v6997_v11 = vld [vmem:[%s8163_s2 + $0x3f8] sm:$0xff] }
  0x7b   :  { %3976 = vmatpush.bf16.msra.mxu3 %v5008_v39  ;;  %3891 = vmatpush.bf16.msra.mxu0 %v5228_v63  ;;  %v6905_v39 = vld [vmem:[%s8163_s2 + $0x118] sm:$0xff]  ;;  %v7011_v63 = vld [vmem:[%s8163_s2 + $0x468] sm:$0xff]  ;;  %6185 = vst [vmem:[#allocation2 + $0x3e8] sm:$0xff] %v6995_v10  }
  0x7c   :  { %3735 = vmatmul.bf16.gmra.mxu2 %v7476_v29  ;;  %7025 = vset.pattern.permute.xlu1 %v7028_v6  ;;  %5735 = vst [vmem:[#allocation2 + $0x118] sm:$0xff] %v6905_v39   ;;  %v5424_v46 = vld [vmem:[#allocation2 + $0x34] sm:$0xf0] }
  0x7d   :  { %4339 = vperm.xlu1 %7025, %v7274_v32   ;;  %4287 = vperm.xlu2 %7020, %v7436_v8   ;;  %v6883_v32 = vld [vmem:[%s8163_s2 + $0x68] sm:$0xff]  ;;  %v5428_v12 = vld [vmem:[#allocation2 + $0x54] sm:$0xf0]  ;;  %v4832_v47 = vor.u32 %v5424_v46, %v4831_v42  ;;  %6265 = vst [vmem:[#allocation2 + $0x468] sm:$0xff] %v7011_v63  }
  0x7e   :  { %3764 = vmatmul.bf16.gmra.mxu3 %v7481_v34  ;;  %4355 = vperm.xlu0 %7024, %v7370_v22   ;;  %v4763_v22 = vld [vmem:[%s8161_s0 + $0x38] sm:$0xf]  ;;  %5625 = vst [vmem:[#allocation2 + $0x68] sm:$0xff] %v6883_v32   ;;  %v4848_v14 = vor.u32 %v5428_v12, %v4847_v9  ;;  %v6903_v32 = vld [vmem:[%s8163_s2 + $0x108] sm:$0xff]  ;;  %v5416_v9 = vld [vmem:[%s8161_s0 + $0x98] sm:$0xf0] }
  0x7f   :  { %3947 = vmatpush.bf16.msra.mxu2 %v4880_v27  ;;  %v7564_v1 = vor.u32 %v5406_v35, %v4763_v22  ;;  %v5324_v22 = vor.u32 %v5545_v24, %v5321_v30  ;;  %v5193_v35 = vld [vmem:[#allocation2 + $0x310] sm:$0xf0]  ;;  %5725 = vst [vmem:[#allocation2 + $0x108] sm:$0xff] %v6903_v32   ;;  %v5456_v51 = vld [vmem:[#allocation2 + $0x134] sm:$0xf0]  ;;  %v6959_v12 = vld [vmem:[%s8163_s2 + $0x2c8] sm:$0xff] }
  0x80   :  { %v5196_v40 = vor.u32 %v5513_v31, %v5193_v35  ;;  %v5420_v57 = vld [vmem:[#allocation2 + $0x14] sm:$0xf0]  ;;  %6195 = vst [vmem:[#allocation2 + $0x3f8] sm:$0xff] %v6997_v11   ;;  %v6991_v24 = vld [vmem:[%s8163_s2 + $0x3c8] sm:$0xff] }
  0x81   :  { %3922 = vmatpush.bf16.msra.mxu1 %v5324_v22  ;;  %v4815_v56 = vld [vmem:[#allocation2 + $0x8] sm:$0xf]  ;;  %6005 = vst [vmem:[#allocation2 + $0x2c8] sm:$0xff] %v6959_v12   ;;  %v5560_v26 = vld [vmem:[#allocation2 + $0x474] sm:$0xf0] }
  0x82   :  { %v6993_v25 = vld [vmem:[%s8163_s2 + $0x3d8] sm:$0xff]  ;;  %v5311_v30 = vld [vmem:[#allocation2 + $0x3e8] sm:$0xf]  ;;  %6165 = vst [vmem:[#allocation2 + $0x3c8] sm:$0xff] %v6991_v24  }
  0x83   :  { %v5452_v59 = vld [vmem:[#allocation2 + $0x114] sm:$0xf0]  ;;  %6175 = vst [vmem:[#allocation2 + $0x3d8] sm:$0xff] %v6993_v25   ;;  %v7007_v35 = vld [vmem:[%s8163_s2 + $0x448] sm:$0xff] }
  0x84   :  { %v7009_v39 = vld [vmem:[%s8163_s2 + $0x458] sm:$0xff]  ;;  %v6955_v42 = vld [vmem:[%s8163_s2 + $0x2a8] sm:$0xff]  ;;  %6245 = vst [vmem:[#allocation2 + $0x448] sm:$0xff] %v7007_v35  }
  0x85   :  { %4347 = vperm.xlu1 %7025, %v7379_v28   ;;  %7023 = vset.pattern.permute.xlu2 %v7028_v6  ;;  %v4863_v28 = vld [vmem:[#allocation2 + $0x68] sm:$0xf]  ;;  %v6957_v46 = vld [vmem:[%s8163_s2 + $0x2b8] sm:$0xff]  ;;  %6255 = vst [vmem:[#allocation2 + $0x458] sm:$0xff] %v7009_v39  }
  0x86   :  { %4331 = vperm.xlu2 %7023, %v7208_v50   ;;  %v4864_v3 = vor.u32 %v5432_v2, %v4863_v28  ;;  %v4991_v6 = vld [vmem:[#allocation2 + $0x168] sm:$0xf]  ;;  %v5464_v50 = vld [vmem:[#allocation2 + $0x174] sm:$0xf0]  ;;  %5985 = vst [vmem:[#allocation2 + $0x2a8] sm:$0xff] %v6955_v42  }
  0x87   :  { %v4992_v7 = vor.u32 %v5464_v50, %v4991_v6  ;;  %v4943_v58 = vld [vmem:[#allocation2 + $0x108] sm:$0xf]  ;;  %v6965_v2 = vld [vmem:[%s8163_s2 + $0x2f8] sm:$0xff]  ;;  %5995 = vst [vmem:[#allocation2 + $0x2b8] sm:$0xff] %v6957_v46  }
  0x88   :  { %5381 = vmatmul.msk.bf16.vlgmr.msrb.gmra.mxu0 %vm3641_vm0, %v7520_v15  ;;  %3948 = vmatpush.bf16.msra.mxu2 %v4864_v3  ;;  %v4944_v60 = vor.u32 %v5452_v59, %v4943_v58  ;;  %v6963_v28 = vld [vmem:[%s8163_s2 + $0x2e8] sm:$0xff]  ;;  %v4929_v6 = vld [vmem:[#allocation2 + $0xf8] sm:$0xf0]  ;;  %6035 = vst [vmem:[#allocation2 + $0x2f8] sm:$0xff] %v6965_v2   ;;  %v5544_v31 = vld [vmem:[#allocation2 + $0x3f4] sm:$0xf0] }
  0x89   :  { %3977 = vmatpush.bf16.msra.mxu3 %v4992_v7  ;;  %v5446_v3 = vld [vmem:[#allocation2 + $0xec] sm:$0xf]  ;;  %v4803_v7 = vld [vmem:[%s8161_s0 + $0x88] sm:$0xf]  ;;  %6025 = vst [vmem:[#allocation2 + $0x2e8] sm:$0xff] %v6963_v28   ;;  %v5312_v32 = vor.u32 %v5544_v31, %v5311_v30  ;;  %v6953_v59 = vld [vmem:[%s8163_s2 + $0x298] sm:$0xff] }
  0x8a   :  { %3807 = vmatmul.bf16.vlgmr.msrb.gmra.mxu1 %v7289_v43  ;;  %v4932_v50 = vor.u32 %v5446_v3, %v4929_v6  ;;  %v7641_v16 = vor.u32 %v5416_v9, %v4803_v7  ;;  %v5167_v33 = vld [vmem:[#allocation2 + $0x2c8] sm:$0xf]  ;;  %v5540_v63 = vld [vmem:[#allocation2 + $0x3d4] sm:$0xf0]  ;;  %5975 = vst [vmem:[#allocation2 + $0x298] sm:$0xff] %v6953_v59  }
  0x8b   :  { %4031 = vmatpush.bf16.msrb.mxu1 %v5312_v32  ;;  %v5295_v58 = vld [vmem:[#allocation2 + $0x3c8] sm:$0xf]  ;;  %v7005_v31 = vld [vmem:[%s8163_s2 + $0x438] sm:$0xff] }
  0x8c   :  { %3836 = vmatmul.bf16.vlgmr.msrb.gmra.mxu2 %v7297_v55  ;;  %v5296_v2 = vor.u32 %v5540_v63, %v5295_v58  ;;  %v5359_v7 = vld [vmem:[#allocation2 + $0x448] sm:$0xf]  ;;  %v5556_v10 = vld [vmem:[#allocation2 + $0x454] sm:$0xf0]  ;;  %6235 = vst [vmem:[#allocation2 + $0x438] sm:$0xff] %v7005_v31  }
  0x8d   :  { %4359 = vperm.xlu1 %7025, %v7388_v36   ;;  %v6907_v36 = vld [vmem:[%s8163_s2 + $0x128] sm:$0xff]  ;;  %3949 = vmatpush.bf16.msra.mxu2 %v4848_v14  ;;  %v4913_v14 = vld [vmem:[#allocation2 + $0xd8] sm:$0xf0]  ;;  %v5360_v11 = vor.u32 %v5556_v10, %v5359_v7 }
  0x8e   :  { %3865 = vmatmul.bf16.vlgmr.msrb.gmra.mxu3 %v7300_v62  ;;  %4343 = vperm.xlu2 %7023, %v7328_v37   ;;  %v5517_v37 = vld [vmem:[#allocation2 + $0x324] sm:$0xf]  ;;  %5745 = vst [vmem:[#allocation2 + $0x128] sm:$0xff] %v6907_v36   ;;  %v6961_v36 = vld [vmem:[%s8163_s2 + $0x2d8] sm:$0xff]  ;;  %v4916_v17 = vor.u32 %v5442_v13, %v4913_v14  ;;  %v5151_v12 = vld [vmem:[#allocation2 + $0x2a8] sm:$0xf] }
  0x8f   :  { %v5212_v27 = vor.u32 %v5517_v37, %v5209_v21  ;;  %3978 = vmatpush.bf16.msra.mxu3 %v4976_v20  ;;  %v5375_v37 = vld [vmem:[#allocation2 + $0x468] sm:$0xf]  ;;  %6015 = vst [vmem:[#allocation2 + $0x2d8] sm:$0xff] %v6961_v36   ;;  %v5512_v21 = vld [vmem:[#allocation2 + $0x2f4] sm:$0xf0]  ;;  %4032 = vmatpush.bf16.msrb.mxu1 %v5296_v2 }
  0x90   :  { %v5376_v18 = vor.u32 %v5560_v26, %v5375_v37  ;;  %v5183_v20 = vld [vmem:[#allocation2 + $0x2e8] sm:$0xf]  ;;  %v5504_v36 = vld [vmem:[#allocation2 + $0x2b4] sm:$0xf0]  ;;  %v4849_v2 = vld [vmem:[#allocation2 + $0x58] sm:$0xf0] }
  0x91   :  { %3892 = vmatpush.bf16.msra.mxu0 %v5212_v27  ;;  %3950 = vmatpush.bf16.msra.mxu2 %v4832_v47  ;;  %v5184_v27 = vor.u32 %v5512_v21, %v5183_v20  ;;  %v5438_v47 = vld [vmem:[#allocation2 + $0xac] sm:$0xf]  ;;  %v6985_v14 = vld [vmem:[%s8163_s2 + $0x398] sm:$0xff]  ;;  %v5152_v37 = vor.u32 %v5504_v36, %v5151_v12 }
  0x92   :  { %v6983_v13 = vld [vmem:[%s8163_s2 + $0x388] sm:$0xff]  ;;  %6135 = vst [vmem:[#allocation2 + $0x398] sm:$0xff] %v6985_v14   ;;  %v6949_v39 = vld [vmem:[%s8163_s2 + $0x278] sm:$0xff] }
  0x93   :  { %6125 = vst [vmem:[#allocation2 + $0x388] sm:$0xff] %v6983_v13   ;;  %v7003_v30 = vld [vmem:[%s8163_s2 + $0x428] sm:$0xff]  ;;  %v6981_v58 = vld [vmem:[%s8163_s2 + $0x378] sm:$0xff] }
  0x94   :  { %v6947_v35 = vld [vmem:[%s8163_s2 + $0x268] sm:$0xff]  ;;  %6225 = vst [vmem:[#allocation2 + $0x428] sm:$0xff] %v7003_v30   ;;  %v6945_v63 = vld [vmem:[%s8163_s2 + $0x258] sm:$0xff] }
  0x95   :  { %v4959_v48 = vld [vmem:[#allocation2 + $0x128] sm:$0xf]  ;;  %3893 = vmatpush.bf16.msra.mxu0 %v5196_v40  ;;  %5945 = vst [vmem:[#allocation2 + $0x268] sm:$0xff] %v6947_v35   ;;  %v6977_v36 = vld [vmem:[%s8163_s2 + $0x358] sm:$0xff] }
  0x96   :  { %4351 = vperm.xlu2 %7023, %v7436_v8   ;;  %v4960_v53 = vor.u32 %v5456_v51, %v4959_v48  ;;  %v4816_v8 = vor.u32 %v5420_v57, %v4815_v56  ;;  %v5508_v22 = vld [vmem:[#allocation2 + $0x2d4] sm:$0xf0]  ;;  %v4897_v48 = vld [vmem:[#allocation2 + $0xb8] sm:$0xf0]  ;;  %v6987_v56 = vld [vmem:[%s8163_s2 + $0x3a8] sm:$0xff]  ;;  %5955 = vst [vmem:[#allocation2 + $0x278] sm:$0xff] %v6949_v39  }
  0x97   :  { %v5168_v40 = vor.u32 %v5508_v22, %v5167_v33  ;;  %v6989_v57 = vld [vmem:[%s8163_s2 + $0x3b8] sm:$0xff]  ;;  %6145 = vst [vmem:[#allocation2 + $0x3a8] sm:$0xff] %v6987_v56   ;;  %v6943_v59 = vld [vmem:[%s8163_s2 + $0x248] sm:$0xff] }
  0x98   :  { %5382 = vmatmul.msk.bf16.gmra.mxu0 %vm3641_vm0, %v7564_v1  ;;  %3979 = vmatpush.bf16.msra.mxu3 %v4960_v53  ;;  %v4900_v53 = vor.u32 %v5438_v47, %v4897_v48  ;;  %6155 = vst [vmem:[#allocation2 + $0x3b8] sm:$0xff] %v6989_v57   ;;  %v4865_v47 = vld [vmem:[#allocation2 + $0x78] sm:$0xf0]  ;;  %v6975_v12 = vld [vmem:[%s8163_s2 + $0x348] sm:$0xff] }
  0x99   :  { %3951 = vmatpush.bf16.msra.mxu2 %v4816_v8  ;;  %4002 = vmatpush.bf16.msrb.mxu0 %v5184_v27  ;;  %v6951_v8 = vld [vmem:[%s8163_s2 + $0x288] sm:$0xff]  ;;  %v5500_v27 = vld [vmem:[#allocation2 + $0x294] sm:$0xf0]  ;;  %6115 = vst [vmem:[#allocation2 + $0x378] sm:$0xff] %v6981_v58  }
  0x9a   :  { %3812 = vmatmul.bf16.gmra.mxu1 %v7331_v44  ;;  %5965 = vst [vmem:[#allocation2 + $0x288] sm:$0xff] %v6951_v8   ;;  %v6979_v8 = vld [vmem:[%s8163_s2 + $0x368] sm:$0xff] }
  0x9b   :  { %6105 = vst [vmem:[#allocation2 + $0x368] sm:$0xff] %v6979_v8   ;;  %v6939_v31 = vld [vmem:[%s8163_s2 + $0x228] sm:$0xff] }
  0x9c   :  { %3841 = vmatmul.bf16.gmra.mxu2 %v7339_v52  ;;  %3980 = vmatpush.bf16.msra.mxu3 %v4944_v60  ;;  %v5434_v60 = vld [vmem:[#allocation2 + $0x8c] sm:$0xf]  ;;  %5925 = vst [vmem:[#allocation2 + $0x248] sm:$0xff] %v6943_v59  }
  0x9d   :  { %4064 = vmatpush.bf16.msrb.mxu2 %v5376_v18  ;;  %4003 = vmatpush.bf16.msrb.mxu0 %v5168_v40  ;;  %v4884_v3 = vor.u32 %v5434_v60, %v4881_v0  ;;  %v5430_v40 = vld [vmem:[#allocation2 + $0x6c] sm:$0xf]  ;;  %v5263_v60 = vld [vmem:[#allocation2 + $0x388] sm:$0xf]  ;;  %5935 = vst [vmem:[#allocation2 + $0x258] sm:$0xff] %v6945_v63  }
  0x9e   :  { %3870 = vmatmul.bf16.gmra.mxu3 %v7348_v61  ;;  %v5279_v26 = vld [vmem:[#allocation2 + $0x3a8] sm:$0xf]  ;;  %v4868_v56 = vor.u32 %v5430_v40, %v4865_v47  ;;  %v5426_v0 = vld [vmem:[#allocation2 + $0x4c] sm:$0xf]  ;;  %6085 = vst [vmem:[#allocation2 + $0x348] sm:$0xff] %v6975_v12  }
  0x9f   :  { %v5536_v18 = vld [vmem:[#allocation2 + $0x3b4] sm:$0xf0]  ;;  %6095 = vst [vmem:[#allocation2 + $0x358] sm:$0xff] %v6977_v36   ;;  %v4833_v63 = vld [vmem:[#allocation2 + $0x38] sm:$0xf0] }
  0xa0   :  { %4089 = vmatpush.bf16.msrb.mxu3 %v4932_v50  ;;  %v5280_v21 = vor.u32 %v5536_v18, %v5279_v26  ;;  %5905 = vst [vmem:[#allocation2 + $0x228] sm:$0xff] %v6939_v31   ;;  %v5418_v36 = vld [vmem:[#allocation2 + $0xc] sm:$0xf] }
  0xa1   :  { %v7666_v51 = vpop.permute.xlu0 %2783  ;;  %4065 = vmatpush.bf16.msrb.mxu2 %v5360_v11  ;;  %4004 = vmatpush.bf16.msrb.mxu0 %v5152_v37  ;;  %v5135_v24 = vld [vmem:[#allocation2 + $0x288] sm:$0xf]  ;;  %v5552_v37 = vld [vmem:[#allocation2 + $0x434] sm:$0xf0] }
  0xa2   :  { %4033 = vmatpush.bf16.msrb.mxu1 %v5280_v21  ;;  %v5136_v22 = vor.u32 %v5500_v27, %v5135_v24  ;;  %v5343_v11 = vld [vmem:[#allocation2 + $0x428] sm:$0xf]  ;;  %v5496_v24 = vld [vmem:[#allocation2 + $0x274] sm:$0xf0] }
  0xa3   :  { %v5344_v18 = vor.u32 %v5552_v37, %v5343_v11  ;;  %v5247_v30 = vld [vmem:[#allocation2 + $0x368] sm:$0xf] }
  0xa4   :  { %4090 = vmatpush.bf16.msrb.mxu3 %v4916_v17  ;;  %v5103_v40 = vld [vmem:[#allocation2 + $0x248] sm:$0xf]  ;;  %v5492_v47 = vld [vmem:[#allocation2 + $0x254] sm:$0xf0] }
  0xa5   :  { %4005 = vmatpush.bf16.msrb.mxu0 %v5136_v22  ;;  %4066 = vmatpush.bf16.msrb.mxu2 %v5344_v18  ;;  %v6971_v22 = vld [vmem:[%s8163_s2 + $0x328] sm:$0xff]  ;;  %v5104_v59 = vor.u32 %v5492_v47, %v5103_v40 }
  0xa6   :  { %6065 = vst [vmem:[#allocation2 + $0x328] sm:$0xff] %v6971_v22  }
  0xa7   :  { %v5087_v18 = vld [vmem:[#allocation2 + $0x228] sm:$0xf] }
  0xa8   :  { %5383 = vmatmul.msk.bf16.gmra.mxu0 %vm3641_vm0, %v7604_v41  ;;  %4091 = vmatpush.bf16.msrb.mxu3 %v4900_v53 }
  0xa9   :  { %v7690_v17 = vpop.permute.xlu0 %2788 }
  0xaa   :  { %3817 = vmatmul.bf16.gmra.mxu1 %v7390_v38 }
  0xac   :  { %3846 = vmatmul.bf16.gmra.mxu2 %v7399_v45  ;;  %4092 = vmatpush.bf16.msrb.mxu3 %v4884_v3 }
  0xad   :  { %v5215_v22 = vld [vmem:[#allocation2 + $0x328] sm:$0xf] }
  0xae   :  { %3875 = vmatmul.bf16.gmra.mxu3 %v7408_v49  ;;  %v7707_v53 = vpop.permute.xlu1 %2793 }
  0xb0   :  { %4093 = vmatpush.bf16.msrb.mxu3 %v4868_v56  ;;  %v7001_v56 = vld [vmem:[%s8163_s2 + $0x418] sm:$0xff] }
  0xb1   :  { %6215 = vst [vmem:[#allocation2 + $0x418] sm:$0xff] %v7001_v56  }
  0xb3   :  { %v7772_v37 = vpop.permute.xlu2 %2803 }
  0xb8   :  { %5384 = vmatmul.msk.bf16.gmra.mxu0 %vm3641_vm0, %v7641_v16  ;;  %v5548_v40 = vld [vmem:[#allocation2 + $0x414] sm:$0xf0] }
  0xba   :  { %3822 = vmatmul.bf16.gmra.mxu1 %v7459_v19 }
  0xbc   :  { %3851 = vmatmul.bf16.gmra.mxu2 %v7467_v23 }
  0xbe   :  { %3880 = vmatmul.bf16.gmra.mxu3 %v7476_v29 }
  0xc5   :  { %v3663_v28 = vpop.f32.mrf.mxu0 }
  0xc6   :  { %v3664_v6 = vadd.f32 %v3663_v28, %v7666_v51  ;;  %v5532_v28 = vld [vmem:[#allocation2 + $0x394] sm:$0xf0] }
  0xc7   :  { %v3692_v50 = vpop.f32.mrf.mxu1 }
  0xc8   :  { %v3693_v9 = vadd.f32 %v3692_v50, %v3664_v6  ;;  %3894 = vmatmul.bf16.vlgmr.msra.gmra.mxu0 %v7303_v5  ;;  %v5264_v6 = vor.u32 %v5532_v28, %v5263_v60  ;;  %v4852_v50 = vor.u32 %v5426_v0, %v4849_v2  ;;  %v5422_v60 = vld [vmem:[#allocation2 + $0x2c] sm:$0xf] }
  0xc9   :  { %v6935_v0 = vld [vmem:[%s8163_s2 + $0x208] sm:$0xff] }
  0xca   :  { %5385 = vmatmul.msk.bf16.vlgmr.msra.gmra.mxu1 %vm3641_vm0, %v7520_v15  ;;  %4094 = vmatpush.bf16.msrb.mxu3 %v4852_v50  ;;  %v6937_v50 = vld [vmem:[%s8163_s2 + $0x218] sm:$0xff]  ;;  %5885 = vst [vmem:[#allocation2 + $0x208] sm:$0xff] %v6935_v0  }
  0xcb   :  { %4034 = vmatpush.bf16.msrb.mxu1 %v5264_v6  ;;  %v4836_v6 = vor.u32 %v5422_v60, %v4833_v63  ;;  %5895 = vst [vmem:[#allocation2 + $0x218] sm:$0xff] %v6937_v50   ;;  %v7781_v63 = vpop.permute.xlu2 %2808  ;;  %v5313_v50 = vld [vmem:[#allocation2 + $0x3f8] sm:$0xf0] }
  0xcc   :  { %3952 = vmatmul.bf16.vlgmr.msra.gmra.mxu2 %v7289_v43 }
  0xcd   :  { %v3665_v20 = vpop.f32.mrf.mxu0 }
  0xce   :  { %3981 = vmatmul.bf16.vlgmr.msra.gmra.mxu3 %v7297_v55  ;;  %v3666_v25 = vadd.f32 %v3665_v20, %v7690_v17  ;;  %v5119_v20 = vld [vmem:[#allocation2 + $0x268] sm:$0xf] }
  0xcf   :  { %v3721_v32 = vpop.f32.mrf.mxu2  ;;  %v3694_v33 = vpop.f32.mrf.mxu1  ;;  %v5120_v27 = vor.u32 %v5496_v24, %v5119_v20  ;;  %4095 = vmatpush.bf16.msrb.mxu3 %v4836_v6  ;;  %v5542_v6 = vld [vmem:[#allocation2 + $0x3ec] sm:$0xf] }
  0xd0   :  { %v3722_v42 = vadd.f32 %v3721_v32, %v3693_v9  ;;  %v3695_v46 = vadd.f32 %v3694_v33, %v3666_v25  ;;  %v7735_v25 = vpop.permute.xlu1 %2798  ;;  %v6941_v32 = vld [vmem:[%s8163_s2 + $0x238] sm:$0xff] }
  0xd1   :  { %v3750_v48 = vpop.f32.mrf.mxu3  ;;  %v5528_v33 = vld [vmem:[#allocation2 + $0x374] sm:$0xf0]  ;;  %4006 = vmatpush.bf16.msrb.mxu0 %v5120_v27  ;;  %5915 = vst [vmem:[#allocation2 + $0x238] sm:$0xff] %v6941_v32  }
  0xd2   :  { %v7709_v57 = vadd.f32 %v3750_v48, %v3722_v42  ;;  %v5248_v39 = vor.u32 %v5528_v33, %v5247_v30  ;;  %v6973_v42 = vld [vmem:[%s8163_s2 + $0x338] sm:$0xff]  ;;  %v6999_v48 = vld [vmem:[%s8163_s2 + $0x408] sm:$0xff] }
  0xd3   :  { %6205 = vst [vmem:[#allocation2 + $0x408] sm:$0xff] %v6999_v48  }
  0xd4   :  { %4035 = vmatpush.bf16.msrb.mxu1 %v5248_v39  ;;  %6075 = vst [vmem:[#allocation2 + $0x338] sm:$0xff] %v6973_v42  }
  0xd5   :  { %v3668_v3 = vpop.f32.mrf.mxu0  ;;  %4007 = vmatpush.bf16.msrb.mxu0 %v5104_v59 }
  0xd6   :  { %v3669_v7 = vadd.f32 %v3668_v3, %v7707_v53  ;;  %v5231_v3 = vld [vmem:[#allocation2 + $0x348] sm:$0xf] }
  0xd7   :  { %v3723_v9 = vpop.f32.mrf.mxu2  ;;  %v3697_v10 = vpop.f32.mrf.mxu1 }
  0xd8   :  { %v3724_v13 = vadd.f32 %v3723_v9, %v3695_v46  ;;  %v3698_v14 = vadd.f32 %v3697_v10, %v3669_v7  ;;  %3899 = vmatmul.bf16.gmra.mxu0 %v7351_v4  ;;  %v5524_v9 = vld [vmem:[#allocation2 + $0x354] sm:$0xf0]  ;;  %v6967_v10 = vld [vmem:[%s8163_s2 + $0x308] sm:$0xff] }
  0xd9   :  { %v3752_v26 = vpop.f32.mrf.mxu3  ;;  %v5232_v12 = vor.u32 %v5524_v9, %v5231_v3  ;;  %v5488_v24 = vld [vmem:[#allocation2 + $0x234] sm:$0xf0]  ;;  %6045 = vst [vmem:[#allocation2 + $0x308] sm:$0xff] %v6967_v10  }
  0xda   :  { %v7731_v21 = vadd.f32 %v3752_v26, %v3724_v13  ;;  %5386 = vmatmul.msk.bf16.gmra.mxu1 %vm3641_vm0, %v7564_v1  ;;  %v4817_v13 = vld [vmem:[#allocation2 + $0x18] sm:$0xf0]  ;;  %v5088_v30 = vor.u32 %v5488_v24, %v5087_v18  ;;  %v5327_v33 = vld [vmem:[#allocation2 + $0x408] sm:$0xf] }
  0xdb   :  { %v4820_v26 = vor.u32 %v5418_v36, %v4817_v13  ;;  %4036 = vmatpush.bf16.msrb.mxu1 %v5232_v12  ;;  %v5520_v47 = vld [vmem:[#allocation2 + $0x334] sm:$0xf0]  ;;  %v5316_v12 = vor.u32 %v5542_v6, %v5313_v50  ;;  %v5057_v36 = vld [vmem:[#allocation2 + $0x1f8] sm:$0xf0]  ;;  %v5558_v13 = vld [vmem:[#allocation2 + $0x46c] sm:$0xf] }
  0xdc   :  { %3957 = vmatmul.bf16.gmra.mxu2 %v7331_v44  ;;  %4008 = vmatpush.bf16.msrb.mxu0 %v5088_v30  ;;  %v5216_v56 = vor.u32 %v5520_v47, %v5215_v22  ;;  %v7787_v22 = vpop.permute.xlu0 %2813  ;;  %v5169_v6 = vld [vmem:[#allocation2 + $0x2d8] sm:$0xf0] }
  0xdd   :  { %v3670_v35 = vpop.f32.mrf.mxu0  ;;  %4096 = vmatpush.bf16.msrb.mxu3 %v4820_v26 }
  0xde   :  { %3986 = vmatmul.bf16.gmra.mxu3 %v7339_v52  ;;  %v3671_v46 = vadd.f32 %v3670_v35, %v7735_v25 }
  0xdf   :  { %v3726_v8 = vpop.f32.mrf.mxu2  ;;  %v3699_v58 = vpop.f32.mrf.mxu1  ;;  %4037 = vmatpush.bf16.msrb.mxu1 %v5216_v56 }
  0xe0   :  { %v3727_v28 = vadd.f32 %v3726_v8, %v3698_v14  ;;  %v3700_v2 = vadd.f32 %v3699_v58, %v3671_v46  ;;  %v6969_v14 = vld [vmem:[%s8163_s2 + $0x318] sm:$0xff]  ;;  %v5328_v46 = vor.u32 %v5548_v40, %v5327_v33  ;;  %v5071_v8 = vld [vmem:[#allocation2 + $0x208] sm:$0xf]  ;;  %v5538_v33 = vld [vmem:[#allocation2 + $0x3cc] sm:$0xf] }
  0xe1   :  { %v3755_v7 = vpop.f32.mrf.mxu3  ;;  %6055 = vst [vmem:[#allocation2 + $0x318] sm:$0xff] %v6969_v14   ;;  %v5484_v58 = vld [vmem:[#allocation2 + $0x214] sm:$0xf0]  ;;  %v5199_v60 = vld [vmem:[#allocation2 + $0x308] sm:$0xf] }
  0xe2   :  { %v7767_v11 = vadd.f32 %v3755_v7, %v3727_v28  ;;  %4067 = vmatpush.bf16.msrb.mxu2 %v5328_v46  ;;  %v5072_v59 = vor.u32 %v5484_v58, %v5071_v8  ;;  %v5478_v7 = vld [vmem:[#allocation2 + $0x1ec] sm:$0xf]  ;;  %v5377_v14 = vld [vmem:[#allocation2 + $0x478] sm:$0xf0] }
  0xe3   :  { %v5380_v24 = vor.u32 %v5558_v13, %v5377_v14  ;;  %v5297_v40 = vld [vmem:[#allocation2 + $0x3d8] sm:$0xf0]  ;;  %v5470_v13 = vld [vmem:[#allocation2 + $0x1ac] sm:$0xf] }
  0xe4   :  { %4009 = vmatpush.bf16.msrb.mxu0 %v5072_v59  ;;  %v5041_v46 = vld [vmem:[#allocation2 + $0x1d8] sm:$0xf0] }
  0xe5   :  { %v3673_v20 = vpop.f32.mrf.mxu0  ;;  %4209 = vmatpush.bf16.msra.mxu3 %v5380_v24  ;;  %v5554_v24 = vld [vmem:[#allocation2 + $0x44c] sm:$0xf] }
  0xe6   :  { %v3674_v27 = vadd.f32 %v3673_v20, %v7772_v37  ;;  %v5060_v20 = vor.u32 %v5478_v7, %v5057_v36  ;;  %4176 = vmatpush.bf16.msra.mxu2 %v5316_v12  ;;  %v7796_v7 = vpop.permute.xlu1 %2818  ;;  %v5534_v12 = vld [vmem:[#allocation2 + $0x3ac] sm:$0xf]  ;;  %v5281_v36 = vld [vmem:[#allocation2 + $0x3b8] sm:$0xf0] }
  0xe7   :  { %v3728_v31 = vpop.f32.mrf.mxu2  ;;  %v3702_v32 = vpop.f32.mrf.mxu1 }
  0xe8   :  { %v3729_v35 = vadd.f32 %v3728_v31, %v3700_v2  ;;  %v3703_v39 = vadd.f32 %v3702_v32, %v3674_v27  ;;  %3904 = vmatmul.bf16.gmra.mxu0 %v7411_v54  ;;  %v5516_v28 = vld [vmem:[#allocation2 + $0x314] sm:$0xf0]  ;;  %v5510_v31 = vld [vmem:[#allocation2 + $0x2ec] sm:$0xf]  ;;  %v5185_v32 = vld [vmem:[#allocation2 + $0x2f8] sm:$0xf0] }
  0xe9   :  { %v3757_v42 = vpop.f32.mrf.mxu3  ;;  %v5200_v3 = vor.u32 %v5516_v28, %v5199_v60  ;;  %4118 = vmatpush.bf16.msra.mxu0 %v5060_v20  ;;  %v5025_v20 = vld [vmem:[#allocation2 + $0x1b8] sm:$0xf0] }
  0xea   :  { %v7776_v48 = vadd.f32 %v3757_v42, %v3729_v35  ;;  %5387 = vmatmul.msk.bf16.gmra.mxu1 %vm3641_vm0, %v7604_v41  ;;  %v5188_v35 = vor.u32 %v5510_v31, %v5185_v32  ;;  %v5474_v42 = vld [vmem:[#allocation2 + $0x1cc] sm:$0xf] }
  0xeb   :  { %4038 = vmatpush.bf16.msrb.mxu1 %v5200_v3  ;;  %v5044_v47 = vor.u32 %v5474_v42, %v5041_v46  ;;  %v5506_v3 = vld [vmem:[#allocation2 + $0x2cc] sm:$0xf] }
  0xec   :  { %3962 = vmatmul.bf16.gmra.mxu2 %v7390_v38  ;;  %v5172_v50 = vor.u32 %v5506_v3, %v5169_v6  ;;  %v5502_v46 = vld [vmem:[#allocation2 + $0x2ac] sm:$0xf] }
  0xed   :  { %v3675_v0 = vpop.f32.mrf.mxu0  ;;  %4119 = vmatpush.bf16.msra.mxu0 %v5044_v47  ;;  %v5530_v47 = vld [vmem:[#allocation2 + $0x38c] sm:$0xf] }
  0xee   :  { %3991 = vmatmul.bf16.gmra.mxu3 %v7399_v45  ;;  %v3676_v2 = vadd.f32 %v3675_v0, %v7781_v63 }
  0xef   :  { %v3731_v9 = vpop.f32.mrf.mxu2  ;;  %v3704_v10 = vpop.f32.mrf.mxu1  ;;  %4147 = vmatpush.bf16.msra.mxu1 %v5188_v35 }
  0xf0   :  { %v3732_v26 = vadd.f32 %v3731_v9, %v3703_v39  ;;  %v3705_v18 = vadd.f32 %v3704_v10, %v3676_v2  ;;  %v5300_v39 = vor.u32 %v5538_v33, %v5297_v40  ;;  %v5028_v33 = vor.u32 %v5470_v13, %v5025_v20  ;;  %v5137_v13 = vld [vmem:[#allocation2 + $0x298] sm:$0xf0]  ;;  %v5526_v20 = vld [vmem:[#allocation2 + $0x36c] sm:$0xf] }
  0xf1   :  { %v3760_v27 = vpop.f32.mrf.mxu3 }
  0xf2   :  { %v7785_v30 = vadd.f32 %v3760_v27, %v3732_v26  ;;  %4177 = vmatpush.bf16.msra.mxu2 %v5300_v39  ;;  %v5361_v27 = vld [vmem:[#allocation2 + $0x458] sm:$0xf0]  ;;  %4120 = vmatpush.bf16.msra.mxu0 %v5028_v33 }
  0xf3   :  { %4148 = vmatpush.bf16.msra.mxu1 %v5172_v50  ;;  %v5364_v35 = vor.u32 %v5554_v24, %v5361_v27  ;;  %v5153_v39 = vld [vmem:[#allocation2 + $0x2b8] sm:$0xf0]  ;;  %v5462_v27 = vld [vmem:[#allocation2 + $0x16c] sm:$0xf] }
  0xf4   :  { %v5249_v24 = vld [vmem:[#allocation2 + $0x378] sm:$0xf0] }
  0xf5   :  { %v3678_v56 = vpop.f32.mrf.mxu0  ;;  %4210 = vmatpush.bf16.msra.mxu3 %v5364_v35  ;;  %v5252_v33 = vor.u32 %v5526_v20, %v5249_v24  ;;  %v4993_v35 = vld [vmem:[#allocation2 + $0x178] sm:$0xf0] }
  0xf6   :  { %v3679_v8 = vadd.f32 %v3678_v56, %v7787_v22  ;;  %v5156_v56 = vor.u32 %v5502_v46, %v5153_v39  ;;  %v5345_v46 = vld [vmem:[#allocation2 + $0x438] sm:$0xf0] }
  0xf7   :  { %v3733_v58 = vpop.f32.mrf.mxu2  ;;  %v3707_v59 = vpop.f32.mrf.mxu1 }
  0xf8   :  { %v3734_v60 = vadd.f32 %v3733_v58, %v3705_v18  ;;  %3909 = vmatmul.bf16.gmra.mxu0 %v7481_v34  ;;  %v3708_v0 = vadd.f32 %v3707_v59, %v3679_v8  ;;  %v5284_v18 = vor.u32 %v5534_v12, %v5281_v36  ;;  %v5265_v8 = vld [vmem:[#allocation2 + $0x398] sm:$0xf0]  ;;  %v5466_v58 = vld [vmem:[#allocation2 + $0x18c] sm:$0xf]  ;;  %4149 = vmatpush.bf16.msra.mxu1 %v5156_v56 }
  0xf9   :  { %v3762_v28 = vpop.f32.mrf.mxu3  ;;  %v5009_v59 = vld [vmem:[#allocation2 + $0x198] sm:$0xf0]  ;;  %v5498_v36 = vld [vmem:[#allocation2 + $0x28c] sm:$0xf] }
  0xfa   :  { %v7791_v2 = vadd.f32 %v3762_v28, %v3734_v60  ;;  %5388 = vmatmul.msk.bf16.gmra.mxu1 %vm3641_vm0, %v7641_v16  ;;  %4178 = vmatpush.bf16.msra.mxu2 %v5284_v18  ;;  %v5268_v60 = vor.u32 %v5530_v47, %v5265_v8  ;;  %v5012_v28 = vor.u32 %v5466_v58, %v5009_v59  ;;  %v5522_v59 = vld [vmem:[#allocation2 + $0x34c] sm:$0xf] }
  0xfb   :  { %v4996_v47 = vor.u32 %v5462_v27, %v4993_v35  ;;  %v5490_v27 = vld [vmem:[#allocation2 + $0x24c] sm:$0xf] }
  0xfc   :  { %3967 = vmatmul.bf16.gmra.mxu2 %v7459_v19  ;;  %4121 = vmatpush.bf16.msra.mxu0 %v5012_v28  ;;  %v5233_v28 = vld [vmem:[#allocation2 + $0x358] sm:$0xf0] }
  0xfd   :  { %v3680_v9 = vpop.f32.mrf.mxu0 }
  0xfe   :  { %3996 = vmatmul.bf16.gmra.mxu3 %v7467_v23  ;;  %v3681_v10 = vadd.f32 %v3680_v9, %v7796_v7  ;;  %4179 = vmatpush.bf16.msra.mxu2 %v5268_v60 }
  0xff   :  { %v3736_v14 = vpop.f32.mrf.mxu2  ;;  %v3709_v26 = vpop.f32.mrf.mxu1 }
 0x100   :  { %v3737_v31 = vadd.f32 %v3736_v14, %v3708_v0  ;;  %v3710_v32 = vadd.f32 %v3709_v26, %v3681_v10  ;;  %v5140_v14 = vor.u32 %v5498_v36, %v5137_v13  ;;  %4122 = vmatpush.bf16.msra.mxu0 %v4996_v47 }
 0x101   :  { %v3765_v40 = vpop.f32.mrf.mxu3 }
 0x102   :  { %v7800_v42 = vadd.f32 %v3765_v40, %v3737_v31  ;;  %4150 = vmatpush.bf16.msra.mxu1 %v5140_v14  ;;  %v5550_v40 = vld [vmem:[#allocation2 + $0x42c] sm:$0xf]  ;;  %4180 = vmatpush.bf16.msra.mxu2 %v5252_v33 }
 0x103   :  { %v5348_v8 = vor.u32 %v5550_v40, %v5345_v46  ;;  %v5518_v40 = vld [vmem:[#allocation2 + $0x32c] sm:$0xf]  ;;  %v5217_v46 = vld [vmem:[#allocation2 + $0x338] sm:$0xf0] }
 0x105   :  { %v3779_v3 = vpop.f32.mrf.mxu0  ;;  %4211 = vmatpush.bf16.msra.mxu3 %v5348_v8  ;;  %v5220_v8 = vor.u32 %v5518_v40, %v5217_v46  ;;  %v5482_v46 = vld [vmem:[#allocation2 + $0x20c] sm:$0xf] }
 0x106   :  { %v7803_v0 = vadd.f32 %v3779_v3, %v7709_v57  ;;  %v5458_v3 = vld [vmem:[#allocation2 + $0x14c] sm:$0xf] }
 0x107   :  { %v3738_v6 = vpop.f32.mrf.mxu2  ;;  %v3808_v50 = vpop.f32.mrf.mxu1 }
 0x108   :  { %v3739_v9 = vadd.f32 %v3738_v6, %v3710_v32  ;;  %4010 = vmatmul.bf16.vlgmr.msrb.gmra.mxu0 %v7300_v62  ;;  %v3809_v26 = vadd.f32 %v3808_v50, %v7666_v51  ;;  %v4977_v6 = vld [vmem:[#allocation2 + $0x158] sm:$0xf0]  ;;  %v5236_v50 = vor.u32 %v5522_v59, %v5233_v28 }
 0x109   :  { %v3767_v10 = vpop.f32.mrf.mxu3  ;;  %v5329_v59 = vld [vmem:[#allocation2 + $0x418] sm:$0xf0] }
 0x10a   :  { %v7806_v12 = vadd.f32 %v3767_v10, %v3739_v9  ;;  %4039 = vmatmul.bf16.vlgmr.msrb.gmra.mxu1 %v7303_v5  ;;  %v4980_v9 = vor.u32 %v5458_v3, %v4977_v6  ;;  %4181 = vmatpush.bf16.msra.mxu2 %v5236_v50 }
 0x10c   :  { %5389 = vmatmul.msk.bf16.vlgmr.msrb.gmra.mxu2 %vm3641_vm0, %v7520_v15  ;;  %4123 = vmatpush.bf16.msra.mxu0 %v4980_v9  ;;  %v5514_v9 = vld [vmem:[#allocation2 + $0x30c] sm:$0xf] }
 0x10d   :  { %v3781_v57 = vpop.f32.mrf.mxu0 }
 0x10e   :  { %4097 = vmatmul.bf16.vlgmr.msrb.gmra.mxu3 %v7289_v43  ;;  %v7814_v18 = vadd.f32 %v3781_v57, %v7731_v21  ;;  %v5494_v43 = vld [vmem:[#allocation2 + $0x26c] sm:$0xf]  ;;  %v5121_v21 = vld [vmem:[#allocation2 + $0x278] sm:$0xf0]  ;;  %4182 = vmatpush.bf16.msra.mxu2 %v5220_v8 }
 0x10f   :  { %v3837_v31 = vpop.f32.mrf.mxu2  ;;  %v3810_v32 = vpop.f32.mrf.mxu1  ;;  %v5124_v60 = vor.u32 %v5494_v43, %v5121_v21  ;;  %v4961_v43 = vld [vmem:[#allocation2 + $0x138] sm:$0xf0]  ;;  %v5546_v21 = vld [vmem:[#allocation2 + $0x40c] sm:$0xf] }
 0x110   :  { %v3838_v39 = vadd.f32 %v3837_v31, %v3809_v26  ;;  %v3811_v36 = vadd.f32 %v3810_v32, %v7690_v17  ;;  %v5105_v31 = vld [vmem:[#allocation2 + $0x258] sm:$0xf0]  ;;  %v5332_v6 = vor.u32 %v5546_v21, %v5329_v59 }
 0x111   :  { %v3866_v56 = vpop.f32.mrf.mxu3  ;;  %4151 = vmatpush.bf16.msra.mxu1 %v5124_v60  ;;  %v5108_v33 = vor.u32 %v5490_v27, %v5105_v31 }
 0x112   :  { %v7816_v58 = vadd.f32 %v3866_v56, %v3838_v39  ;;  %v5454_v39 = vld [vmem:[#allocation2 + $0x12c] sm:$0xf]  ;;  %4212 = vmatpush.bf16.msra.mxu3 %v5332_v6 }
 0x113   :  { %v4964_v28 = vor.u32 %v5454_v39, %v4961_v43  ;;  %v5073_v39 = vld [vmem:[#allocation2 + $0x218] sm:$0xf0] }
 0x114   :  { %v5076_v8 = vor.u32 %v5482_v46, %v5073_v39 }
 0x115   :  { %v3784_v10 = vpop.f32.mrf.mxu0  ;;  %4152 = vmatpush.bf16.msra.mxu1 %v5108_v33  ;;  %4124 = vmatpush.bf16.msra.mxu0 %v4964_v28 }
 0x116   :  { %v7820_v13 = vadd.f32 %v3784_v10, %v7767_v11 }
 0x117   :  { %v3839_v14 = vpop.f32.mrf.mxu2  ;;  %v3813_v26 = vpop.f32.mrf.mxu1 }
 0x118   :  { %v3840_v57 = vadd.f32 %v3839_v14, %v3811_v36  ;;  %4015 = vmatmul.bf16.gmra.mxu0 %v7348_v61  ;;  %v3814_v32 = vadd.f32 %v3813_v26, %v7707_v53  ;;  %v5201_v36 = vld [vmem:[#allocation2 + $0x318] sm:$0xf0]  ;;  %v5450_v14 = vld [vmem:[#allocation2 + $0x10c] sm:$0xf] }
 0x119   :  { %v3868_v20 = vpop.f32.mrf.mxu3  ;;  %v4945_v26 = vld [vmem:[#allocation2 + $0x118] sm:$0xf0] }
 0x11a   :  { %v7823_v24 = vadd.f32 %v3868_v20, %v3840_v57  ;;  %4044 = vmatmul.bf16.gmra.mxu1 %v7351_v4  ;;  %v5204_v57 = vor.u32 %v5514_v9, %v5201_v36  ;;  %v4948_v20 = vor.u32 %v5450_v14, %v4945_v26 }
 0x11c   :  { %5390 = vmatmul.msk.bf16.gmra.mxu2 %vm3641_vm0, %v7564_v1  ;;  %4125 = vmatpush.bf16.msra.mxu0 %v4948_v20  ;;  %v7864_v20 = vpop.permute.xlu1 %4275 }
 0x11d   :  { %v3786_v11 = vpop.f32.mrf.mxu0  ;;  %4183 = vmatpush.bf16.msra.mxu2 %v5204_v57 }
 0x11e   :  { %4102 = vmatmul.bf16.gmra.mxu3 %v7331_v44  ;;  %v7831_v35 = vadd.f32 %v3786_v11, %v7776_v48  ;;  %v5486_v44 = vld [vmem:[#allocation2 + $0x22c] sm:$0xf]  ;;  %v5089_v48 = vld [vmem:[#allocation2 + $0x238] sm:$0xf0] }
 0x11f   :  { %v3842_v47 = vpop.f32.mrf.mxu2  ;;  %v3815_v56 = vpop.f32.mrf.mxu1  ;;  %v5092_v10 = vor.u32 %v5486_v44, %v5089_v48 }
 0x120   :  { %v3843_v60 = vadd.f32 %v3842_v47, %v3814_v32  ;;  %v3816_v31 = vadd.f32 %v3815_v56, %v7735_v25  ;;  %v7843_v56 = vpop.permute.xlu2 %4267 }
 0x121   :  { %v3871_v3 = vpop.f32.mrf.mxu3  ;;  %4153 = vmatpush.bf16.msra.mxu1 %v5092_v10 }
 0x122   :  { %v7833_v50 = vadd.f32 %v3871_v3, %v3843_v60 }
 0x125   :  { %v3789_v27 = vpop.f32.mrf.mxu0  ;;  %4154 = vmatpush.bf16.msra.mxu1 %v5076_v8 }
 0x126   :  { %v7837_v33 = vadd.f32 %v3789_v27, %v7785_v30 }
 0x127   :  { %v3844_v32 = vpop.f32.mrf.mxu2  ;;  %v3818_v11 = vpop.f32.mrf.mxu1 }
 0x128   :  { %v3845_v40 = vadd.f32 %v3844_v32, %v3816_v31  ;;  %4020 = vmatmul.bf16.gmra.mxu0 %v7408_v49  ;;  %v3819_v30 = vadd.f32 %v3818_v11, %v7772_v37  ;;  %v7854_v9 = vpop.permute.xlu2 %4279 }
 0x129   :  { %v3873_v47 = vpop.f32.mrf.mxu3 }
 0x12a   :  { %v7840_v43 = vadd.f32 %v3873_v47, %v3845_v40  ;;  %4049 = vmatmul.bf16.gmra.mxu1 %v7411_v54 }
 0x12c   :  { %5391 = vmatmul.msk.bf16.gmra.mxu2 %vm3641_vm0, %v7604_v41 }
 0x12d   :  { %v3791_v21 = vpop.f32.mrf.mxu0 }
 0x12e   :  { %4107 = vmatmul.bf16.gmra.mxu3 %v7390_v38  ;;  %v7850_v59 = vadd.f32 %v3791_v21, %v7791_v2  ;;  %v4234_v21 = vmax.f32 %v7803_v0, 0.0 }
 0x12f   :  { %v3847_v60 = vpop.f32.mrf.mxu2  ;;  %v3820_v28 = vpop.f32.mrf.mxu1 }
 0x130   :  { %v3848_v3 = vadd.f32 %v3847_v60, %v3819_v30  ;;  %v3821_v10 = vadd.f32 %v3820_v28, %v7781_v63  ;;  %v7875_v39 = vpop.permute.xlu2 %4287  ;;  %v7880_v60 = vpop.permute.xlu1 %4283 }
 0x131   :  { %v3876_v6 = vpop.f32.mrf.mxu3 }
 0x132   :  { %v7852_v44 = vadd.f32 %v3876_v6, %v3848_v3 }
 0x135   :  { %v3794_v48 = vpop.f32.mrf.mxu0 }
 0x136   :  { %v7858_v36 = vadd.f32 %v3794_v48, %v7800_v42  ;;  %v7869_v42 = vpop.permute.xlu0 %4271 }
 0x137   :  { %v3849_v14 = vpop.f32.mrf.mxu2  ;;  %v3823_v26 = vpop.f32.mrf.mxu1 }
 0x138   :  { %v3850_v38 = vadd.f32 %v3849_v14, %v3821_v10  ;;  %4025 = vmatmul.bf16.gmra.mxu0 %v7476_v29  ;;  %v3824_v27 = vadd.f32 %v3823_v26, %v7787_v22  ;;  %v4298_v26 = vmul.f32 %v7843_v56, %v4234_v21  ;;  %v7908_v21 = vpop.permute.xlu1 %4295 }
 0x139   :  { %v3878_v2 = vpop.f32.mrf.mxu3  ;;  %8177 = vst [vmem:[#allocation3_spill] sm:$0xff] %v7908_v21 }
 0x13a   :  { %v7861_v57 = vadd.f32 %v3878_v2, %v3850_v38  ;;  %4054 = vmatmul.bf16.gmra.mxu1 %v7481_v34  ;;  %v7891_v2 = vpop.permute.xlu2 %4331 }
 0x13c   :  { %5392 = vmatmul.msk.bf16.gmra.mxu2 %vm3641_vm0, %v7641_v16 }
 0x13d   :  { %v3796_v31 = vpop.f32.mrf.mxu0 }
 0x13e   :  { %4112 = vmatmul.bf16.gmra.mxu3 %v7459_v19  ;;  %v7873_v32 = vadd.f32 %v3796_v31, %v7806_v12  ;;  %v7885_v10 = vpop.permute.xlu0 %4291  ;;  %v7896_v31 = vadd.f32 %v7891_v2, %v4298_v26 }
 0x13f   :  { %v3852_v11 = vpop.f32.mrf.mxu2  ;;  %v3825_v40 = vpop.f32.mrf.mxu1 }
 0x140   :  { %v3853_v46 = vadd.f32 %v3852_v11, %v3824_v27  ;;  %v3826_v28 = vadd.f32 %v3825_v40, %v7796_v7 }
 0x141   :  { %v3881_v47 = vpop.f32.mrf.mxu3 }
 0x142   :  { %v7877_v8 = vadd.f32 %v3881_v47, %v3853_v46 }
 0x145   :  { %v3895_v30 = vpop.f32.mrf.mxu0 }
 0x146   :  { %v3896_v19 = vadd.f32 %v3895_v30, %v7816_v58 }
 0x147   :  { %v3854_v3 = vpop.f32.mrf.mxu2  ;;  %v3924_v12 = vpop.f32.mrf.mxu1 }
 0x148   :  { %v3855_v6 = vadd.f32 %v3854_v3, %v3826_v28  ;;  %v3925_v48 = vadd.f32 %v3924_v12, %v3896_v19  ;;  %4126 = vmatmul.bf16.vlgmr.msra.gmra.mxu0 %v7297_v55  ;;  %v4238_v55 = vmax.f32 %v7814_v18, 0.0  ;;  %v7913_v12 = vpop.permute.xlu0 %4335 }
 0x149   :  { %v3883_v14 = vpop.f32.mrf.mxu3 }
 0x14a   :  { %v7888_v38 = vadd.f32 %v3883_v14, %v3855_v6  ;;  %v4235_v0 = vmax.f32 %v3925_v48, 0.0  ;;  %4155 = vmatmul.bf16.vlgmr.msra.gmra.mxu1 %v7300_v62  ;;  %v4302_v18 = vmul.f32 %v7869_v42, %v4238_v55  ;;  %v4242_v48 = vmax.f32 %v7820_v13, 0.0 }
 0x14c   :  { %v4299_v58 = vmul.f32 %v7843_v56, %v4235_v0  ;;  %4184 = vmatmul.bf16.vlgmr.msra.gmra.mxu2 %v7303_v5  ;;  %v7917_v6 = vadd.f32 %v7913_v12, %v4302_v18 }
 0x14d   :  { %v3897_v27 = vpop.f32.mrf.mxu0 }
 0x14e   :  { %v7900_v11 = vadd.f32 %v7891_v2, %v4299_v58  ;;  %5393 = vmatmul.msk.bf16.vlgmr.msra.gmra.mxu3 %vm3641_vm0, %v7520_v15  ;;  %v3898_v62 = vadd.f32 %v3897_v27, %v7823_v24 }
 0x14f   :  { %v3953_v40 = vpop.f32.mrf.mxu2  ;;  %v3926_v46 = vpop.f32.mrf.mxu1 }
 0x150   :  { %v3954_v5 = vadd.f32 %v3953_v40, %v7666_v51  ;;  %v3927_v30 = vadd.f32 %v3926_v46, %v3898_v62  ;;  %v4306_v46 = vmul.f32 %v7864_v20, %v4242_v48 }
 0x151   :  { %v3982_v28 = vpop.f32.mrf.mxu3 }
 0x152   :  { %v7911_v19 = vadd.f32 %v3982_v28, %v3954_v5  ;;  %v4239_v3 = vmax.f32 %v3927_v30, 0.0  ;;  %v7932_v30 = vpop.permute.xlu1 %4339 }
 0x153   :  { %v7937_v18 = vadd.f32 %v7932_v30, %v4306_v46  ;;  %v4250_v46 = vmax.f32 %v7837_v33, 0.0 }
 0x154   :  { %v4303_v15 = vmul.f32 %v7869_v42, %v4239_v3 }
 0x155   :  { %v3900_v24 = vpop.f32.mrf.mxu0 }
 0x156   :  { %v7921_v14 = vadd.f32 %v7913_v12, %v4303_v15  ;;  %v3901_v26 = vadd.f32 %v3900_v24, %v7833_v50 }
 0x157   :  { %v3955_v0 = vpop.f32.mrf.mxu2  ;;  %v3929_v58 = vpop.f32.mrf.mxu1 }
 0x158   :  { %v3956_v55 = vadd.f32 %v3955_v0, %v7690_v17  ;;  %v3930_v62 = vadd.f32 %v3929_v58, %v3901_v26  ;;  %4131 = vmatmul.bf16.gmra.mxu0 %v7339_v52  ;;  %v4246_v52 = vmax.f32 %v7831_v35, 0.0 }
 0x159   :  { %v3984_v40 = vpop.f32.mrf.mxu3 }
 0x15a   :  { %v7929_v5 = vadd.f32 %v3984_v40, %v3956_v55  ;;  %v4243_v13 = vmax.f32 %v3930_v62, 0.0  ;;  %4160 = vmatmul.bf16.gmra.mxu1 %v7348_v61  ;;  %v4310_v58 = vmul.f32 %v7854_v9, %v4246_v52  ;;  %v7952_v62 = vpop.permute.xlu2 %4343 }
 0x15c   :  { %v4307_v50 = vmul.f32 %v7864_v20, %v4243_v13  ;;  %4189 = vmatmul.bf16.gmra.mxu2 %v7351_v4 }
 0x15d   :  { %v3902_v28 = vpop.f32.mrf.mxu0 }
 0x15e   :  { %v7941_v3 = vadd.f32 %v7932_v30, %v4307_v50  ;;  %5394 = vmatmul.msk.bf16.gmra.mxu3 %vm3641_vm0, %v7564_v1  ;;  %v3903_v61 = vadd.f32 %v3902_v28, %v7840_v43  ;;  %v7956_v43 = vadd.f32 %v7952_v62, %v4310_v58  ;;  %v7971_v58 = vpop.permute.xlu1 %4347 }
 0x15f   :  { %v3958_v15 = vpop.f32.mrf.mxu2  ;;  %v3931_v24 = vpop.f32.mrf.mxu1 }
 0x160   :  { %v3959_v4 = vadd.f32 %v3958_v15, %v7707_v53  ;;  %v3932_v26 = vadd.f32 %v3931_v24, %v3903_v61 }
 0x161   :  { %v3987_v0 = vpop.f32.mrf.mxu3 }
 0x162   :  { %v7950_v35 = vadd.f32 %v3987_v0, %v3959_v4  ;;  %v4247_v55 = vmax.f32 %v3932_v26, 0.0  ;;  %v4314_v26 = vmul.f32 %v7880_v60, %v4250_v46 }
 0x164   :  { %v4311_v1 = vmul.f32 %v7854_v9, %v4247_v55 }
 0x165   :  { %v3905_v40 = vpop.f32.mrf.mxu0 }
 0x166   :  { %v7960_v13 = vadd.f32 %v7952_v62, %v4311_v1  ;;  %v3906_v50 = vadd.f32 %v3905_v40, %v7852_v44  ;;  %v7976_v1 = vadd.f32 %v7971_v58, %v4314_v26  ;;  %v7991_v26 = vpop.permute.xlu2 %4351 }
 0x167   :  { %v3960_v28 = vpop.f32.mrf.mxu2  ;;  %v3934_v52 = vpop.f32.mrf.mxu1 }
 0x168   :  { %v3961_v15 = vadd.f32 %v3960_v28, %v7735_v25  ;;  %v3935_v24 = vadd.f32 %v3934_v52, %v3906_v50  ;;  %4136 = vmatmul.bf16.gmra.mxu0 %v7399_v45  ;;  %v4254_v45 = vmax.f32 %v7850_v59, 0.0 }
 0x169   :  { %v3989_v4 = vpop.f32.mrf.mxu3 }
 0x16a   :  { %v7968_v0 = vadd.f32 %v3989_v4, %v3961_v15  ;;  %v4251_v33 = vmax.f32 %v3935_v24, 0.0  ;;  %4165 = vmatmul.bf16.gmra.mxu1 %v7408_v49  ;;  %v4318_v24 = vmul.f32 %v7875_v39, %v4254_v45 }
 0x16c   :  { %v4315_v44 = vmul.f32 %v7880_v60, %v4251_v33  ;;  %4194 = vmatmul.bf16.gmra.mxu2 %v7411_v54 }
 0x16d   :  { %v3907_v55 = vpop.f32.mrf.mxu0 }
 0x16e   :  { %v7980_v40 = vadd.f32 %v7971_v58, %v4315_v44  ;;  %5395 = vmatmul.msk.bf16.gmra.mxu3 %vm3641_vm0, %v7604_v41  ;;  %v3908_v49 = vadd.f32 %v3907_v55, %v7861_v57  ;;  %v7995_v57 = vadd.f32 %v7991_v26, %v4318_v24  ;;  %v4258_v44 = vmax.f32 %v7858_v36, 0.0 }
 0x16f   :  { %v3963_v46 = vpop.f32.mrf.mxu2  ;;  %v3936_v50 = vpop.f32.mrf.mxu1 }
 0x170   :  { %v3964_v54 = vadd.f32 %v3963_v46, %v7772_v37  ;;  %v3937_v52 = vadd.f32 %v3936_v50, %v3908_v49  ;;  %8178 = vst [vmem:[#allocation4_spill] sm:$0xff] %v7995_v57  ;;  %v4322_v24 = vmul.f32 %v7885_v10, %v4258_v44 }
 0x171   :  { %v3992_v15 = vpop.f32.mrf.mxu3 }
 0x172   :  { %v7989_v59 = vadd.f32 %v3992_v15, %v3964_v54  ;;  %v4255_v4 = vmax.f32 %v3937_v52, 0.0 }
 0x174   :  { %v4319_v41 = vmul.f32 %v7875_v39, %v4255_v4 }
 0x175   :  { %v3910_v33 = vpop.f32.mrf.mxu0 }
 0x176   :  { %v7999_v55 = vadd.f32 %v7991_v26, %v4319_v41  ;;  %v3911_v49 = vadd.f32 %v3910_v33, %v7877_v8  ;;  %v8010_v41 = vpop.permute.xlu0 %4355 }
 0x177   :  { %v3965_v46 = vpop.f32.mrf.mxu2  ;;  %v3939_v45 = vpop.f32.mrf.mxu1  ;;  %8180 = vst [vmem:[#allocation6_spill] sm:$0xff] %v8010_v41 }
 0x178   :  { %8179 = vst [vmem:[#allocation5_spill] sm:$0xff] %v7999_v55  ;;  %v3966_v54 = vadd.f32 %v3965_v46, %v7781_v63  ;;  %v3940_v52 = vadd.f32 %v3939_v45, %v3911_v49  ;;  %4141 = vmatmul.bf16.gmra.mxu0 %v7467_v23  ;;  %v8015_v46 = vadd.f32 %v8010_v41, %v4322_v24  ;;  %v4262_v23 = vmax.f32 %v7873_v32, 0.0 }
 0x179   :  { %v3994_v15 = vpop.f32.mrf.mxu3 }
 0x17a   :  { %v8007_v4 = vadd.f32 %v3994_v15, %v3966_v54  ;;  %v4259_v36 = vmax.f32 %v3940_v52, 0.0  ;;  %4170 = vmatmul.bf16.gmra.mxu1 %v7476_v29  ;;  %8181 = vst [vmem:[#allocation7_spill] sm:$0xff] %v8015_v46  ;;  %v4326_v24 = vmul.f32 %v7908_v21, %v4262_v23 }
 0x17c   :  { %v4323_v8 = vmul.f32 %v7885_v10, %v4259_v36  ;;  %4199 = vmatmul.bf16.gmra.mxu2 %v7481_v34 }
 0x17d   :  { %v3912_v33 = vpop.f32.mrf.mxu0 }
 0x17e   :  { %v8019_v49 = vadd.f32 %v8010_v41, %v4323_v8  ;;  %5396 = vmatmul.msk.bf16.gmra.mxu3 %vm3641_vm0, %v7641_v16  ;;  %v3913_v29 = vadd.f32 %v3912_v33, %v7888_v38  ;;  %v8028_v8 = vpop.permute.xlu1 %4359 }
 0x17f   :  { %v3968_v44 = vpop.f32.mrf.mxu2  ;;  %v3941_v45 = vpop.f32.mrf.mxu1  ;;  %8183 = vst [vmem:[#allocation9_spill] sm:$0xff] %v8028_v8  ;;  %v8032_v38 = vadd.f32 %v8028_v8, %v4326_v24 }
 0x180   :  { %8182 = vst [vmem:[#allocation8_spill] sm:$0xff] %v8019_v49  ;;  %v3969_v34 = vadd.f32 %v3968_v44, %v7787_v22  ;;  %v3942_v52 = vadd.f32 %v3941_v45, %v3913_v29 }
 0x181   :  { %v3997_v15 = vpop.f32.mrf.mxu3  ;;  %8184 = vst [vmem:[#allocation10_spill] sm:$0xff] %v8032_v38 }
 0x182   :  { %v3998_v32 = vadd.f32 %v3997_v15, %v3969_v34  ;;  %v4263_v36 = vmax.f32 %v3942_v52, 0.0 }
 0x184   :  { %v4327_v50 = vmul.f32 %v7908_v21, %v4263_v36 }
 0x185   :  { %v4011_v16 = vpop.f32.mrf.mxu0 }
 0x186   :  { %v8035_v33 = vadd.f32 %v8028_v8, %v4327_v50  ;;  %v4012_v54 = vadd.f32 %v4011_v16, %v7911_v19 }
 0x187   :  { %v3970_v44 = vpop.f32.mrf.mxu2  ;;  %v4040_v29 = vpop.f32.mrf.mxu1 }
 0x188   :  { %8185 = vst [vmem:[#allocation11_spill] sm:$0xff] %v8035_v33  ;;  %v3971_v45 = vadd.f32 %v3970_v44, %v7796_v7  ;;  %v4041_v34 = vadd.f32 %v4040_v29, %v4012_v54 }
 0x189   :  { %v3999_v52 = vpop.f32.mrf.mxu3 }
 0x18a   :  { %v4000_v15 = vadd.f32 %v3999_v52, %v3971_v45 }
 0x18d   :  { %v4013_v36 = vpop.f32.mrf.mxu0 }
 0x18e   :  { %v4014_v28 = vadd.f32 %v4013_v36, %v7929_v5 }
 0x18f   :  { %v4069_v24 = vpop.f32.mrf.mxu2  ;;  %v4042_v61 = vpop.f32.mrf.mxu1 }
 0x190   :  { %v8042_v48 = vadd.f32 %v4069_v24, %v4041_v34  ;;  %v4043_v50 = vadd.f32 %v4042_v61, %v4014_v28 }
 0x191   :  { %v4098_v27 = vpop.f32.mrf.mxu3 }
 0x195   :  { %v4016_v19 = vpop.f32.mrf.mxu0 }
 0x196   :  { %v4017_v16 = vadd.f32 %v4016_v19, %v7950_v35 }
 0x197   :  { %v4071_v47 = vpop.f32.mrf.mxu2  ;;  %v4045_v8 = vpop.f32.mrf.mxu1 }
 0x198   :  { %v8045_v23 = vadd.f32 %v4071_v47, %v4043_v50  ;;  %v4046_v44 = vadd.f32 %v4045_v8, %v4017_v16 }
 0x199   :  { %v4100_v54 = vpop.f32.mrf.mxu3 }
 0x19d   :  { %v4018_v29 = vpop.f32.mrf.mxu0 }
 0x19e   :  { %v4019_v45 = vadd.f32 %v4018_v29, %v7968_v0 }
 0x19f   :  { %v4074_v52 = vpop.f32.mrf.mxu2  ;;  %v4047_v5 = vpop.f32.mrf.mxu1 }
 0x1a0   :  { %v8048_v36 = vadd.f32 %v4074_v52, %v4046_v44  ;;  %v4048_v34 = vadd.f32 %v4047_v5, %v4019_v45 }
 0x1a1   :  { %v4103_v24 = vpop.f32.mrf.mxu3 }
 0x1a5   :  { %v4021_v61 = vpop.f32.mrf.mxu0 }
 0x1a6   :  { %v4022_v28 = vadd.f32 %v4021_v61, %v7989_v59 }
 0x1a7   :  { %v4076_v33 = vpop.f32.mrf.mxu2  ;;  %v4050_v35 = vpop.f32.mrf.mxu1 }
 0x1a8   :  { %v8051_v19 = vadd.f32 %v4076_v33, %v4048_v34  ;;  %v4051_v47 = vadd.f32 %v4050_v35, %v4022_v28 }
 0x1a9   :  { %v8053_v50 = vpop.f32.mrf.mxu3 }
 0x1ad   :  { %v4023_v8 = vpop.f32.mrf.mxu0 }
 0x1ae   :  { %v4024_v16 = vadd.f32 %v4023_v8, %v8007_v4 }
 0x1af   :  { %v4079_v0 = vpop.f32.mrf.mxu2  ;;  %v4052_v29 = vpop.f32.mrf.mxu1 }
 0x1b0   :  { %v8056_v38 = vadd.f32 %v4079_v0, %v4051_v47  ;;  %v4053_v44 = vadd.f32 %v4052_v29, %v4024_v16 }
 0x1b1   :  { %v8058_v45 = vpop.f32.mrf.mxu3 }
 0x1b5   :  { %v4026_v52 = vpop.f32.mrf.mxu0 }
 0x1b6   :  { %v4027_v5 = vadd.f32 %v4026_v52, %v3998_v32  ;;  %v4099_v32 = vadd.f32 %v4098_v27, %v7666_v51 }
 0x1b7   :  { %v4081_v59 = vpop.f32.mrf.mxu2  ;;  %v4055_v61 = vpop.f32.mrf.mxu1 }
 0x1b8   :  { %v8060_v49 = vadd.f32 %v4081_v59, %v4053_v44  ;;  %v4056_v33 = vadd.f32 %v4055_v61, %v4027_v5 }
 0x1b9   :  { %v8062_v34 = vpop.f32.mrf.mxu3 }
 0x1bd   :  { %v4028_v28 = vpop.f32.mrf.mxu0 }
 0x1be   :  { %v4029_v35 = vadd.f32 %v4028_v28, %v4000_v15 }
 0x1bf   :  { %v4084_v46 = vpop.f32.mrf.mxu2  ;;  %v4057_v4 = vpop.f32.mrf.mxu1 }
 0x1c0   :  { %v8064_v8 = vadd.f32 %v4084_v46, %v4056_v33  ;;  %v4058_v47 = vadd.f32 %v4057_v4, %v4029_v35  ;;  %v4236_v46 = vmax.f32 %v8042_v48, 0.0  ;;  %v4101_v33 = vadd.f32 %v4100_v54, %v7690_v17 }
 0x1c1   :  { %v8066_v0 = vpop.f32.mrf.mxu3  ;;  %v4104_v48 = vadd.f32 %v4103_v24, %v7707_v53 }
 0x1c2   :  { %v4300_v57 = vmul.f32 %v7843_v56, %v4236_v46 }
 0x1c5   :  { %v4127_v16 = vpop.f32.mrf.mxu0 }
 0x1c6   :  { %v4128_v5 = vadd.f32 %v4127_v16, %v4099_v32  ;;  %v4240_v16 = vmax.f32 %v8045_v23, 0.0 }
 0x1c7   :  { %v4086_v29 = vpop.f32.mrf.mxu2  ;;  %v4156_v21 = vpop.f32.mrf.mxu1 }
 0x1c8   :  { %v8069_v52 = vadd.f32 %v4086_v29, %v4058_v47  ;;  %v4157_v61 = vadd.f32 %v4156_v21, %v4128_v5  ;;  %v4364_v5 = vadd.f32 %v7891_v2, %v4300_v57 }
 0x1c9   :  { %v8071_v44 = vpop.f32.mrf.mxu3 }
 0x1cd   :  { %v4129_v59 = vpop.f32.mrf.mxu0 }
 0x1ce   :  { %v4130_v55 = vadd.f32 %v4129_v59, %v4101_v33 }
 0x1cf   :  { %v4185_v15 = vpop.f32.mrf.mxu2  ;;  %v4158_v28 = vpop.f32.mrf.mxu1 }
 0x1d0   :  { %v4186_v35 = vadd.f32 %v4185_v15, %v4157_v61  ;;  %v4159_v29 = vadd.f32 %v4158_v28, %v4130_v55 }
 0x1d1   :  { %v4214_v4 = vpop.f32.mrf.mxu3 }
 0x1d2   :  { %v4215_v41 = vadd.f32 %v4214_v4, %v4186_v35  ;;  %v4244_v35 = vmax.f32 %v8048_v36, 0.0  ;;  %v4106_v4 = vadd.f32 %v8053_v50, %v7735_v25  ;;  %v4248_v25 = vmax.f32 %v8051_v19, 0.0 }
 0x1d4   :  { %v4237_v51 = vmax.f32 %v4215_v41, 0.0  ;;  %v4304_v41 = vmul.f32 %v7869_v42, %v4240_v16  ;;  %v4308_v16 = vmul.f32 %v7864_v20, %v4244_v35  ;;  %v4312_v19 = vmul.f32 %v7854_v9, %v4248_v25 }
 0x1d5   :  { %v4132_v27 = vpop.f32.mrf.mxu0 }
 0x1d6   :  { %v4301_v47 = vmul.f32 %v7843_v56, %v4237_v51  ;;  %v4133_v46 = vadd.f32 %v4132_v27, %v4104_v48  ;;  %v8186_v56 = vmax.f32 %v7896_v31, %v7900_v11  ;;  %v4368_v53 = vadd.f32 %v7913_v12, %v4304_v41 }
 0x1d7   :  { %v4187_v21 = vpop.f32.mrf.mxu2  ;;  %v4161_v32 = vpop.f32.mrf.mxu1  ;;  %v8188_v41 = vmax.f32 %v7937_v18, %v7941_v3 }
 0x1d8   :  { %v4365_v17 = vadd.f32 %v7891_v2, %v4301_v47  ;;  %v4188_v54 = vadd.f32 %v4187_v21, %v4159_v29  ;;  %v4162_v57 = vadd.f32 %v4161_v32, %v4133_v46 }
 0x1d9   :  { %v4216_v61 = vpop.f32.mrf.mxu3 }
 0x1da   :  { %v4402_v59 = vmax.f32 %v4364_v5, %v4365_v17  ;;  %v4217_v15 = vadd.f32 %v4216_v61, %v4188_v54  ;;  %v4372_v54 = vadd.f32 %v7932_v30, %v4308_v16  ;;  %v4109_v61 = vadd.f32 %v8058_v45, %v7772_v37 }
 0x1db   :  { %v4114_v16 = vadd.f32 %v8066_v0, %v7787_v22 }
 0x1dc   :  { %v4410_v55 = vmax.f32 %v8186_v56, %v4402_v59  ;;  %v4241_v23 = vmax.f32 %v4217_v15, 0.0 }
 0x1dd   :  { %v4134_v28 = vpop.f32.mrf.mxu0 }
 0x1de   :  { %v4305_v33 = vmul.f32 %v7869_v42, %v4241_v23  ;;  %v4135_v29 = vadd.f32 %v4134_v28, %v4106_v4  ;;  %v8187_v42 = vmax.f32 %v7917_v6, %v7921_v14  ;;  %v4376_v28 = vadd.f32 %v7952_v62, %v4312_v19 }
 0x1df   :  { %v4190_v24 = vpop.f32.mrf.mxu2  ;;  %v4163_v2 = vpop.f32.mrf.mxu1 }
 0x1e0   :  { %v4369_v51 = vadd.f32 %v7913_v12, %v4305_v33  ;;  %v4191_v27 = vadd.f32 %v4190_v24, %v4162_v57  ;;  %v4164_v17 = vadd.f32 %v4163_v2, %v4135_v29  ;;  %v4111_v57 = vadd.f32 %v8062_v34, %v7781_v63 }
 0x1e1   :  { %v4219_v47 = vpop.f32.mrf.mxu3 }
 0x1e2   :  { %v4403_v31 = vmax.f32 %v4368_v53, %v4369_v51  ;;  %v4220_v11 = vadd.f32 %v4219_v47, %v4191_v27 }
 0x1e4   :  { %v4411_v21 = vmax.f32 %v8187_v42, %v4403_v31  ;;  %v4245_v32 = vmax.f32 %v4220_v11, 0.0 }
 0x1e5   :  { %v4137_v5 = vpop.f32.mrf.mxu0 }
 0x1e6   :  { %v6279_v48 = vpack.c.bf16 %v4411_v21, %v4410_v55  ;;  %v4309_v36 = vmul.f32 %v7864_v20, %v4245_v32  ;;  %v4138_v46 = vadd.f32 %v4137_v5, %v4109_v61 }
 0x1e7   :  { %v4192_v12 = vpop.f32.mrf.mxu2  ;;  %v4166_v50 = vpop.f32.mrf.mxu1 }
 0x1e8   :  { %6280 = vst [vmem:[%s8164_s3] sm:$0xff] %v6279_v48   ;;  %v4373_v6 = vadd.f32 %v7932_v30, %v4309_v36  ;;  %v4193_v14 = vadd.f32 %v4192_v12, %v4164_v17  ;;  %v4167_v45 = vadd.f32 %v4166_v50, %v4138_v46  ;;  %v4252_v30 = vmax.f32 %v8056_v38, 0.0 }
 0x1e9   :  { %v4221_v59 = vpop.f32.mrf.mxu3  ;;  %v8190_v48 = vmax.f32 %v7976_v1, %v7980_v40  ;;  %v4260_v50 = vmax.f32 %v8064_v8, 0.0 }
 0x1ea   :  { %v4404_v15 = vmax.f32 %v4372_v54, %v4373_v6  ;;  %v4222_v20 = vadd.f32 %v4221_v59, %v4193_v14  ;;  %v4316_v51 = vmul.f32 %v7880_v60, %v4252_v30  ;;  %v4116_v54 = vadd.f32 %v8071_v44, %v7796_v7  ;;  %v8194_v44 = vld [vmem:[#allocation6_spill] sm:$0xff] }
 0x1ec   :  { %v4412_v56 = vmax.f32 %v8188_v41, %v4404_v15  ;;  %v4249_v55 = vmax.f32 %v4222_v20, 0.0  ;;  %v4380_v29 = vadd.f32 %v7971_v58, %v4316_v51  ;;  %v4324_v15 = vmul.f32 %v7885_v10, %v4260_v50  ;;  %v8192_v20 = vld [vmem:[#allocation5_spill] sm:$0xff] }
 0x1ed   :  { %v4139_v23 = vpop.f32.mrf.mxu0 }
 0x1ee   :  { %v4313_v37 = vmul.f32 %v7854_v9, %v4249_v55  ;;  %v4140_v4 = vadd.f32 %v4139_v23, %v4111_v57  ;;  %v8189_v9 = vmax.f32 %v7956_v43, %v7960_v13 }
 0x1ef   :  { %v4195_v33 = vpop.f32.mrf.mxu2  ;;  %v4168_v35 = vpop.f32.mrf.mxu1 }
 0x1f0   :  { %v4377_v53 = vadd.f32 %v7952_v62, %v4313_v37  ;;  %v4196_v24 = vadd.f32 %v4195_v33, %v4167_v45  ;;  %v4169_v63 = vadd.f32 %v4168_v35, %v4140_v4  ;;  %v4256_v62 = vmax.f32 %v8060_v49, 0.0 }
 0x1f1   :  { %v4224_v2 = vpop.f32.mrf.mxu3  ;;  %v4264_v37 = vmax.f32 %v8069_v52, 0.0  ;;  %v8199_v52 = vld [vmem:[#allocation9_spill] sm:$0xff] }
 0x1f2   :  { %v4405_v18 = vmax.f32 %v4376_v28, %v4377_v53  ;;  %v4225_v3 = vadd.f32 %v4224_v2, %v4196_v24  ;;  %v4320_v5 = vmul.f32 %v7875_v39, %v4256_v62  ;;  %v8195_v53 = vld [vmem:[#allocation3_spill] sm:$0xff] }
 0x1f3   :  { %v4328_v24 = vmul.f32 %v8195_v53, %v4264_v37  ;;  %v8196_v2 = vld [vmem:[#allocation7_spill] sm:$0xff] }
 0x1f4   :  { %v4413_v27 = vmax.f32 %v8189_v9, %v4405_v18  ;;  %v4253_v47 = vmax.f32 %v4225_v3, 0.0  ;;  %v4384_v25 = vadd.f32 %v7991_v26, %v4320_v5 }
 0x1f5   :  { %v4142_v31 = vpop.f32.mrf.mxu0  ;;  %v4392_v51 = vadd.f32 %v8199_v52, %v4328_v24 }
 0x1f6   :  { %v6284_v38 = vpack.c.bf16 %v4413_v27, %v4412_v56  ;;  %v4317_v11 = vmul.f32 %v7880_v60, %v4253_v47  ;;  %v4143_v60 = vadd.f32 %v4142_v31, %v4114_v16  ;;  %v8200_v47 = vld [vmem:[#allocation10_spill] sm:$0xff]  ;;  %v8201_v31 = vld [vmem:[#allocation11_spill] sm:$0xff] }
 0x1f7   :  { %v4197_v34 = vpop.f32.mrf.mxu2  ;;  %v4171_v49 = vpop.f32.mrf.mxu1 }
 0x1f8   :  { %6868 = vst [vmem:[%s8164_s3 + $0x8] sm:$0xff] %v6284_v38   ;;  %v4381_v43 = vadd.f32 %v7971_v58, %v4317_v11  ;;  %v4198_v13 = vadd.f32 %v4197_v34, %v4169_v63  ;;  %v4172_v0 = vadd.f32 %v4171_v49, %v4143_v60  ;;  %v8202_v38 = vmax.f32 %v8200_v47, %v8201_v31 }
 0x1f9   :  { %v4226_v42 = vpop.f32.mrf.mxu3 }
 0x1fa   :  { %v4406_v21 = vmax.f32 %v4380_v29, %v4381_v43  ;;  %v4227_v32 = vadd.f32 %v4226_v42, %v4198_v13 }
 0x1fc   :  { %v4414_v36 = vmax.f32 %v8190_v48, %v4406_v21  ;;  %v4257_v17 = vmax.f32 %v4227_v32, 0.0 }
 0x1fd   :  { %v4144_v58 = vpop.f32.mrf.mxu0 }
 0x1fe   :  { %v4321_v22 = vmul.f32 %v7875_v39, %v4257_v17  ;;  %v4145_v40 = vadd.f32 %v4144_v58, %v4116_v54  ;;  %v8191_v39 = vld [vmem:[#allocation4_spill] sm:$0xff] }
 0x1ff   :  { %v4200_v12 = vpop.f32.mrf.mxu2  ;;  %v8193_v46 = vmax.f32 %v8191_v39, %v8192_v20  ;;  %v4173_v56 = vpop.f32.mrf.mxu1 }
 0x200   :  { %v4385_v61 = vadd.f32 %v7991_v26, %v4321_v22  ;;  %v4201_v6 = vadd.f32 %v4200_v12, %v4172_v0  ;;  %v4174_v23 = vadd.f32 %v4173_v56, %v4145_v40  ;;  %v4388_v26 = vadd.f32 %v8194_v44, %v4324_v15 }
 0x201   :  { %v4229_v14 = vpop.f32.mrf.mxu3 }
 0x202   :  { %v4407_v59 = vmax.f32 %v4384_v25, %v4385_v61  ;;  %v4230_v1 = vadd.f32 %v4229_v14, %v4201_v6 }
 0x204   :  { %v4415_v19 = vmax.f32 %v8193_v46, %v4407_v59  ;;  %v4261_v41 = vmax.f32 %v4230_v1, 0.0 }
 0x206   :  { %v6289_v55 = vpack.c.bf16 %v4415_v19, %v4414_v36  ;;  %v4325_v8 = vmul.f32 %v7885_v10, %v4261_v41  ;;  %v8197_v10 = vld [vmem:[#allocation8_spill] sm:$0xff] }
 0x207   :  { %v4202_v7 = vpop.f32.mrf.mxu2  ;;  %v8198_v35 = vmax.f32 %v8196_v2, %v8197_v10 }
 0x208   :  { %6869 = vst [vmem:[%s8164_s3 + $0x10] sm:$0xff] %v6289_v55   ;;  %v4389_v45 = vadd.f32 %v8194_v44, %v4325_v8  ;;  %v4203_v28 = vadd.f32 %v4202_v7, %v4174_v23 }
 0x209   :  { %v4231_v33 = vpop.f32.mrf.mxu3 }
 0x20a   :  { %v4408_v30 = vmax.f32 %v4388_v26, %v4389_v45  ;;  %v4232_v57 = vadd.f32 %v4231_v33, %v4203_v28 }
 0x20c   :  { %v4416_v18 = vmax.f32 %v8198_v35, %v4408_v30  ;;  %v4265_v3 = vmax.f32 %v4232_v57, 0.0 }
 0x20e   :  { %v4329_v4 = vmul.f32 %v8195_v53, %v4265_v3 }
 0x210   :  { %v4393_v9 = vadd.f32 %v8199_v52, %v4329_v4 }
 0x212   :  { %v4409_v27 = vmax.f32 %v4392_v51, %v4393_v9 }
 0x214   :  { %v4417_v11 = vmax.f32 %v8202_v38, %v4409_v27 }
 0x216   :  { %v6294_v63 = vpack.c.bf16 %v4417_v11, %v4416_v18 }
 0x218   :  { %6870 = vst [vmem:[%s8164_s3 + $0x18] sm:$0xff] %v6294_v63  }

// kernel: cnn_forward.7
= control target key start
LH: loop header
LB: loop body
LE: loop exit
PB: predicated region body
PF: predicated region fallthrough
CT: control target
= control target key end

     0   :  { %vm915_vm0 = vcmask 523264   ;;  %s3437_s1 = inlined_call_operand.vmem [shape: bf16[576,512], index: 1, kind: input, shape index: {}]   ;;  %s3438_s0 = inlined_call_operand.vmem [shape: bf16[8,576], index: 0, kind: input, shape index: {}]   ;;  %s3439_s3 = inlined_call_operand.vmem [shape: bf16[512,128], index: 3, kind: input, shape index: {}]   ;;  %s3440_s2 = inlined_call_operand.vmem [shape: f32[1,512], index: 2, kind: input, shape index: {}]   ;;  %s3441_s4 = inlined_call_operand.vmem [shape: f32[1,128], index: 4, kind: input, shape index: {}]   ;;  %s3442_s5 = inlined_call_operand.vmem [shape: f32[8,128], index: 5, kind: output, shape index: {}]  }
   0x1   :  { %v1618_v0 = vld [vmem:[%s3437_s1 + $0xe0] sm:$0xf]  ;;  %v2242_v1 = vld [vmem:[%s3437_s1 + $0xec] sm:$0xf0] }
   0x2   :  { %v1746_v2 = vld [vmem:[%s3437_s1 + $0x1e0] sm:$0xf]  ;;  %v1619_v3 = vor.u32 %v2242_v1, %v1618_v0  ;;  %v2274_v4 = vld [vmem:[%s3437_s1 + $0x1ec] sm:$0xf0] }
   0x3   :  { %v1874_v5 = vld [vmem:[%s3437_s1 + $0x2e0] sm:$0xf]  ;;  %v2306_v6 = vld [vmem:[%s3437_s1 + $0x2ec] sm:$0xf0]  ;;  %v1747_v7 = vor.u32 %v2274_v4, %v1746_v2 }
   0x4   :  { %v1875_v8 = vor.u32 %v2306_v6, %v1874_v5  ;;  %v2002_v9 = vld [vmem:[%s3437_s1 + $0x3e0] sm:$0xf]  ;;  %v2338_v10 = vld [vmem:[%s3437_s1 + $0x3ec] sm:$0xf0]  ;;  %919 = vmatpush.bf16.msra.mxu0 %v1619_v3 }
   0x5   :  { %v1602_v11 = vld [vmem:[%s3437_s1 + $0xc0] sm:$0xf]  ;;  %v2003_v12 = vor.u32 %v2338_v10, %v2002_v9  ;;  %v2238_v13 = vld [vmem:[%s3437_s1 + $0xcc] sm:$0xf0]  ;;  %932 = vmatpush.bf16.msra.mxu1 %v1747_v7 }
   0x6   :  { %v1730_v14 = vld [vmem:[%s3437_s1 + $0x1c0] sm:$0xf]  ;;  %v2270_v15 = vld [vmem:[%s3437_s1 + $0x1cc] sm:$0xf0]  ;;  %945 = vmatpush.bf16.msra.mxu2 %v1875_v8  ;;  %v1603_v16 = vor.u32 %v2238_v13, %v1602_v11 }
   0x7   :  { %v1731_v17 = vor.u32 %v2270_v15, %v1730_v14  ;;  %v1858_v18 = vld [vmem:[%s3437_s1 + $0x2c0] sm:$0xf]  ;;  %v2302_v19 = vld [vmem:[%s3437_s1 + $0x2cc] sm:$0xf0]  ;;  %958 = vmatpush.bf16.msra.mxu3 %v2003_v12 }
   0x8   :  { %v1986_v20 = vld [vmem:[%s3437_s1 + $0x3c0] sm:$0xf]  ;;  %v1859_v21 = vor.u32 %v2302_v19, %v1858_v18  ;;  %v2334_v22 = vld [vmem:[%s3437_s1 + $0x3cc] sm:$0xf0]  ;;  %920 = vmatpush.bf16.msra.mxu0 %v1603_v16 }
   0x9   :  { %v1586_v23 = vld [vmem:[%s3437_s1 + $0xa0] sm:$0xf]  ;;  %v2234_v24 = vld [vmem:[%s3437_s1 + $0xac] sm:$0xf0]  ;;  %v1987_v25 = vor.u32 %v2334_v22, %v1986_v20  ;;  %933 = vmatpush.bf16.msra.mxu1 %v1731_v17 }
   0xa   :  { %v1714_v26 = vld [vmem:[%s3437_s1 + $0x1a0] sm:$0xf]  ;;  %v2266_v27 = vld [vmem:[%s3437_s1 + $0x1ac] sm:$0xf0]  ;;  %v1587_v29 = vor.u32 %v2234_v24, %v1586_v23  ;;  %946 = vmatpush.bf16.msra.mxu2 %v1859_v21 }
   0xb   :  { %v1842_v28 = vld [vmem:[%s3437_s1 + $0x2a0] sm:$0xf]  ;;  %v2298_v30 = vld [vmem:[%s3437_s1 + $0x2ac] sm:$0xf0]  ;;  %v1715_v33 = vor.u32 %v2266_v27, %v1714_v26  ;;  %959 = vmatpush.bf16.msra.mxu3 %v1987_v25 }
   0xc   :  { %v1970_v31 = vld [vmem:[%s3437_s1 + $0x3a0] sm:$0xf]  ;;  %v2330_v32 = vld [vmem:[%s3437_s1 + $0x3ac] sm:$0xf0]  ;;  %v1843_v34 = vor.u32 %v2298_v30, %v1842_v28  ;;  %921 = vmatpush.bf16.msra.mxu0 %v1587_v29 }
   0xd   :  { %v1570_v35 = vld [vmem:[%s3437_s1 + $0x80] sm:$0xf]  ;;  %v2230_v36 = vld [vmem:[%s3437_s1 + $0x8c] sm:$0xf0]  ;;  %v1971_v38 = vor.u32 %v2330_v32, %v1970_v31  ;;  %934 = vmatpush.bf16.msra.mxu1 %v1715_v33  ;;  %v2240_v31 = vld [vmem:[%s3437_s1 + $0xe4] sm:$0xf] }
   0xe   :  { %v1698_v37 = vld [vmem:[%s3437_s1 + $0x180] sm:$0xf]  ;;  %v2262_v39 = vld [vmem:[%s3437_s1 + $0x18c] sm:$0xf0]  ;;  %v1571_v44 = vor.u32 %v2230_v36, %v1570_v35  ;;  %947 = vmatpush.bf16.msra.mxu2 %v1843_v34  ;;  %v1620_v32 = vld [vmem:[%s3437_s1 + $0xf0] sm:$0xf0] }
   0xf   :  { %v1826_v40 = vld [vmem:[%s3437_s1 + $0x280] sm:$0xf]  ;;  %v2294_v41 = vld [vmem:[%s3437_s1 + $0x28c] sm:$0xf0]  ;;  %v1699_v45 = vor.u32 %v2262_v39, %v1698_v37  ;;  %960 = vmatpush.bf16.msra.mxu3 %v1971_v38  ;;  %v2272_v34 = vld [vmem:[%s3437_s1 + $0x1e4] sm:$0xf] }
  0x10   :  { %v1954_v42 = vld [vmem:[%s3437_s1 + $0x380] sm:$0xf]  ;;  %v2326_v43 = vld [vmem:[%s3437_s1 + $0x38c] sm:$0xf0]  ;;  %v1827_v46 = vor.u32 %v2294_v41, %v1826_v40  ;;  %922 = vmatpush.bf16.msra.mxu0 %v1571_v44  ;;  %v1748_v35 = vld [vmem:[%s3437_s1 + $0x1f0] sm:$0xf0] }
  0x11   :  { %v1554_v47 = vld [vmem:[%s3437_s1 + $0x60] sm:$0xf]  ;;  %v2226_v48 = vld [vmem:[%s3437_s1 + $0x6c] sm:$0xf0]  ;;  %v1955_v50 = vor.u32 %v2326_v43, %v1954_v42  ;;  %935 = vmatpush.bf16.msra.mxu1 %v1699_v45  ;;  %v22_v37 = vld [vmem:[%s3438_s0 + $0x8] sm:$0xff] }
  0x12   :  { %v1682_v49 = vld [vmem:[%s3437_s1 + $0x160] sm:$0xf]  ;;  %v2258_v51 = vld [vmem:[%s3437_s1 + $0x16c] sm:$0xf0]  ;;  %v1555_v56 = vor.u32 %v2226_v48, %v1554_v47  ;;  %948 = vmatpush.bf16.msra.mxu2 %v1827_v46  ;;  %v2304_v40 = vld [vmem:[%s3437_s1 + $0x2e4] sm:$0xf]  ;;  %v183_v42 = vunpack.c.l.b16 %v22_v37  ;;  %v184_v43 = vunpack.c.h.b16 %v22_v37  ;;  %v1623_v47 = vor.u32 %v2240_v31, %v1620_v32 }
  0x13   :  { %v1810_v52 = vld [vmem:[%s3437_s1 + $0x260] sm:$0xf]  ;;  %v2290_v53 = vld [vmem:[%s3437_s1 + $0x26c] sm:$0xf0]  ;;  %v1683_v57 = vor.u32 %v2258_v51, %v1682_v49  ;;  %961 = vmatpush.bf16.msra.mxu3 %v1955_v50  ;;  %v1876_v41 = vld [vmem:[%s3437_s1 + $0x2f0] sm:$0xf0]  ;;  %v1751_v48 = vor.u32 %v2272_v34, %v1748_v35 }
  0x14   :  { %v1938_v54 = vld [vmem:[%s3437_s1 + $0x360] sm:$0xf]  ;;  %v2322_v55 = vld [vmem:[%s3437_s1 + $0x36c] sm:$0xf0]  ;;  %v1811_v58 = vor.u32 %v2290_v53, %v1810_v52  ;;  %923 = vmatpush.bf16.msra.mxu0 %v1555_v56  ;;  %v2236_v51 = vld [vmem:[%s3437_s1 + $0xc4] sm:$0xf]  ;;  %v1879_v52 = vor.u32 %v2304_v40, %v1876_v41 }
  0x15   :  { %v1538_v59 = vld [vmem:[%s3437_s1 + $0x40] sm:$0xf]  ;;  %v2222_v60 = vld [vmem:[%s3437_s1 + $0x4c] sm:$0xf0]  ;;  %v1939_v62 = vor.u32 %v2322_v55, %v1938_v54  ;;  %936 = vmatpush.bf16.msra.mxu1 %v1683_v57  ;;  %v1604_v54 = vld [vmem:[%s3437_s1 + $0xd0] sm:$0xf0] }
  0x16   :  { %v1666_v61 = vld [vmem:[%s3437_s1 + $0x140] sm:$0xf]  ;;  %v2254_v63 = vld [vmem:[%s3437_s1 + $0x14c] sm:$0xf0]  ;;  %v1539_v4 = vor.u32 %v2222_v60, %v1538_v59  ;;  %949 = vmatpush.bf16.msra.mxu2 %v1811_v58  ;;  %v2268_v55 = vld [vmem:[%s3437_s1 + $0x1c4] sm:$0xf]  ;;  %v2667_v59 = vpack.c.b16 %v183_v42, %v183_v42  ;;  %v2669_v60 = vpack.c.b16 %v184_v43, %v184_v43 }
  0x17   :  { %v1794_v0 = vld [vmem:[%s3437_s1 + $0x240] sm:$0xf]  ;;  %v2286_v1 = vld [vmem:[%s3437_s1 + $0x24c] sm:$0xf0]  ;;  %v1667_v5 = vor.u32 %v2254_v63, %v1666_v61  ;;  %962 = vmatpush.bf16.msra.mxu3 %v1939_v62  ;;  %v1732_v56 = vld [vmem:[%s3437_s1 + $0x1d0] sm:$0xf0]  ;;  %v1607_v63 = vor.u32 %v2236_v51, %v1604_v54 }
  0x18   :  { %v1922_v2 = vld [vmem:[%s3437_s1 + $0x340] sm:$0xf]  ;;  %v2318_v3 = vld [vmem:[%s3437_s1 + $0x34c] sm:$0xf0]  ;;  %v1795_v6 = vor.u32 %v2286_v1, %v1794_v0  ;;  %924 = vmatpush.bf16.msra.mxu0 %v1539_v4  ;;  %v2300_v57 = vld [vmem:[%s3437_s1 + $0x2c4] sm:$0xf]  ;;  %v1735_v0 = vor.u32 %v2268_v55, %v1732_v56 }
  0x19   :  { %v1522_v7 = vld [vmem:[%s3437_s1 + $0x20] sm:$0xf]  ;;  %v2218_v8 = vld [vmem:[%s3437_s1 + $0x2c] sm:$0xf0]  ;;  %v1923_v10 = vor.u32 %v2318_v3, %v1922_v2  ;;  %937 = vmatpush.bf16.msra.mxu1 %v1667_v5  ;;  %v1860_v58 = vld [vmem:[%s3437_s1 + $0x2d0] sm:$0xf0] }
  0x1a   :  { %v1650_v9 = vld [vmem:[%s3437_s1 + $0x120] sm:$0xf]  ;;  %v2250_v11 = vld [vmem:[%s3437_s1 + $0x12c] sm:$0xf0]  ;;  %v1523_v17 = vor.u32 %v2218_v8, %v1522_v7  ;;  %950 = vmatpush.bf16.msra.mxu2 %v1795_v6  ;;  %v2232_v3 = vld [vmem:[%s3437_s1 + $0xa4] sm:$0xf]  ;;  %v1863_v4 = vor.u32 %v2300_v57, %v1860_v58 }
  0x1b   :  { %v1778_v12 = vld [vmem:[%s3437_s1 + $0x220] sm:$0xf]  ;;  %v2282_v13 = vld [vmem:[%s3437_s1 + $0x22c] sm:$0xf0]  ;;  %v1651_v21 = vor.u32 %v2250_v11, %v1650_v9  ;;  %963 = vmatpush.bf16.msra.mxu3 %v1923_v10  ;;  %v1588_v5 = vld [vmem:[%s3437_s1 + $0xb0] sm:$0xf0] }
  0x1c   :  { %v1906_v14 = vld [vmem:[%s3437_s1 + $0x320] sm:$0xf]  ;;  %v2314_v15 = vld [vmem:[%s3437_s1 + $0x32c] sm:$0xf0]  ;;  %v1779_v22 = vor.u32 %v2282_v13, %v1778_v12  ;;  %925 = vmatpush.bf16.msra.mxu0 %v1523_v17  ;;  %v2264_v6 = vld [vmem:[%s3437_s1 + $0x1a4] sm:$0xf]  ;;  %v1591_v12 = vor.u32 %v2232_v3, %v1588_v5 }
  0x1d   :  { %v1506_v16 = vld [vmem:[%s3437_s1] sm:$0xf]  ;;  %v2214_v18 = vld [vmem:[%s3437_s1 + $0xc] sm:$0xf0]  ;;  %v1907_v26 = vor.u32 %v2314_v15, %v1906_v14  ;;  %938 = vmatpush.bf16.msra.mxu1 %v1651_v21  ;;  %v1716_v7 = vld [vmem:[%s3437_s1 + $0x1b0] sm:$0xf0] }
  0x1e   :  { %v1634_v19 = vld [vmem:[%s3437_s1 + $0x100] sm:$0xf]  ;;  %v2246_v20 = vld [vmem:[%s3437_s1 + $0x10c] sm:$0xf0]  ;;  %v1507_v33 = vor.u32 %v2214_v18, %v1506_v16  ;;  %951 = vmatpush.bf16.msra.mxu2 %v1779_v22  ;;  %v2296_v8 = vld [vmem:[%s3437_s1 + $0x2a4] sm:$0xf]  ;;  %v1719_v13 = vor.u32 %v2264_v6, %v1716_v7 }
  0x1f   :  { %v1762_v23 = vld [vmem:[%s3437_s1 + $0x200] sm:$0xf]  ;;  %v2278_v24 = vld [vmem:[%s3437_s1 + $0x20c] sm:$0xf0]  ;;  %v1635_v38 = vor.u32 %v2246_v20, %v1634_v19  ;;  %964 = vmatpush.bf16.msra.mxu3 %v1907_v26  ;;  %v1844_v9 = vld [vmem:[%s3437_s1 + $0x2b0] sm:$0xf0] }
  0x20   :  { %v21_v25 = vld [vmem:[%s3438_s0] sm:$0xff]  ;;  %v2310_v28 = vld [vmem:[%s3437_s1 + $0x30c] sm:$0xf0]  ;;  %v1763_v39 = vor.u32 %v2278_v24, %v1762_v23  ;;  %926 = vmatpush.bf16.msra.mxu0 %v1507_v33  ;;  %v1572_v16 = vld [vmem:[%s3437_s1 + $0x90] sm:$0xf0]  ;;  %v1847_v17 = vor.u32 %v2296_v8, %v1844_v9 }
  0x21   :  { %v1890_v27 = vld [vmem:[%s3437_s1 + $0x300] sm:$0xf]  ;;  %v2354_v30 = vld [vmem:[%s3437_s1 + $0x46c] sm:$0xf0]  ;;  %v181_v36 = vunpack.c.l.b16 %v21_v25  ;;  %v182_v46 = vunpack.c.h.b16 %v21_v25  ;;  %939 = vmatpush.bf16.msra.mxu1 %v1635_v38  ;;  %v2228_v15 = vld [vmem:[%s3437_s1 + $0x84] sm:$0xf] }
  0x22   :  { %v2066_v29 = vld [vmem:[%s3437_s1 + $0x460] sm:$0xf]  ;;  %v1891_v44 = vor.u32 %v2310_v28, %v1890_v27  ;;  %v2350_v50 = vld [vmem:[%s3437_s1 + $0x44c] sm:$0xf0]  ;;  %952 = vmatpush.bf16.msra.mxu2 %v1763_v39  ;;  %v2260_v18 = vld [vmem:[%s3437_s1 + $0x184] sm:$0xf]  ;;  %v1575_v26 = vor.u32 %v2228_v15, %v1572_v16 }
  0x23   :  { %v2067_v45 = vor.u32 %v2354_v30, %v2066_v29  ;;  %v2050_v49 = vld [vmem:[%s3437_s1 + $0x440] sm:$0xf]  ;;  %v2650_v53 = vpack.c.b16 %v181_v36, %v181_v36  ;;  %v2671_v62 = vpack.c.b16 %v182_v46, %v182_v46  ;;  %v2346_v2 = vld [vmem:[%s3437_s1 + $0x42c] sm:$0xf0]  ;;  %v1700_v19 = vld [vmem:[%s3437_s1 + $0x190] sm:$0xf0] }
  0x24   :  { %965 = vmatpush.bf16.msra.mxu3 %v1891_v44  ;;  %v2051_v61 = vor.u32 %v2350_v50, %v2050_v49  ;;  %v2034_v1 = vld [vmem:[%s3437_s1 + $0x420] sm:$0xf]  ;;  %v2342_v14 = vld [vmem:[%s3437_s1 + $0x40c] sm:$0xf0]  ;;  %v2292_v20 = vld [vmem:[%s3437_s1 + $0x284] sm:$0xf]  ;;  %v1703_v27 = vor.u32 %v2260_v18, %v1700_v19 }
  0x25   :  { %975 = vmatpush.bf16.msrb.mxu0 %v2067_v45  ;;  %984 = vmatpush.bf16.msrb.mxu1 %v1623_v47  ;;  %v2035_v10 = vor.u32 %v2346_v2, %v2034_v1  ;;  %v2018_v11 = vld [vmem:[%s3437_s1 + $0x400] sm:$0xf]  ;;  %v1828_v21 = vld [vmem:[%s3437_s1 + $0x290] sm:$0xf0]  ;;  %v2336_v22 = vld [vmem:[%s3437_s1 + $0x3e4] sm:$0xf] }
  0x26   :  { %997 = vmatpush.bf16.msrb.mxu2 %v1751_v48  ;;  %927 = vmatmul.bf16.vlgmr.msra.gmra.mxu0 %v2650_v53  ;;  %v2004_v23 = vld [vmem:[%s3437_s1 + $0x3f0] sm:$0xf0]  ;;  %v2019_v24 = vor.u32 %v2342_v14, %v2018_v11  ;;  %v23_v25 = vld [vmem:[%s3438_s0 + $0x10] sm:$0xf]  ;;  %v2224_v28 = vld [vmem:[%s3437_s1 + $0x64] sm:$0xf]  ;;  %v1831_v30 = vor.u32 %v2292_v20, %v1828_v21 }
  0x27   :  { %953 = vmatmul.bf16.vlgmr.msra.gmra.mxu2 %v2667_v59  ;;  %966 = vmatmul.bf16.vlgmr.msra.gmra.mxu3 %v2669_v60  ;;  %v1556_v29 = vld [vmem:[%s3437_s1 + $0x70] sm:$0xf0]  ;;  %v2007_v31 = vor.u32 %v2336_v22, %v2004_v23  ;;  %v2256_v32 = vld [vmem:[%s3437_s1 + $0x164] sm:$0xf]  ;;  %v185_v38 = vunpack.c.l.b16 %v23_v25  ;;  %v1626_v18 = vld [vmem:[%s3437_s1 + $0xe8] sm:$0xf] }
  0x28   :  { %1010 = vmatpush.bf16.msrb.mxu3 %v1879_v52  ;;  %940 = vmatmul.bf16.vlgmr.msra.gmra.mxu1 %v2671_v62  ;;  %v1684_v33 = vld [vmem:[%s3437_s1 + $0x170] sm:$0xf0]  ;;  %v2288_v34 = vld [vmem:[%s3437_s1 + $0x264] sm:$0xf]  ;;  %v1559_v39 = vor.u32 %v2224_v28, %v1556_v29  ;;  %v2243_v19 = vld [vmem:[%s3437_s1 + $0xf4] sm:$0xf0] }
  0x29   :  { %976 = vmatpush.bf16.msrb.mxu0 %v2051_v61  ;;  %985 = vmatpush.bf16.msrb.mxu1 %v1607_v63  ;;  %v1812_v35 = vld [vmem:[%s3437_s1 + $0x270] sm:$0xf0]  ;;  %v2332_v36 = vld [vmem:[%s3437_s1 + $0x3c4] sm:$0xf]  ;;  %v1687_v40 = vor.u32 %v2256_v32, %v1684_v33  ;;  %v2773_v48 = vpack.c.b16 %v185_v38, %v185_v38  ;;  %v1754_v22 = vld [vmem:[%s3437_s1 + $0x1e8] sm:$0xf] }
  0x2a   :  { %998 = vmatpush.bf16.msrb.mxu2 %v1735_v0  ;;  %v1988_v37 = vld [vmem:[%s3437_s1 + $0x3d0] sm:$0xf0]  ;;  %v2220_v41 = vld [vmem:[%s3437_s1 + $0x44] sm:$0xf]  ;;  %v1815_v43 = vor.u32 %v2288_v34, %v1812_v35  ;;  %v2275_v23 = vld [vmem:[%s3437_s1 + $0x1f4] sm:$0xf0] }
  0x2b   :  { %v1540_v42 = vld [vmem:[%s3437_s1 + $0x50] sm:$0xf0]  ;;  %v1991_v44 = vor.u32 %v2332_v36, %v1988_v37  ;;  %v2252_v45 = vld [vmem:[%s3437_s1 + $0x144] sm:$0xf]  ;;  %v1610_v33 = vld [vmem:[%s3437_s1 + $0xc8] sm:$0xf] }
  0x2c   :  { %1011 = vmatpush.bf16.msrb.mxu3 %v1863_v4  ;;  %v1668_v46 = vld [vmem:[%s3437_s1 + $0x150] sm:$0xf0]  ;;  %v2284_v47 = vld [vmem:[%s3437_s1 + $0x244] sm:$0xf]  ;;  %v1543_v52 = vor.u32 %v2220_v41, %v1540_v42  ;;  %v2239_v34 = vld [vmem:[%s3437_s1 + $0xd4] sm:$0xf0] }
  0x2d   :  { %977 = vmatpush.bf16.msrb.mxu0 %v2035_v10  ;;  %986 = vmatpush.bf16.msrb.mxu1 %v1591_v12  ;;  %v1796_v49 = vld [vmem:[%s3437_s1 + $0x250] sm:$0xf0]  ;;  %v2328_v50 = vld [vmem:[%s3437_s1 + $0x3a4] sm:$0xf]  ;;  %v1671_v54 = vor.u32 %v2252_v45, %v1668_v46  ;;  %v1738_v35 = vld [vmem:[%s3437_s1 + $0x1c8] sm:$0xf] }
  0x2e   :  { %999 = vmatpush.bf16.msrb.mxu2 %v1719_v13  ;;  %v1972_v51 = vld [vmem:[%s3437_s1 + $0x3b0] sm:$0xf0]  ;;  %v2216_v55 = vld [vmem:[%s3437_s1 + $0x24] sm:$0xf]  ;;  %v1799_v57 = vor.u32 %v2284_v47, %v1796_v49  ;;  %v2271_v36 = vld [vmem:[%s3437_s1 + $0x1d4] sm:$0xf0] }
  0x2f   :  { %v1524_v56 = vld [vmem:[%s3437_s1 + $0x30] sm:$0xf0]  ;;  %v1975_v58 = vor.u32 %v2328_v50, %v1972_v51  ;;  %v2248_v61 = vld [vmem:[%s3437_s1 + $0x124] sm:$0xf]  ;;  %v1594_v45 = vld [vmem:[%s3437_s1 + $0xa8] sm:$0xf] }
  0x30   :  { %1012 = vmatpush.bf16.msrb.mxu3 %v1847_v17  ;;  %v1652_v63 = vld [vmem:[%s3437_s1 + $0x130] sm:$0xf0]  ;;  %v2280_v0 = vld [vmem:[%s3437_s1 + $0x224] sm:$0xf]  ;;  %v1527_v4 = vor.u32 %v2216_v55, %v1524_v56  ;;  %v2235_v46 = vld [vmem:[%s3437_s1 + $0xb4] sm:$0xf0] }
  0x31   :  { %978 = vmatpush.bf16.msrb.mxu0 %v2019_v24  ;;  %987 = vmatpush.bf16.msrb.mxu1 %v1575_v26  ;;  %v1780_v1 = vld [vmem:[%s3437_s1 + $0x230] sm:$0xf0]  ;;  %v2324_v2 = vld [vmem:[%s3437_s1 + $0x384] sm:$0xf]  ;;  %v1655_v5 = vor.u32 %v2248_v61, %v1652_v63  ;;  %v1722_v47 = vld [vmem:[%s3437_s1 + $0x1a8] sm:$0xf] }
  0x32   :  { %1000 = vmatpush.bf16.msrb.mxu2 %v1703_v27  ;;  %v1956_v3 = vld [vmem:[%s3437_s1 + $0x390] sm:$0xf0]  ;;  %v2212_v6 = vld [vmem:[%s3437_s1 + $0x4] sm:$0xf]  ;;  %v1783_v9 = vor.u32 %v2280_v0, %v1780_v1  ;;  %v1627_v27 = vor.u32 %v2243_v19, %v1626_v18  ;;  %v2267_v49 = vld [vmem:[%s3437_s1 + $0x1b4] sm:$0xf0] }
  0x33   :  { %v1508_v7 = vld [vmem:[%s3437_s1 + $0x10] sm:$0xf0]  ;;  %v2244_v8 = vld [vmem:[%s3437_s1 + $0x104] sm:$0xf]  ;;  %v1959_v10 = vor.u32 %v2324_v2, %v1956_v3  ;;  %v1578_v61 = vld [vmem:[%s3437_s1 + $0x88] sm:$0xf] }
  0x34   :  { %1013 = vmatpush.bf16.msrb.mxu3 %v1831_v30  ;;  %v1636_v11 = vld [vmem:[%s3437_s1 + $0x110] sm:$0xf0]  ;;  %v2276_v12 = vld [vmem:[%s3437_s1 + $0x204] sm:$0xf]  ;;  %v1511_v20 = vor.u32 %v2212_v6, %v1508_v7  ;;  %v2231_v63 = vld [vmem:[%s3437_s1 + $0x94] sm:$0xf0] }
  0x35   :  { %1023 = vmatpush.bf16.msra.mxu0 %v2007_v31  ;;  %988 = vmatpush.bf16.msrb.mxu1 %v1559_v39  ;;  %v1764_v13 = vld [vmem:[%s3437_s1 + $0x210] sm:$0xf0]  ;;  %v2320_v14 = vld [vmem:[%s3437_s1 + $0x364] sm:$0xf]  ;;  %v1639_v21 = vor.u32 %v2244_v8, %v1636_v11  ;;  %v1755_v31 = vor.u32 %v2275_v23, %v1754_v22  ;;  %v1611_v39 = vor.u32 %v2239_v34, %v1610_v33  ;;  %v1706_v0 = vld [vmem:[%s3437_s1 + $0x188] sm:$0xf] }
  0x36   :  { %1001 = vmatpush.bf16.msrb.mxu2 %v1687_v40  ;;  %2080 = vmatmul.msk.bf16.vlgmr.msrb.gmra.mxu0 %vm915_vm0, %v2773_v48  ;;  %v1940_v15 = vld [vmem:[%s3437_s1 + $0x370] sm:$0xf0]  ;;  %v2352_v16 = vld [vmem:[%s3437_s1 + $0x464] sm:$0xf]  ;;  %v1767_v24 = vor.u32 %v2276_v12, %v1764_v13  ;;  %v2263_v1 = vld [vmem:[%s3437_s1 + $0x194] sm:$0xf0]  ;;  %v1579_v8 = vor.u32 %v2231_v63, %v1578_v61 }
  0x37   :  { %v2068_v17 = vld [vmem:[%s3437_s1 + $0x470] sm:$0xf0]  ;;  %v1943_v25 = vor.u32 %v2320_v14, %v1940_v15  ;;  %v2316_v28 = vld [vmem:[%s3437_s1 + $0x344] sm:$0xf]  ;;  %v1882_v2 = vld [vmem:[%s3437_s1 + $0x2e8] sm:$0xf] }
  0x38   :  { %1014 = vmatpush.bf16.msrb.mxu3 %v1815_v43  ;;  %v2071_v26 = vor.u32 %v2352_v16, %v2068_v17  ;;  %v1924_v29 = vld [vmem:[%s3437_s1 + $0x350] sm:$0xf0]  ;;  %v2348_v30 = vld [vmem:[%s3437_s1 + $0x444] sm:$0xf]  ;;  %v1739_v43 = vor.u32 %v2271_v36, %v1738_v35  ;;  %v2307_v3 = vld [vmem:[%s3437_s1 + $0x2f4] sm:$0xf0] }
  0x39   :  { %1024 = vmatpush.bf16.msra.mxu0 %v1991_v44  ;;  %989 = vmatpush.bf16.msrb.mxu1 %v1543_v52  ;;  %v2052_v32 = vld [vmem:[%s3437_s1 + $0x450] sm:$0xf0]  ;;  %v1927_v37 = vor.u32 %v2316_v28, %v1924_v29  ;;  %v2312_v40 = vld [vmem:[%s3437_s1 + $0x324] sm:$0xf]  ;;  %v2339_v6 = vld [vmem:[%s3437_s1 + $0x3f4] sm:$0xf0] }
  0x3a   :  { %1002 = vmatpush.bf16.msrb.mxu2 %v1671_v54  ;;  %v2055_v38 = vor.u32 %v2348_v30, %v2052_v32  ;;  %v1908_v41 = vld [vmem:[%s3437_s1 + $0x330] sm:$0xf0]  ;;  %v2344_v42 = vld [vmem:[%s3437_s1 + $0x424] sm:$0xf]  ;;  %v1595_v54 = vor.u32 %v2235_v46, %v1594_v45  ;;  %v1562_v11 = vld [vmem:[%s3437_s1 + $0x68] sm:$0xf] }
  0x3b   :  { %v2036_v44 = vld [vmem:[%s3437_s1 + $0x430] sm:$0xf0]  ;;  %v1911_v50 = vor.u32 %v2312_v40, %v1908_v41  ;;  %v2308_v51 = vld [vmem:[%s3437_s1 + $0x304] sm:$0xf]  ;;  %v2227_v12 = vld [vmem:[%s3437_s1 + $0x74] sm:$0xf0] }
  0x3c   :  { %1015 = vmatpush.bf16.msrb.mxu3 %v1799_v57  ;;  %v2039_v52 = vor.u32 %v2344_v42, %v2036_v44  ;;  %v1892_v55 = vld [vmem:[%s3437_s1 + $0x310] sm:$0xf0]  ;;  %v2340_v56 = vld [vmem:[%s3437_s1 + $0x404] sm:$0xf]  ;;  %v1690_v13 = vld [vmem:[%s3437_s1 + $0x168] sm:$0xf] }
  0x3d   :  { %1025 = vmatpush.bf16.msra.mxu0 %v1975_v58  ;;  %990 = vmatpush.bf16.msrb.mxu1 %v1527_v4  ;;  %v2020_v57 = vld [vmem:[%s3437_s1 + $0x410] sm:$0xf0]  ;;  %v1723_v58 = vor.u32 %v2267_v49, %v1722_v47  ;;  %v1895_v4 = vor.u32 %v2308_v51, %v1892_v55  ;;  %v2259_v15 = vld [vmem:[%s3437_s1 + $0x174] sm:$0xf0]  ;;  %v1866_v16 = vld [vmem:[%s3437_s1 + $0x2c8] sm:$0xf] }
  0x3e   :  { %1003 = vmatpush.bf16.msrb.mxu2 %v1655_v5  ;;  %v2010_v5 = vld [vmem:[%s3437_s1 + $0x3e8] sm:$0xf]  ;;  %v2023_v7 = vor.u32 %v2340_v56, %v2020_v57  ;;  %v2303_v17 = vld [vmem:[%s3437_s1 + $0x2d4] sm:$0xf0] }
  0x3f   :  { %v2011_v14 = vor.u32 %v2339_v6, %v2010_v5  ;;  %v1994_v18 = vld [vmem:[%s3437_s1 + $0x3c8] sm:$0xf]  ;;  %v2335_v19 = vld [vmem:[%s3437_s1 + $0x3d4] sm:$0xf0]  ;;  %v1867_v22 = vor.u32 %v2303_v17, %v1866_v16 }
  0x40   :  { %1016 = vmatpush.bf16.msrb.mxu3 %v1783_v9  ;;  %v1707_v9 = vor.u32 %v2263_v1, %v1706_v0  ;;  %v1546_v23 = vld [vmem:[%s3437_s1 + $0x48] sm:$0xf]  ;;  %v2299_v29 = vld [vmem:[%s3437_s1 + $0x2b4] sm:$0xf0]  ;;  %v2241_v0 = vld [vmem:[%s3437_s1 + $0xec] sm:$0xf] }
  0x41   :  { %1026 = vmatpush.bf16.msra.mxu0 %v1959_v10  ;;  %991 = vmatpush.bf16.msrb.mxu1 %v1511_v20  ;;  %v1883_v10 = vor.u32 %v2307_v3, %v1882_v2  ;;  %v1563_v20 = vor.u32 %v2227_v12, %v1562_v11  ;;  %v1850_v28 = vld [vmem:[%s3437_s1 + $0x2a8] sm:$0xf]  ;;  %v2219_v36 = vld [vmem:[%s3437_s1 + $0x34] sm:$0xf0]  ;;  %v1628_v1 = vld [vmem:[%s3437_s1 + $0xf8] sm:$0xf0] }
  0x42   :  { %1004 = vmatpush.bf16.msrb.mxu2 %v1639_v21  ;;  %v1691_v21 = vor.u32 %v2259_v15, %v1690_v13  ;;  %v1978_v30 = vld [vmem:[%s3437_s1 + $0x3a8] sm:$0xf]  ;;  %v1851_v34 = vor.u32 %v2299_v29, %v1850_v28  ;;  %v2295_v41 = vld [vmem:[%s3437_s1 + $0x294] sm:$0xf0]  ;;  %v2237_v13 = vld [vmem:[%s3437_s1 + $0xcc] sm:$0xf] }
  0x43   :  { %v1530_v35 = vld [vmem:[%s3437_s1 + $0x28] sm:$0xf]  ;;  %v2215_v49 = vld [vmem:[%s3437_s1 + $0x14] sm:$0xf0] }
  0x44   :  { %1017 = vmatpush.bf16.msrb.mxu3 %v1767_v24  ;;  %992 = vmatmul.bf16.vlgmr.msrb.gmra.mxu1 %v2650_v53  ;;  %v2223_v24 = vld [vmem:[%s3437_s1 + $0x54] sm:$0xf0]  ;;  %v1834_v40 = vld [vmem:[%s3437_s1 + $0x288] sm:$0xf]  ;;  %v1531_v44 = vor.u32 %v2219_v36, %v1530_v35 }
  0x45   :  { %1027 = vmatpush.bf16.msra.mxu0 %v1943_v25  ;;  %1040 = vmatpush.bf16.msra.mxu1 %v2071_v26  ;;  %v1674_v25 = vld [vmem:[%s3437_s1 + $0x148] sm:$0xf]  ;;  %v1995_v26 = vor.u32 %v2335_v19, %v1994_v18  ;;  %v1547_v32 = vor.u32 %v2223_v24, %v1546_v23  ;;  %v1835_v47 = vor.u32 %v2295_v41, %v1834_v40  ;;  %v2247_v51 = vld [vmem:[%s3437_s1 + $0x114] sm:$0xf0]  ;;  %v1756_v40 = vld [vmem:[%s3437_s1 + $0x1f8] sm:$0xf0] }
  0x46   :  { %1049 = vmatpush.bf16.msra.mxu2 %v1627_v27  ;;  %v2255_v27 = vld [vmem:[%s3437_s1 + $0x154] sm:$0xf0]  ;;  %v1962_v42 = vld [vmem:[%s3437_s1 + $0x388] sm:$0xf]  ;;  %v2305_v41 = vld [vmem:[%s3437_s1 + $0x2ec] sm:$0xf] }
  0x47   :  { %1005 = vmatmul.bf16.vlgmr.msrb.gmra.mxu2 %v2671_v62  ;;  %1018 = vmatmul.bf16.vlgmr.msrb.gmra.mxu3 %v2667_v59  ;;  %v1675_v33 = vor.u32 %v2255_v27, %v1674_v25  ;;  %v1514_v45 = vld [vmem:[%s3437_s1 + $0x8] sm:$0xf]  ;;  %v2291_v55 = vld [vmem:[%s3437_s1 + $0x274] sm:$0xf0]  ;;  %v2233_v25 = vld [vmem:[%s3437_s1 + $0xac] sm:$0xf] }
  0x48   :  { %1062 = vmatpush.bf16.msra.mxu3 %v1755_v31  ;;  %v2331_v31 = vld [vmem:[%s3437_s1 + $0x3b4] sm:$0xf0]  ;;  %v1946_v56 = vld [vmem:[%s3437_s1 + $0x368] sm:$0xf]  ;;  %v1515_v63 = vor.u32 %v2215_v49, %v1514_v45  ;;  %v2012_v45 = vld [vmem:[%s3437_s1 + $0x3f8] sm:$0xf0] }
  0x49   :  { %1028 = vmatpush.bf16.msra.mxu0 %v1927_v37  ;;  %1041 = vmatpush.bf16.msra.mxu1 %v2055_v38  ;;  %v1658_v37 = vld [vmem:[%s3437_s1 + $0x128] sm:$0xf]  ;;  %v1979_v38 = vor.u32 %v2331_v31, %v1978_v30  ;;  %v2323_v57 = vld [vmem:[%s3437_s1 + $0x374] sm:$0xf0] }
  0x4a   :  { %1050 = vmatpush.bf16.msra.mxu2 %v1611_v39  ;;  %v2251_v39 = vld [vmem:[%s3437_s1 + $0x134] sm:$0xf0]  ;;  %v1802_v6 = vld [vmem:[%s3437_s1 + $0x248] sm:$0xf] }
  0x4b   :  { %v1659_v46 = vor.u32 %v2251_v39, %v1658_v37  ;;  %v2355_v61 = vld [vmem:[%s3437_s1 + $0x474] sm:$0xf0]  ;;  %v2058_v11 = vld [vmem:[%s3437_s1 + $0x448] sm:$0xf]  ;;  %v2229_v37 = vld [vmem:[%s3437_s1 + $0x8c] sm:$0xf] }
  0x4c   :  { %1063 = vmatpush.bf16.msra.mxu3 %v1739_v43  ;;  %v2327_v43 = vld [vmem:[%s3437_s1 + $0x394] sm:$0xf0]  ;;  %v1786_v18 = vld [vmem:[%s3437_s1 + $0x228] sm:$0xf]  ;;  %v2273_v39 = vld [vmem:[%s3437_s1 + $0x1ec] sm:$0xf] }
  0x4d   :  { %1029 = vmatpush.bf16.msra.mxu0 %v1911_v50  ;;  %1042 = vmatpush.bf16.msra.mxu1 %v2039_v52  ;;  %v1642_v50 = vld [vmem:[%s3437_s1 + $0x108] sm:$0xf]  ;;  %v1963_v52 = vor.u32 %v2327_v43, %v1962_v42  ;;  %v2351_v12 = vld [vmem:[%s3437_s1 + $0x454] sm:$0xf0]  ;;  %v1884_v43 = vld [vmem:[%s3437_s1 + $0x2f8] sm:$0xf0] }
  0x4e   :  { %1051 = vmatpush.bf16.msra.mxu2 %v1595_v54  ;;  %v1818_v54 = vld [vmem:[%s3437_s1 + $0x268] sm:$0xf]  ;;  %v1643_v2 = vor.u32 %v2247_v51, %v1642_v50  ;;  %v2059_v17 = vor.u32 %v2351_v12, %v2058_v11  ;;  %v2283_v19 = vld [vmem:[%s3437_s1 + $0x234] sm:$0xf0]  ;;  %v1759_v50 = vor.u32 %v2273_v39, %v1756_v40  ;;  %v2225_v51 = vld [vmem:[%s3437_s1 + $0x6c] sm:$0xf] }
  0x4f   :  { %v1819_v3 = vor.u32 %v2291_v55, %v1818_v54  ;;  %v2042_v23 = vld [vmem:[%s3437_s1 + $0x428] sm:$0xf]  ;;  %v2347_v24 = vld [vmem:[%s3437_s1 + $0x434] sm:$0xf0]  ;;  %v1787_v27 = vor.u32 %v2283_v19, %v1786_v18  ;;  %v1887_v54 = vor.u32 %v2305_v41, %v1884_v43  ;;  %v2329_v11 = vld [vmem:[%s3437_s1 + $0x3ac] sm:$0xf] }
  0x50   :  { %1064 = vmatpush.bf16.msra.mxu3 %v1723_v58  ;;  %v2074_v58 = vld [vmem:[%s3437_s1 + $0x468] sm:$0xf]  ;;  %v2279_v29 = vld [vmem:[%s3437_s1 + $0x214] sm:$0xf0]  ;;  %v2043_v31 = vor.u32 %v2347_v24, %v2042_v23  ;;  %v1980_v12 = vld [vmem:[%s3437_s1 + $0x3b8] sm:$0xf0] }
  0x51   :  { %1030 = vmatpush.bf16.msra.mxu0 %v1895_v4  ;;  %1043 = vmatpush.bf16.msra.mxu1 %v2023_v7  ;;  %v1947_v4 = vor.u32 %v2323_v57, %v1946_v56  ;;  %v2075_v5 = vor.u32 %v2355_v61, %v2074_v58  ;;  %v2287_v7 = vld [vmem:[%s3437_s1 + $0x254] sm:$0xf0]  ;;  %v1770_v28 = vld [vmem:[%s3437_s1 + $0x208] sm:$0xf]  ;;  %v2269_v56 = vld [vmem:[%s3437_s1 + $0x1cc] sm:$0xf]  ;;  %v1983_v18 = vor.u32 %v2329_v11, %v1980_v12 }
  0x52   :  { %1052 = vmatpush.bf16.msra.mxu2 %v1579_v8  ;;  %v1930_v8 = vld [vmem:[%s3437_s1 + $0x348] sm:$0xf]  ;;  %v1803_v15 = vor.u32 %v2287_v7, %v1802_v6  ;;  %v2343_v36 = vld [vmem:[%s3437_s1 + $0x414] sm:$0xf0]  ;;  %v1771_v42 = vor.u32 %v2279_v29, %v1770_v28  ;;  %v1740_v57 = vld [vmem:[%s3437_s1 + $0x1d8] sm:$0xf0] }
  0x53   :  { %v2301_v58 = vld [vmem:[%s3437_s1 + $0x2cc] sm:$0xf]  ;;  %v1868_v61 = vld [vmem:[%s3437_s1 + $0x2d8] sm:$0xf0] }
  0x54   :  { %1065 = vmatpush.bf16.msra.mxu3 %v1707_v9  ;;  %1031 = vmatmul.bf16.vlgmr.msra.gmra.mxu0 %v2669_v60  ;;  %v1631_v9 = vor.u32 %v2241_v0, %v1628_v1  ;;  %v1996_v0 = vld [vmem:[%s3437_s1 + $0x3d8] sm:$0xf0]  ;;  %v2265_v7 = vld [vmem:[%s3437_s1 + $0x1ac] sm:$0xf] }
  0x55   :  { %1075 = vmatpush.bf16.msrb.mxu0 %v1883_v10  ;;  %1088 = vmatpush.bf16.msrb.mxu1 %v2011_v14  ;;  %v2319_v10 = vld [vmem:[%s3437_s1 + $0x354] sm:$0xf0]  ;;  %v1612_v14 = vld [vmem:[%s3437_s1 + $0xd8] sm:$0xf0]  ;;  %v2261_v19 = vld [vmem:[%s3437_s1 + $0x18c] sm:$0xf] }
  0x56   :  { %1053 = vmatpush.bf16.msra.mxu2 %v1563_v20  ;;  %2081 = vmatmul.msk.bf16.vlgmr.msra.gmra.mxu1 %vm915_vm0, %v2773_v48  ;;  %v1931_v16 = vor.u32 %v2319_v10, %v1930_v8  ;;  %v1914_v20 = vld [vmem:[%s3437_s1 + $0x328] sm:$0xf]  ;;  %v1724_v8 = vld [vmem:[%s3437_s1 + $0x1b8] sm:$0xf0]  ;;  %v2325_v23 = vld [vmem:[%s3437_s1 + $0x38c] sm:$0xf] }
  0x57   :  { %v1852_v10 = vld [vmem:[%s3437_s1 + $0x2b8] sm:$0xf0]  ;;  %v2253_v43 = vld [vmem:[%s3437_s1 + $0x14c] sm:$0xf] }
  0x58   :  { %1066 = vmatpush.bf16.msra.mxu3 %v1691_v21  ;;  %v1615_v21 = vor.u32 %v2237_v13, %v1612_v14  ;;  %v1727_v14 = vor.u32 %v2265_v7, %v1724_v8  ;;  %v1964_v24 = vld [vmem:[%s3437_s1 + $0x398] sm:$0xf0]  ;;  %v2245_v8 = vld [vmem:[%s3437_s1 + $0x10c] sm:$0xf] }
  0x59   :  { %1076 = vmatpush.bf16.msrb.mxu0 %v1867_v22  ;;  %1089 = vmatpush.bf16.msrb.mxu1 %v1995_v26  ;;  %v2315_v22 = vld [vmem:[%s3437_s1 + $0x334] sm:$0xf0]  ;;  %v1596_v26 = vld [vmem:[%s3437_s1 + $0xb8] sm:$0xf0]  ;;  %v2309_v12 = vld [vmem:[%s3437_s1 + $0x30c] sm:$0xf] }
  0x5a   :  { %1054 = vmatpush.bf16.msra.mxu2 %v1547_v32  ;;  %v1915_v30 = vor.u32 %v2315_v22, %v1914_v20  ;;  %v1898_v32 = vld [vmem:[%s3437_s1 + $0x308] sm:$0xf]  ;;  %v1599_v35 = vor.u32 %v2233_v25, %v1596_v26  ;;  %v1708_v20 = vld [vmem:[%s3437_s1 + $0x198] sm:$0xf0] }
  0x5b   :  { %v1836_v22 = vld [vmem:[%s3437_s1 + $0x298] sm:$0xf0]  ;;  %v1711_v26 = vor.u32 %v2261_v19, %v1708_v20 }
  0x5c   :  { %1067 = vmatpush.bf16.msra.mxu3 %v1675_v33  ;;  %v2311_v33 = vld [vmem:[%s3437_s1 + $0x314] sm:$0xf0]  ;;  %v1516_v28 = vld [vmem:[%s3437_s1 + $0x18] sm:$0xf0] }
  0x5d   :  { %1077 = vmatpush.bf16.msrb.mxu0 %v1851_v34  ;;  %1090 = vmatpush.bf16.msrb.mxu1 %v1979_v38  ;;  %v2026_v34 = vld [vmem:[%s3437_s1 + $0x408] sm:$0xf]  ;;  %v1580_v38 = vld [vmem:[%s3437_s1 + $0x98] sm:$0xf0] }
  0x5e   :  { %1055 = vmatpush.bf16.msra.mxu2 %v1531_v44  ;;  %v2337_v44 = vld [vmem:[%s3437_s1 + $0x3ec] sm:$0xf]  ;;  %v1583_v49 = vor.u32 %v2229_v37, %v1580_v38  ;;  %v2076_v38 = vld [vmem:[%s3437_s1 + $0x478] sm:$0xf0] }
  0x5f   :  { %v2015_v55 = vor.u32 %v2337_v44, %v2012_v45  ;;  %v2353_v37 = vld [vmem:[%s3437_s1 + $0x46c] sm:$0xf]  ;;  %v1676_v44 = vld [vmem:[%s3437_s1 + $0x158] sm:$0xf0] }
  0x60   :  { %1068 = vmatpush.bf16.msra.mxu3 %v1659_v46  ;;  %v1899_v46 = vor.u32 %v2311_v33, %v1898_v32  ;;  %v1692_v32 = vld [vmem:[%s3437_s1 + $0x178] sm:$0xf0]  ;;  %v2289_v33 = vld [vmem:[%s3437_s1 + $0x26c] sm:$0xf] }
  0x61   :  { %1078 = vmatpush.bf16.msrb.mxu0 %v1835_v47  ;;  %1091 = vmatpush.bf16.msrb.mxu1 %v1963_v52  ;;  %v2027_v47 = vor.u32 %v2343_v36, %v2026_v34  ;;  %v1564_v52 = vld [vmem:[%s3437_s1 + $0x78] sm:$0xf0]  ;;  %v2285_v45 = vld [vmem:[%s3437_s1 + $0x24c] sm:$0xf] }
  0x62   :  { %1056 = vmatpush.bf16.msra.mxu2 %v1515_v63  ;;  %v2333_v63 = vld [vmem:[%s3437_s1 + $0x3cc] sm:$0xf]  ;;  %v1567_v1 = vor.u32 %v2225_v51, %v1564_v52  ;;  %v1820_v34 = vld [vmem:[%s3437_s1 + $0x278] sm:$0xf0] }
  0x63   :  { %v1999_v6 = vor.u32 %v2333_v63, %v1996_v0  ;;  %v1948_v36 = vld [vmem:[%s3437_s1 + $0x378] sm:$0xf0]  ;;  %v1823_v41 = vor.u32 %v2289_v33, %v1820_v34  ;;  %v2349_v51 = vld [vmem:[%s3437_s1 + $0x44c] sm:$0xf] }
  0x64   :  { %1069 = vmatpush.bf16.msra.mxu3 %v1643_v2  ;;  %v1743_v2 = vor.u32 %v2269_v56, %v1740_v57  ;;  %v2060_v52 = vld [vmem:[%s3437_s1 + $0x458] sm:$0xf0]  ;;  %v2249_v57 = vld [vmem:[%s3437_s1 + $0x12c] sm:$0xf] }
  0x65   :  { %1079 = vmatpush.bf16.msrb.mxu0 %v1819_v3  ;;  %1092 = vmatpush.bf16.msrb.mxu1 %v1947_v4  ;;  %v2221_v3 = vld [vmem:[%s3437_s1 + $0x4c] sm:$0xf]  ;;  %v1548_v4 = vld [vmem:[%s3437_s1 + $0x58] sm:$0xf0]  ;;  %v2063_v63 = vor.u32 %v2349_v51, %v2060_v52 }
  0x66   :  { %1105 = vmatpush.bf16.msrb.mxu2 %v2075_v5  ;;  %v1871_v5 = vor.u32 %v2301_v58, %v1868_v61  ;;  %v1551_v13 = vor.u32 %v2221_v3, %v1548_v4  ;;  %v1660_v58 = vld [vmem:[%s3437_s1 + $0x138] sm:$0xf0]  ;;  %v2281_v61 = vld [vmem:[%s3437_s1 + $0x22c] sm:$0xf] }
  0x67   :  { %1057 = vmatmul.bf16.vlgmr.msra.gmra.mxu2 %v2650_v53  ;;  %1070 = vmatmul.bf16.vlgmr.msra.gmra.mxu3 %v2671_v62  ;;  %v1788_v0 = vld [vmem:[%s3437_s1 + $0x238] sm:$0xf0]  ;;  %v2345_v3 = vld [vmem:[%s3437_s1 + $0x42c] sm:$0xf] }
  0x68   :  { %1114 = vmatpush.bf16.msrb.mxu3 %v1631_v9  ;;  %v2297_v9 = vld [vmem:[%s3437_s1 + $0x2ac] sm:$0xf]  ;;  %v2044_v4 = vld [vmem:[%s3437_s1 + $0x438] sm:$0xf0] }
  0x69   :  { %1080 = vmatpush.bf16.msrb.mxu0 %v1803_v15  ;;  %1093 = vmatpush.bf16.msrb.mxu1 %v1931_v16  ;;  %v2217_v15 = vld [vmem:[%s3437_s1 + $0x2c] sm:$0xf]  ;;  %v1532_v16 = vld [vmem:[%s3437_s1 + $0x38] sm:$0xf0] }
  0x6a   :  { %1106 = vmatpush.bf16.msrb.mxu2 %v2059_v17  ;;  %v1855_v17 = vor.u32 %v2297_v9, %v1852_v10  ;;  %v1535_v25 = vor.u32 %v2217_v15, %v1532_v16  ;;  %v2277_v9 = vld [vmem:[%s3437_s1 + $0x20c] sm:$0xf]  ;;  %v2047_v10 = vor.u32 %v2345_v3, %v2044_v4  ;;  %v1772_v11 = vld [vmem:[%s3437_s1 + $0x218] sm:$0xf0] }
  0x6b   :  { %v2028_v15 = vld [vmem:[%s3437_s1 + $0x418] sm:$0xf0] }
  0x6c   :  { %1115 = vmatpush.bf16.msrb.mxu3 %v1615_v21  ;;  %v2293_v21 = vld [vmem:[%s3437_s1 + $0x28c] sm:$0xf]  ;;  %v2363_v20 = vld [vmem:[%s3439_s3 + $0x38] sm:$0xff] }
  0x6d   :  { %1081 = vmatpush.bf16.msrb.mxu0 %v1787_v27  ;;  %1094 = vmatpush.bf16.msrb.mxu1 %v1915_v30  ;;  %v2213_v27 = vld [vmem:[%s3437_s1 + $0xc] sm:$0xf]  ;;  %v1839_v29 = vor.u32 %v2293_v21, %v1836_v22  ;;  %v1967_v30 = vor.u32 %v2325_v23, %v1964_v24  ;;  %v2362_v21 = vld [vmem:[%s3439_s3 + $0x30] sm:$0xff]  ;;  %v2360_v23 = vld [vmem:[%s3439_s3 + $0x20] sm:$0xff] }
  0x6e   :  { %1107 = vmatpush.bf16.msrb.mxu2 %v2043_v31  ;;  %v2257_v31 = vld [vmem:[%s3437_s1 + $0x16c] sm:$0xf]  ;;  %v1519_v39 = vor.u32 %v2213_v27, %v1516_v28  ;;  %v3353_v24 = vld [vmem:[%s3440_s2] sm:$0xf]  ;;  %v2367_v34 = vld [vmem:[%s3439_s3 + $0x58] sm:$0xff] }
  0x6f   :  { %v1695_v40 = vor.u32 %v2257_v31, %v1692_v32  ;;  %v2361_v22 = vld [vmem:[%s3439_s3 + $0x28] sm:$0xff]  ;;  %v2379_v51 = vld [vmem:[%s3439_s3 + $0xb8] sm:$0xff] }
  0x70   :  { %1116 = vmatpush.bf16.msrb.mxu3 %v1599_v35  ;;  %v2321_v35 = vld [vmem:[%s3437_s1 + $0x36c] sm:$0xf]  ;;  %v2375_v4 = vld [vmem:[%s3439_s3 + $0x98] sm:$0xff] }
  0x71   :  { %1082 = vmatpush.bf16.msrb.mxu0 %v1771_v42  ;;  %1095 = vmatpush.bf16.msrb.mxu1 %v1899_v46  ;;  %v1951_v42 = vor.u32 %v2321_v35, %v1948_v36  ;;  %v2079_v46 = vor.u32 %v2353_v37, %v2076_v38  ;;  %v2369_v27 = vld [vmem:[%s3439_s3 + $0x68] sm:$0xff]  ;;  %v2366_v38 = vld [vmem:[%s3439_s3 + $0x50] sm:$0xff] }
  0x72   :  { %1108 = vmatpush.bf16.msrb.mxu2 %v2027_v47  ;;  %v1804_v47 = vld [vmem:[%s3437_s1 + $0x258] sm:$0xf0] }
  0x74   :  { %1117 = vmatpush.bf16.msrb.mxu3 %v1583_v49  ;;  %1083 = vmatmul.bf16.vlgmr.msrb.gmra.mxu0 %v2667_v59  ;;  %v2317_v49 = vld [vmem:[%s3437_s1 + $0x34c] sm:$0xf] }
  0x75   :  { %1127 = vmatpush.bf16.msra.mxu0 %v1759_v50  ;;  %1140 = vmatpush.bf16.msra.mxu1 %v1887_v54  ;;  %v1932_v50 = vld [vmem:[%s3437_s1 + $0x358] sm:$0xf0]  ;;  %v1679_v54 = vor.u32 %v2253_v43, %v1676_v44  ;;  %v2365_v44 = vld [vmem:[%s3439_s3 + $0x48] sm:$0xff] }
  0x76   :  { %1153 = vmatpush.bf16.msra.mxu2 %v2015_v55  ;;  %1096 = vmatmul.bf16.vlgmr.msrb.gmra.mxu1 %v2669_v60  ;;  %v1807_v55 = vor.u32 %v2285_v45, %v1804_v47  ;;  %v1935_v56 = vor.u32 %v2317_v49, %v1932_v50  ;;  %v2364_v47 = vld [vmem:[%s3439_s3 + $0x40] sm:$0xff] }
  0x77   :  { %2082 = vmatmul.msk.bf16.vlgmr.msrb.gmra.mxu2 %vm915_vm0, %v2773_v48 }
  0x78   :  { %1118 = vmatpush.bf16.msrb.mxu3 %v1567_v1  ;;  %v2313_v1 = vld [vmem:[%s3437_s1 + $0x32c] sm:$0xf] }
  0x79   :  { %1128 = vmatpush.bf16.msra.mxu0 %v1743_v2  ;;  %1141 = vmatpush.bf16.msra.mxu1 %v1871_v5  ;;  %v1916_v2 = vld [vmem:[%s3437_s1 + $0x338] sm:$0xf0]  ;;  %v1663_v5 = vor.u32 %v2249_v57, %v1660_v58  ;;  %v2377_v58 = vld [vmem:[%s3439_s3 + $0xa8] sm:$0xff] }
  0x7a   :  { %1154 = vmatpush.bf16.msra.mxu2 %v1999_v6  ;;  %v1791_v6 = vor.u32 %v2281_v61, %v1788_v0  ;;  %v1919_v7 = vor.u32 %v2313_v1, %v1916_v2  ;;  %v2376_v61 = vld [vmem:[%s3439_s3 + $0xa0] sm:$0xff] }
  0x7c   :  { %1119 = vmatpush.bf16.msrb.mxu3 %v1551_v13  ;;  %v1900_v13 = vld [vmem:[%s3437_s1 + $0x318] sm:$0xf0] }
  0x7d   :  { %1129 = vmatpush.bf16.msra.mxu0 %v1727_v14  ;;  %1142 = vmatpush.bf16.msra.mxu1 %v1855_v17  ;;  %v2341_v14 = vld [vmem:[%s3437_s1 + $0x40c] sm:$0xf]  ;;  %v1775_v17 = vor.u32 %v2277_v9, %v1772_v11 }
  0x7e   :  { %1155 = vmatpush.bf16.msra.mxu2 %v1983_v18  ;;  %v1903_v18 = vor.u32 %v2309_v12, %v1900_v13  ;;  %v2031_v19 = vor.u32 %v2341_v14, %v2028_v15  ;;  %v2373_v11 = vld [vmem:[%s3439_s3 + $0x88] sm:$0xff]  ;;  %v2372_v15 = vld [vmem:[%s3439_s3 + $0x80] sm:$0xff] }
  0x80   :  { %1120 = vmatpush.bf16.msrb.mxu3 %v1535_v25  ;;  %v2357_v25 = vld [vmem:[%s3439_s3 + $0x8] sm:$0xff] }
  0x81   :  { %1130 = vmatpush.bf16.msra.mxu0 %v1711_v26  ;;  %1143 = vmatpush.bf16.msra.mxu1 %v1839_v29  ;;  %v170_v26 = vperm.slane %v3353_v24, 0  ;;  %v2356_v29 = vld [vmem:[%s3439_s3] sm:$0xff] }
  0x82   :  { %1156 = vmatpush.bf16.msra.mxu2 %v1967_v30  ;;  %v2368_v30 = vld [vmem:[%s3439_s3 + $0x60] sm:$0xff] }
  0x84   :  { %1121 = vmatpush.bf16.msrb.mxu3 %v1519_v39 }
  0x85   :  { %1131 = vmatpush.bf16.msra.mxu0 %v1695_v40  ;;  %1144 = vmatpush.bf16.msra.mxu1 %v1823_v41 }
  0x86   :  { %1157 = vmatpush.bf16.msra.mxu2 %v1951_v42 }
  0x87   :  { %1122 = vmatmul.bf16.vlgmr.msrb.gmra.mxu3 %v2650_v53  ;;  %v1644_v53 = vld [vmem:[%s3437_s1 + $0x118] sm:$0xf0] }
  0x88   :  { %1170 = vmatpush.bf16.msra.mxu3 %v2079_v46  ;;  %v1647_v16 = vor.u32 %v2245_v8, %v1644_v53 }
  0x89   :  { %1132 = vmatpush.bf16.msra.mxu0 %v1679_v54  ;;  %1145 = vmatpush.bf16.msra.mxu1 %v1807_v55  ;;  %v2378_v54 = vld [vmem:[%s3439_s3 + $0xb0] sm:$0xff]  ;;  %v171_v55 = vperm.slane %v3353_v24, 1 }
  0x8a   :  { %1158 = vmatpush.bf16.msra.mxu2 %v1935_v56 }
  0x8c   :  { %1171 = vmatpush.bf16.msra.mxu3 %v2063_v63 }
  0x8d   :  { %1133 = vmatpush.bf16.msra.mxu0 %v1663_v5  ;;  %1146 = vmatpush.bf16.msra.mxu1 %v1791_v6  ;;  %v2374_v6 = vld [vmem:[%s3439_s3 + $0x90] sm:$0xff] }
  0x8e   :  { %1159 = vmatpush.bf16.msra.mxu2 %v1919_v7 }
  0x90   :  { %1172 = vmatpush.bf16.msra.mxu3 %v2047_v10 }
  0x91   :  { %1134 = vmatpush.bf16.msra.mxu0 %v1647_v16  ;;  %1147 = vmatpush.bf16.msra.mxu1 %v1775_v17  ;;  %v2387_v16 = vld [vmem:[%s3439_s3 + $0xf8] sm:$0xff] }
  0x92   :  { %1160 = vmatpush.bf16.msra.mxu2 %v1903_v18  ;;  %v2386_v18 = vld [vmem:[%s3439_s3 + $0xf0] sm:$0xff] }
  0x94   :  { %1173 = vmatpush.bf16.msra.mxu3 %v2031_v19  ;;  %1135 = vmatmul.bf16.vlgmr.msra.gmra.mxu0 %v2671_v62  ;;  %v2370_v62 = vld [vmem:[%s3439_s3 + $0x70] sm:$0xff]  ;;  %v2385_v19 = vld [vmem:[%s3439_s3 + $0xe8] sm:$0xff] }
  0x95   :  { %1447 = vmatpush.bf16.msrb.mxu0 %v2363_v20  ;;  %1148 = vmatmul.bf16.vlgmr.msra.gmra.mxu1 %v2667_v59  ;;  %v2359_v59 = vld [vmem:[%s3439_s3 + $0x18] sm:$0xff]  ;;  %v172_v20 = vperm.slane %v3353_v24, 2 }
  0x96   :  { %1161 = vmatmul.bf16.vlgmr.msra.gmra.mxu2 %v2669_v60  ;;  %v2371_v60 = vld [vmem:[%s3439_s3 + $0x78] sm:$0xff] }
  0x97   :  { %2083 = vmatmul.msk.bf16.vlgmr.msra.gmra.mxu3 %vm915_vm0, %v2773_v48  ;;  %1460 = vmatpush.bf16.msrb.mxu1 %v2371_v60  ;;  %v2358_v48 = vld [vmem:[%s3439_s3 + $0x10] sm:$0xff]  ;;  %v2383_v60 = vld [vmem:[%s3439_s3 + $0xd8] sm:$0xff] }
  0x98   :  { %1473 = vmatpush.bf16.msrb.mxu2 %v2379_v51  ;;  %1486 = vmatpush.bf16.msrb.mxu3 %v2387_v16 }
  0x99   :  { %1448 = vmatpush.bf16.msrb.mxu0 %v2362_v21 }
  0x9b   :  { %1461 = vmatpush.bf16.msrb.mxu1 %v2370_v62 }
  0x9c   :  { %1474 = vmatpush.bf16.msrb.mxu2 %v2378_v54  ;;  %1487 = vmatpush.bf16.msrb.mxu3 %v2386_v18 }
  0x9d   :  { %1449 = vmatpush.bf16.msrb.mxu0 %v2361_v22  ;;  %v2384_v22 = vld [vmem:[%s3439_s3 + $0xe0] sm:$0xff] }
  0x9f   :  { %1462 = vmatpush.bf16.msrb.mxu1 %v2369_v27 }
  0xa0   :  { %1475 = vmatpush.bf16.msrb.mxu2 %v2377_v58  ;;  %1488 = vmatpush.bf16.msrb.mxu3 %v2385_v19 }
  0xa1   :  { %1450 = vmatpush.bf16.msrb.mxu0 %v2360_v23 }
  0xa3   :  { %v928_v28 = vpop.f32.mrf.mxu0  ;;  %1463 = vmatpush.bf16.msrb.mxu1 %v2368_v30  ;;  %v2381_v30 = vld [vmem:[%s3439_s3 + $0xc8] sm:$0xff] }
  0xa4   :  { %v929_v31 = vadd.f32 %v928_v28, %v170_v26  ;;  %1476 = vmatpush.bf16.msrb.mxu2 %v2376_v61  ;;  %1489 = vmatpush.bf16.msrb.mxu3 %v2384_v22  ;;  %v2382_v26 = vld [vmem:[%s3439_s3 + $0xd0] sm:$0xff] }
  0xa5   :  { %1451 = vmatpush.bf16.msrb.mxu0 %v2359_v59  ;;  %v941_v32 = vpop.f32.mrf.mxu1 }
  0xa6   :  { %v942_v33 = vadd.f32 %v941_v32, %v929_v31 }
  0xa7   :  { %1464 = vmatpush.bf16.msrb.mxu1 %v2367_v34  ;;  %v2380_v34 = vld [vmem:[%s3439_s3 + $0xc0] sm:$0xff] }
  0xa8   :  { %1477 = vmatpush.bf16.msrb.mxu2 %v2375_v4  ;;  %1490 = vmatpush.bf16.msrb.mxu3 %v2383_v60 }
  0xa9   :  { %1452 = vmatpush.bf16.msrb.mxu0 %v2358_v48 }
  0xaa   :  { %v954_v35 = vpop.f32.mrf.mxu2  ;;  %v967_v36 = vpop.f32.mrf.mxu3 }
  0xab   :  { %v930_v37 = vpop.f32.mrf.mxu0  ;;  %v955_v39 = vadd.f32 %v954_v35, %v942_v33  ;;  %1465 = vmatpush.bf16.msrb.mxu1 %v2366_v38 }
  0xac   :  { %1478 = vmatpush.bf16.msrb.mxu2 %v2374_v6  ;;  %1491 = vmatpush.bf16.msrb.mxu3 %v2382_v26 }
  0xad   :  { %1453 = vmatpush.bf16.msrb.mxu0 %v2357_v25  ;;  %v943_v40 = vpop.f32.mrf.mxu1  ;;  %v968_v41 = vadd.f32 %v967_v36, %v955_v39 }
  0xaf   :  { %1466 = vmatpush.bf16.msrb.mxu1 %v2365_v44 }
  0xb0   :  { %1479 = vmatpush.bf16.msrb.mxu2 %v2373_v11  ;;  %1492 = vmatpush.bf16.msrb.mxu3 %v2381_v30 }
  0xb1   :  { %1454 = vmatpush.bf16.msrb.mxu0 %v2356_v29 }
  0xb2   :  { %v956_v42 = vpop.f32.mrf.mxu2  ;;  %v969_v43 = vpop.f32.mrf.mxu3 }
  0xb3   :  { %v980_v45 = vpop.f32.mrf.mxu0  ;;  %1467 = vmatpush.bf16.msrb.mxu1 %v2364_v47 }
  0xb4   :  { %v981_v46 = vadd.f32 %v980_v45, %v968_v41  ;;  %1480 = vmatpush.bf16.msrb.mxu2 %v2372_v15  ;;  %1493 = vmatpush.bf16.msrb.mxu3 %v2380_v34  ;;  %v173_v41 = vperm.slane %v3353_v24, 3  ;;  %v2388_v24 = vld [vmem:[%s3441_s4] ss:$0 sm:$0xff] }
  0xb6   :  { %v1179_v49 = vmax.f32 %v981_v46, 0.0 }
  0xb8   :  { %v1183_v50 = vpack.c.bf16 %v1179_v49, %v1179_v49 }
  0xba   :  { %1455 = vmatmul.bf16.vlgmr.msrb.gmra.mxu0 %v1183_v50 }
  0xbb   :  { %v982_v52 = vpop.f32.mrf.mxu0 }
  0xc1   :  { %v993_v56 = vpop.f32.mrf.mxu1 }
  0xc2   :  { %v994_v57 = vadd.f32 %v993_v56, %v171_v55 }
  0xc9   :  { %v995_v1 = vpop.f32.mrf.mxu1 }
  0xca   :  { %v1006_v63 = vpop.f32.mrf.mxu2  ;;  %v1019_v0 = vpop.f32.mrf.mxu3 }
  0xcb   :  { %v1007_v2 = vadd.f32 %v1006_v63, %v994_v57 }
  0xcd   :  { %v1020_v3 = vadd.f32 %v1019_v0, %v1007_v2 }
  0xd1   :  { %v1032_v5 = vpop.f32.mrf.mxu0 }
  0xd2   :  { %v1033_v7 = vadd.f32 %v1032_v5, %v1020_v3  ;;  %v1008_v8 = vpop.f32.mrf.mxu2  ;;  %v1021_v53 = vpop.f32.mrf.mxu3 }
  0xd3   :  { %v1045_v9 = vpop.f32.mrf.mxu1 }
  0xd4   :  { %v1046_v10 = vadd.f32 %v1045_v9, %v1033_v7 }
  0xd6   :  { %v1180_v12 = vmax.f32 %v1046_v10, 0.0 }
  0xd8   :  { %v1184_v14 = vpack.c.bf16 %v1180_v12, %v1180_v12 }
  0xd9   :  { %v1034_v13 = vpop.f32.mrf.mxu0 }
  0xda   :  { %1468 = vmatmul.bf16.vlgmr.msrb.gmra.mxu1 %v1184_v14 }
  0xdb   :  { %v1047_v17 = vpop.f32.mrf.mxu1 }
  0xea   :  { %v1058_v21 = vpop.f32.mrf.mxu2  ;;  %v1071_v23 = vpop.f32.mrf.mxu3 }
  0xeb   :  { %v1059_v59 = vadd.f32 %v1058_v21, %v172_v20 }
  0xed   :  { %v1072_v62 = vadd.f32 %v1071_v23, %v1059_v59 }
  0xf1   :  { %v1084_v25 = vpop.f32.mrf.mxu0 }
  0xf2   :  { %v1060_v48 = vpop.f32.mrf.mxu2  ;;  %v1073_v27 = vpop.f32.mrf.mxu3  ;;  %v1085_v29 = vadd.f32 %v1084_v25, %v1072_v62 }
  0xf3   :  { %v1097_v28 = vpop.f32.mrf.mxu1 }
  0xf4   :  { %v1098_v31 = vadd.f32 %v1097_v28, %v1085_v29 }
  0xf9   :  { %v1086_v32 = vpop.f32.mrf.mxu0 }
  0xfa   :  { %v1110_v35 = vpop.f32.mrf.mxu2 }
  0xfb   :  { %v1099_v33 = vpop.f32.mrf.mxu1  ;;  %v1111_v36 = vadd.f32 %v1110_v35, %v1098_v31 }
  0xfd   :  { %v1181_v37 = vmax.f32 %v1111_v36, 0.0 }
  0xff   :  { %v1185_v38 = vpack.c.bf16 %v1181_v37, %v1181_v37 }
 0x101   :  { %1481 = vmatmul.bf16.vlgmr.msrb.gmra.mxu2 %v1185_v38 }
 0x102   :  { %v1112_v39 = vpop.f32.mrf.mxu2 }
 0x10a   :  { %v1123_v40 = vpop.f32.mrf.mxu3 }
 0x10b   :  { %v1124_v42 = vadd.f32 %v1123_v40, %v173_v41 }
 0x111   :  { %v1136_v43 = vpop.f32.mrf.mxu0 }
 0x112   :  { %v1149_v44 = vpop.f32.mrf.mxu1  ;;  %v1137_v45 = vadd.f32 %v1136_v43, %v1124_v42  ;;  %v1125_v46 = vpop.f32.mrf.mxu3 }
 0x114   :  { %v1150_v47 = vadd.f32 %v1149_v44, %v1137_v45 }
 0x119   :  { %v1162_v49 = vpop.f32.mrf.mxu2  ;;  %v1138_v51 = vpop.f32.mrf.mxu0 }
 0x11a   :  { %v1163_v50 = vadd.f32 %v1162_v49, %v1150_v47  ;;  %v1151_v52 = vpop.f32.mrf.mxu1  ;;  %v1175_v54 = vpop.f32.mrf.mxu3 }
 0x11c   :  { %v1176_v55 = vadd.f32 %v1175_v54, %v1163_v50 }
 0x11e   :  { %v1182_v56 = vmax.f32 %v1176_v55, 0.0 }
 0x120   :  { %v1186_v57 = vpack.c.bf16 %v1182_v56, %v1182_v56 }
 0x121   :  { %v1164_v58 = vpop.f32.mrf.mxu2 }
 0x122   :  { %1494 = vmatmul.bf16.vlgmr.msrb.gmra.mxu3 %v1186_v57  ;;  %v1177_v61 = vpop.f32.mrf.mxu3 }
 0x137   :  { %v1456_v63 = vpop.f32.mrf.mxu0 }
 0x138   :  { %v1457_v1 = vadd.f32 %v2388_v24, %v1456_v63 }
 0x13f   :  { %v1458_v0 = vpop.f32.mrf.mxu0 }
 0x157   :  { %v1469_v2 = vpop.f32.mrf.mxu1 }
 0x158   :  { %v1470_v3 = vadd.f32 %v1469_v2, %v1457_v1 }
 0x15f   :  { %v1471_v4 = vpop.f32.mrf.mxu1 }
 0x184   :  { %v1482_v5 = vpop.f32.mrf.mxu2 }
 0x185   :  { %v1483_v7 = vadd.f32 %v1482_v5, %v1470_v3 }
 0x18c   :  { %v1484_v6 = vpop.f32.mrf.mxu2 }
 0x1a5   :  { %v1495_v8 = vpop.f32.mrf.mxu3 }
 0x1a6   :  { %v1496_v53 = vadd.f32 %v1495_v8, %v1483_v7 }
 0x1a8   :  { %1499 = vst [vmem:[%s3442_s5] sm:$0xff] %v1496_v53 }
 0x1ad   :  { %v1497_v9 = vpop.f32.mrf.mxu3 }

</bundles_post_ra>
